<compile_context>
chip_gen: v5e
topology: v5e:2x2
jax: 0.10.0
libtpu: 0.0.40
codegen_flags: <defaults>
</compile_context>

<pallas_src>
import functools

import jax
import jax.numpy as jnp
from jax import lax
from jax.experimental import pallas as pl
from jax.experimental.pallas import tpu as pltpu

# Interior of the padded VMEM scratches starts at this 8-aligned sublane offset
# so the activation store into the scratch is a tile-aligned (unmasked) store.
_PADL = 8
_MXU_DTYPE = jnp.bfloat16          # matmul operand dtype (accumulation is f32)


def _im2col_3x3(xpad, H, W, c):
    """(H+2, Wp, c) padded activation -> (H*W, 9*c) wide-K patch for a 3x3 conv."""
    taps = []
    for dh in range(3):
        for dw in range(3):
            c0 = _PADL - 1 + dw
            taps.append(xpad[dh:dh + H, c0:c0 + W, :].reshape(H * W, c))
    # lane-axis concat: turns 9 small matmuls into one K=9*c MXU push
    return jnp.concatenate(taps, axis=-1)


# -----------------------------------------------------------------------------
# Fused kernel: one batch element per grid step.
#   x_ref   : (1, H, W, Cin)        input tile
#   w1_ref  : (9*Cin, Cout) bf16    conv1 weights, HWIO flattened to wide-K
#   s1,b1   : (1, Cout)             folded BN1 scale / bias
#   w2_ref  : (9*Cout, Cout) bf16   conv2 weights
#   s2,b2   : (1, Cout)             folded BN2 scale / bias
#   sew1    : (Cout, Cr), seb1 (1, Cr), sew2 (Cr, Cout), seb2 (1, Cout)
#   o_ref   : (1, H, W, Cout)
#   xpad_ref  : VMEM (H+2, W+2*PADL, Cin)   zero-padded input scratch
#   y1pad_ref : VMEM (H+2, W+2*PADL, Cout)  zero-padded conv1 activation scratch
# -----------------------------------------------------------------------------
def conv_block_kernel(x_ref, w1_ref, s1_ref, b1_ref,
                      w2_ref, s2_ref, b2_ref,
                      sew1_ref, seb1_ref, sew2_ref, seb2_ref,
                      o_ref, xpad_ref, y1pad_ref, *, H, W):
    cin = x_ref.shape[-1]
    cout = o_ref.shape[-1]

    # ---- stage 0: zero-pad the input inside VMEM (replaces jnp.pad in HBM) ----
    xpad_ref[...] = jnp.zeros_like(xpad_ref)
    xpad_ref[1:1 + H, _PADL:_PADL + W, :] = x_ref[0]

    # ---- stage 1: conv1 3x3 (pad=1) + BN + ReLU, single K=9*Cin matmul --------
    patch1 = _im2col_3x3(xpad_ref[...], H, W, cin).astype(_MXU_DTYPE)
    y1 = jnp.dot(patch1, w1_ref[...], preferred_element_type=jnp.float32)
    y1 = jnp.maximum(y1 * s1_ref[0] + b1_ref[0], 0.0)          # f32 epilogue

    # keep the conv1 activation in a padded VMEM scratch — no HBM round trip
    y1pad_ref[...] = jnp.zeros_like(y1pad_ref)
    y1pad_ref[1:1 + H, _PADL:_PADL + W, :] = y1.reshape(H, W, cout)

    # ---- stage 2: conv2 3x3 (pad=1) + BN + ReLU, single K=9*Cout matmul -------
    patch2 = _im2col_3x3(y1pad_ref[...], H, W, cout).astype(_MXU_DTYPE)
    y2 = jnp.dot(patch2, w2_ref[...], preferred_element_type=jnp.float32)
    y2 = jnp.maximum(y2 * s2_ref[0] + b2_ref[0], 0.0)          # (H*W, Cout) f32

    # ---- stage 3: squeeze-excitation as an epilogue (f32) ---------------------
    m = jnp.mean(y2, axis=0, keepdims=True)                    # (1, Cout) GAP
    h = jnp.dot(m, sew1_ref[...], preferred_element_type=jnp.float32) + seb1_ref[...]
    h = jnp.maximum(h, 0.0)                                    # (1, Cr)
    s = jnp.dot(h, sew2_ref[...], preferred_element_type=jnp.float32) + seb2_ref[...]
    s = jax.nn.sigmoid(s)                                      # (1, Cout)

    o_ref[0] = (y2 * s).reshape(H, W, cout).astype(o_ref.dtype)


def conv_block_fused(x_nhwc, params):
    N, H, W, Cin = x_nhwc.shape
    Cout = params["w2"].shape[-1]
    Cr = params["se_w1"].shape[-1]
    Wp = W + 2 * _PADL                       # padded scratch width (>= PADL + W + 1)

    # HWIO (3,3,Ci,Co) -> wide-K (9*Ci, Co); row order (dh, dw, ci) matches im2col
    w1f = params["w1"].reshape(9 * Cin, Cout).astype(_MXU_DTYPE)
    w2f = params["w2"].reshape(9 * Cout, Cout).astype(_MXU_DTYPE)

    kern = functools.partial(conv_block_kernel, H=H, W=W)
    return pl.pallas_call(
        kern,
        out_shape=jax.ShapeDtypeStruct((N, H, W, Cout), jnp.float32),
        grid_spec=pltpu.PrefetchScalarGridSpec(
            num_scalar_prefetch=0,
            grid=(N,),
            in_specs=[
                pl.BlockSpec((1, H, W, Cin), lambda n: (n, 0, 0, 0)),
                pl.BlockSpec((9 * Cin, Cout), lambda n: (0, 0)),
                pl.BlockSpec((1, Cout), lambda n: (0, 0)),
                pl.BlockSpec((1, Cout), lambda n: (0, 0)),
                pl.BlockSpec((9 * Cout, Cout), lambda n: (0, 0)),
                pl.BlockSpec((1, Cout), lambda n: (0, 0)),
                pl.BlockSpec((1, Cout), lambda n: (0, 0)),
                pl.BlockSpec((Cout, Cr), lambda n: (0, 0)),
                pl.BlockSpec((1, Cr), lambda n: (0, 0)),
                pl.BlockSpec((Cr, Cout), lambda n: (0, 0)),
                pl.BlockSpec((1, Cout), lambda n: (0, 0)),
            ],
            out_specs=pl.BlockSpec((1, H, W, Cout), lambda n: (n, 0, 0, 0)),
            scratch_shapes=[
                pltpu.VMEM((H + 2, Wp, Cin), jnp.float32),
                pltpu.VMEM((H + 2, Wp, Cout), jnp.float32),
            ],
        ),
        compiler_params=pltpu.CompilerParams(
            dimension_semantics=("parallel",),
            vmem_limit_bytes=32 * 1024 * 1024,
        ),
    )(x_nhwc, w1f,
      params["bn1_scale"], params["bn1_bias"],
      w2f, params["bn2_scale"], params["bn2_bias"],
      params["se_w1"], params["se_b1"], params["se_w2"], params["se_b2"])


# -----------------------------------------------------------------------------
# Parameter init (deterministic, mirrors the PyTorch __init__)
# -----------------------------------------------------------------------------
def kaiming_normal_fan_out(key, shape_hwio):
    # kaiming_normal_(mode='fan_out', nonlinearity='relu'): std = sqrt(2 / (out_c*kH*kW))
    kh, kw, _, out_c = shape_hwio
    std = (2.0 / (out_c * kh * kw)) ** 0.5
    return std * jax.random.normal(key, shape_hwio, dtype=jnp.float32)


def make_params(key, in_c, out_c, reduction=16):
    ks = jax.random.split(key, 4)
    eps = 1e-5
    # BN in eval mode with default stats: scale = 1/sqrt(1+eps), bias = 0
    bn_scale = jnp.full((1, out_c), 1.0 / jnp.sqrt(1.0 + eps), jnp.float32)
    bn_bias = jnp.zeros((1, out_c), jnp.float32)
    cr = out_c // reduction
    return {
        "w1": kaiming_normal_fan_out(ks[0], (3, 3, in_c, out_c)),
        "bn1_scale": bn_scale, "bn1_bias": bn_bias,
        "w2": kaiming_normal_fan_out(ks[1], (3, 3, out_c, out_c)),
        "bn2_scale": bn_scale, "bn2_bias": bn_bias,
        # SE 1x1 convs: stored as (Cin, Cout) matrices; biases zero-init.
        "se_w1": kaiming_normal_fan_out(ks[2], (1, 1, out_c, cr))[0, 0],
        "se_b1": jnp.zeros((1, cr), jnp.float32),
        "se_w2": kaiming_normal_fan_out(ks[3], (1, 1, cr, out_c))[0, 0],
        "se_b2": jnp.zeros((1, out_c), jnp.float32),
    }


@jax.jit
def conv_block_forward(x_nchw, params):
    x = jnp.transpose(x_nchw, (0, 2, 3, 1)).astype(jnp.float32)   # NCHW -> NHWC
    y = conv_block_fused(x, params)
    return jnp.transpose(y, (0, 3, 1, 2))                         # back to NCHW


# -----------------------------------------------------------------------------
# Pure-JAX reference (f32) for a sanity check
# -----------------------------------------------------------------------------
def conv_block_reference(x_nchw, params):
    x = jnp.transpose(x_nchw, (0, 2, 3, 1)).astype(jnp.float32)
    dn = ("NHWC", "HWIO", "NHWC")

    def cbr(x, w, s, b):
        y = lax.conv_general_dilated(x, w, (1, 1), "SAME", dimension_numbers=dn)
        return jnp.maximum(y * s[0] + b[0], 0.0)

    x = cbr(x, params["w1"], params["bn1_scale"], params["bn1_bias"])
    x = cbr(x, params["w2"], params["bn2_scale"], params["bn2_bias"])
    m = jnp.mean(x, axis=(1, 2))                                   # (N, C)
    h = jnp.maximum(m @ params["se_w1"] + params["se_b1"][0], 0.0)
    s = jax.nn.sigmoid(h @ params["se_w2"] + params["se_b2"][0])   # (N, C)
    x = x * s[:, None, None, :]
    return jnp.transpose(x, (0, 3, 1, 2))


if __name__ == "__main__":
    key = jax.random.PRNGKey(0)
    kx, kp = jax.random.split(key)

    N, Cin, H, W = 2, 4, 16, 16
    Cout = 32                                    # reduction=16 -> SE hidden = 2

    x = jax.random.normal(kx, (N, Cin, H, W), dtype=jnp.float32)
    params = make_params(kp, Cin, Cout)

    out = jax.block_until_ready(conv_block_forward(x, params))
    ref = conv_block_reference(x, params)

    assert out.shape == (N, Cout, H, W)
    # bf16 MXU operands (f32 accumulation) -> loosened tolerance vs the f32 reference.
    max_err = float(jnp.max(jnp.abs(out - ref)))
    assert jnp.allclose(out, ref, atol=5e-2, rtol=5e-2), max_err

    print("KERNEL_OK")
</pallas_src>

<mosaic_0001>
module attributes {stable_mosaic.version = 11 : i64} {
  func.func @conv_block_kernel(%arg0: i32, %arg1: memref<1x16x16x4xf32, #tpu.memory_space<vmem>>, %arg2: memref<36x32xbf16, #tpu.memory_space<vmem>>, %arg3: memref<1x32xf32, #tpu.memory_space<vmem>>, %arg4: memref<1x32xf32, #tpu.memory_space<vmem>>, %arg5: memref<288x32xbf16, #tpu.memory_space<vmem>>, %arg6: memref<1x32xf32, #tpu.memory_space<vmem>>, %arg7: memref<1x32xf32, #tpu.memory_space<vmem>>, %arg8: memref<32x2xf32, #tpu.memory_space<vmem>>, %arg9: memref<1x2xf32, #tpu.memory_space<vmem>>, %arg10: memref<2x32xf32, #tpu.memory_space<vmem>>, %arg11: memref<1x32xf32, #tpu.memory_space<vmem>>, %arg12: memref<1x16x16x32xf32, #tpu.memory_space<vmem>>, %arg13: memref<18x32x4xf32, #tpu.memory_space<vmem>>, %arg14: memref<18x32x32xf32, #tpu.memory_space<vmem>>) attributes {dimension_semantics = [#tpu.dimension_semantics<parallel>], iteration_bounds = array<i64: 2>, scalar_prefetch = 0 : i64, scratch_operands = 2 : i64, tpu.core_type = #tpu.core_type<tc>, window_params = [{transform_indices = @transform_0, window_bounds = array<i64: 1, 16, 16, 4>}, {pipeline_mode = #tpu.pipeline_mode<synchronous>, transform_indices = @transform_1, window_bounds = array<i64: 36, 32>}, {pipeline_mode = #tpu.pipeline_mode<synchronous>, transform_indices = @transform_2, window_bounds = array<i64: 1, 32>}, {pipeline_mode = #tpu.pipeline_mode<synchronous>, transform_indices = @transform_3, window_bounds = array<i64: 1, 32>}, {pipeline_mode = #tpu.pipeline_mode<synchronous>, transform_indices = @transform_4, window_bounds = array<i64: 288, 32>}, {pipeline_mode = #tpu.pipeline_mode<synchronous>, transform_indices = @transform_5, window_bounds = array<i64: 1, 32>}, {pipeline_mode = #tpu.pipeline_mode<synchronous>, transform_indices = @transform_6, window_bounds = array<i64: 1, 32>}, {pipeline_mode = #tpu.pipeline_mode<synchronous>, transform_indices = @transform_7, window_bounds = array<i64: 32, 2>}, {pipeline_mode = #tpu.pipeline_mode<synchronous>, transform_indices = @transform_8, window_bounds = array<i64: 1, 2>}, {pipeline_mode = #tpu.pipeline_mode<synchronous>, transform_indices = @transform_9, window_bounds = array<i64: 2, 32>}, {pipeline_mode = #tpu.pipeline_mode<synchronous>, transform_indices = @transform_10, window_bounds = array<i64: 1, 32>}, {transform_indices = @transform_11, window_bounds = array<i64: 1, 16, 16, 32>}]} {
    %cst = arith.constant 0.000000e+00 : f32
    %0 = vector.broadcast %cst : f32 to vector<18x32x4xf32>
    %c0 = arith.constant 0 : index
    %c0_0 = arith.constant 0 : index
    %c0_1 = arith.constant 0 : index
    %1 = vector.load %arg13[%c0, %c0_0, %c0_1] : memref<18x32x4xf32, #tpu.memory_space<vmem>>, vector<18x32x4xf32>
    tpu.vector_store %arg13[%c0, %c0_0, %c0_1], %0 {strides = array<i32>} : memref<18x32x4xf32, #tpu.memory_space<vmem>>, vector<18x32x4xf32>,
    %c0_2 = arith.constant 0 : index
    %c0_3 = arith.constant 0 : index
    %c0_4 = arith.constant 0 : index
    %c0_5 = arith.constant 0 : index
    %2 = vector.load %arg1[%c0_2, %c0_3, %c0_4, %c0_5] : memref<1x16x16x4xf32, #tpu.memory_space<vmem>>, vector<1x16x16x4xf32>
    %3 = vector.shape_cast %2 : vector<1x16x16x4xf32> to vector<16x16x4xf32>
    %c1 = arith.constant 1 : index
    %c8 = arith.constant 8 : index
    %c0_6 = arith.constant 0 : index
    %4 = vector.load %arg13[%c1, %c8, %c0_6] : memref<18x32x4xf32, #tpu.memory_space<vmem>>, vector<16x16x4xf32>
    tpu.vector_store %arg13[%c1, %c8, %c0_6], %3 {strides = array<i32>} : memref<18x32x4xf32, #tpu.memory_space<vmem>>, vector<16x16x4xf32>,
    %c0_7 = arith.constant 0 : index
    %c0_8 = arith.constant 0 : index
    %c0_9 = arith.constant 0 : index
    %5 = vector.load %arg13[%c0_7, %c0_8, %c0_9] : memref<18x32x4xf32, #tpu.memory_space<vmem>>, vector<18x32x4xf32>
    %6 = vector.extract_strided_slice %5 {offsets = [0, 7, 0], sizes = [16, 16, 4], strides = [1, 1, 1]} : vector<18x32x4xf32> to vector<16x16x4xf32>
    %7 = vector.shape_cast %6 : vector<16x16x4xf32> to vector<256x4xf32>
    %8 = vector.extract_strided_slice %5 {offsets = [0, 8, 0], sizes = [16, 16, 4], strides = [1, 1, 1]} : vector<18x32x4xf32> to vector<16x16x4xf32>
    %9 = vector.shape_cast %8 : vector<16x16x4xf32> to vector<256x4xf32>
    %10 = vector.extract_strided_slice %5 {offsets = [0, 9, 0], sizes = [16, 16, 4], strides = [1, 1, 1]} : vector<18x32x4xf32> to vector<16x16x4xf32>
    %11 = vector.shape_cast %10 : vector<16x16x4xf32> to vector<256x4xf32>
    %12 = vector.extract_strided_slice %5 {offsets = [1, 7, 0], sizes = [16, 16, 4], strides = [1, 1, 1]} : vector<18x32x4xf32> to vector<16x16x4xf32>
    %13 = vector.shape_cast %12 : vector<16x16x4xf32> to vector<256x4xf32>
    %14 = vector.extract_strided_slice %5 {offsets = [1, 8, 0], sizes = [16, 16, 4], strides = [1, 1, 1]} : vector<18x32x4xf32> to vector<16x16x4xf32>
    %15 = vector.shape_cast %14 : vector<16x16x4xf32> to vector<256x4xf32>
    %16 = vector.extract_strided_slice %5 {offsets = [1, 9, 0], sizes = [16, 16, 4], strides = [1, 1, 1]} : vector<18x32x4xf32> to vector<16x16x4xf32>
    %17 = vector.shape_cast %16 : vector<16x16x4xf32> to vector<256x4xf32>
    %18 = vector.extract_strided_slice %5 {offsets = [2, 7, 0], sizes = [16, 16, 4], strides = [1, 1, 1]} : vector<18x32x4xf32> to vector<16x16x4xf32>
    %19 = vector.shape_cast %18 : vector<16x16x4xf32> to vector<256x4xf32>
    %20 = vector.extract_strided_slice %5 {offsets = [2, 8, 0], sizes = [16, 16, 4], strides = [1, 1, 1]} : vector<18x32x4xf32> to vector<16x16x4xf32>
    %21 = vector.shape_cast %20 : vector<16x16x4xf32> to vector<256x4xf32>
    %22 = vector.extract_strided_slice %5 {offsets = [2, 9, 0], sizes = [16, 16, 4], strides = [1, 1, 1]} : vector<18x32x4xf32> to vector<16x16x4xf32>
    %23 = vector.shape_cast %22 : vector<16x16x4xf32> to vector<256x4xf32>
    %24 = tpu.concatenate %7, %9, %11, %13, %15, %17, %19, %21, %23 in 1 : vector<256x4xf32>, vector<256x4xf32>, vector<256x4xf32>, vector<256x4xf32>, vector<256x4xf32>, vector<256x4xf32>, vector<256x4xf32>, vector<256x4xf32>, vector<256x4xf32> -> vector<256x36xf32>
    %25 = arith.truncf %24 : vector<256x36xf32> to vector<256x36xbf16>
    %c0_10 = arith.constant 0 : index
    %c0_11 = arith.constant 0 : index
    %26 = vector.load %arg2[%c0_10, %c0_11] : memref<36x32xbf16, #tpu.memory_space<vmem>>, vector<36x32xbf16>
    %cst_12 = arith.constant dense<0.000000e+00> : vector<256x32xf32>
    %27 = tpu.matmul %25, %26, %cst_12 {dimension_numbers = #tpu.dot_dimension_numbers<[1], [0], [0], [1], [0, 0, 1, 1], [], []>} : vector<256x36xbf16>, vector<36x32xbf16>, vector<256x32xf32> -> vector<256x32xf32>
    %c0_13 = arith.constant 0 : index
    %c0_14 = arith.constant 0 : index
    %28 = vector.load %arg3[%c0_13, %c0_14] : memref<1x32xf32, #tpu.memory_space<vmem>>, vector<1x32xf32>
    %29 = vector.shape_cast %28 : vector<1x32xf32> to vector<32xf32>
    %30 = vector.shape_cast %29 : vector<32xf32> to vector<1x32xf32>
    %31 = vector.broadcast %30 : vector<1x32xf32> to vector<256x32xf32>
    %32 = arith.mulf %27, %31 : vector<256x32xf32>
    %c0_15 = arith.constant 0 : index
    %c0_16 = arith.constant 0 : index
    %33 = vector.load %arg4[%c0_15, %c0_16] : memref<1x32xf32, #tpu.memory_space<vmem>>, vector<1x32xf32>
    %34 = vector.shape_cast %33 : vector<1x32xf32> to vector<32xf32>
    %35 = vector.shape_cast %34 : vector<32xf32> to vector<1x32xf32>
    %36 = vector.broadcast %35 : vector<1x32xf32> to vector<256x32xf32>
    %37 = arith.addf %32, %36 : vector<256x32xf32>
    %cst_17 = arith.constant 0.000000e+00 : f32
    %38 = vector.broadcast %cst_17 : f32 to vector<256x32xf32>
    %39 = arith.maximumf %37, %38 : vector<256x32xf32>
    %cst_18 = arith.constant 0.000000e+00 : f32
    %40 = vector.broadcast %cst_18 : f32 to vector<18x32x32xf32>
    %c0_19 = arith.constant 0 : index
    %c0_20 = arith.constant 0 : index
    %c0_21 = arith.constant 0 : index
    %41 = vector.load %arg14[%c0_19, %c0_20, %c0_21] : memref<18x32x32xf32, #tpu.memory_space<vmem>>, vector<18x32x32xf32>
    tpu.vector_store %arg14[%c0_19, %c0_20, %c0_21], %40 {strides = array<i32>} : memref<18x32x32xf32, #tpu.memory_space<vmem>>, vector<18x32x32xf32>,
    %42 = vector.shape_cast %39 : vector<256x32xf32> to vector<16x16x32xf32>
    %c1_22 = arith.constant 1 : index
    %c8_23 = arith.constant 8 : index
    %c0_24 = arith.constant 0 : index
    %43 = vector.load %arg14[%c1_22, %c8_23, %c0_24] : memref<18x32x32xf32, #tpu.memory_space<vmem>>, vector<16x16x32xf32>
    tpu.vector_store %arg14[%c1_22, %c8_23, %c0_24], %42 {strides = array<i32>} : memref<18x32x32xf32, #tpu.memory_space<vmem>>, vector<16x16x32xf32>,
    %c0_25 = arith.constant 0 : index
    %c0_26 = arith.constant 0 : index
    %c0_27 = arith.constant 0 : index
    %44 = vector.load %arg14[%c0_25, %c0_26, %c0_27] : memref<18x32x32xf32, #tpu.memory_space<vmem>>, vector<18x32x32xf32>
    %45 = vector.extract_strided_slice %44 {offsets = [0, 7, 0], sizes = [16, 16, 32], strides = [1, 1, 1]} : vector<18x32x32xf32> to vector<16x16x32xf32>
    %46 = vector.shape_cast %45 : vector<16x16x32xf32> to vector<256x32xf32>
    %47 = vector.extract_strided_slice %44 {offsets = [0, 8, 0], sizes = [16, 16, 32], strides = [1, 1, 1]} : vector<18x32x32xf32> to vector<16x16x32xf32>
    %48 = vector.shape_cast %47 : vector<16x16x32xf32> to vector<256x32xf32>
    %49 = vector.extract_strided_slice %44 {offsets = [0, 9, 0], sizes = [16, 16, 32], strides = [1, 1, 1]} : vector<18x32x32xf32> to vector<16x16x32xf32>
    %50 = vector.shape_cast %49 : vector<16x16x32xf32> to vector<256x32xf32>
    %51 = vector.extract_strided_slice %44 {offsets = [1, 7, 0], sizes = [16, 16, 32], strides = [1, 1, 1]} : vector<18x32x32xf32> to vector<16x16x32xf32>
    %52 = vector.shape_cast %51 : vector<16x16x32xf32> to vector<256x32xf32>
    %53 = vector.extract_strided_slice %44 {offsets = [1, 8, 0], sizes = [16, 16, 32], strides = [1, 1, 1]} : vector<18x32x32xf32> to vector<16x16x32xf32>
    %54 = vector.shape_cast %53 : vector<16x16x32xf32> to vector<256x32xf32>
    %55 = vector.extract_strided_slice %44 {offsets = [1, 9, 0], sizes = [16, 16, 32], strides = [1, 1, 1]} : vector<18x32x32xf32> to vector<16x16x32xf32>
    %56 = vector.shape_cast %55 : vector<16x16x32xf32> to vector<256x32xf32>
    %57 = vector.extract_strided_slice %44 {offsets = [2, 7, 0], sizes = [16, 16, 32], strides = [1, 1, 1]} : vector<18x32x32xf32> to vector<16x16x32xf32>
    %58 = vector.shape_cast %57 : vector<16x16x32xf32> to vector<256x32xf32>
    %59 = vector.extract_strided_slice %44 {offsets = [2, 8, 0], sizes = [16, 16, 32], strides = [1, 1, 1]} : vector<18x32x32xf32> to vector<16x16x32xf32>
    %60 = vector.shape_cast %59 : vector<16x16x32xf32> to vector<256x32xf32>
    %61 = vector.extract_strided_slice %44 {offsets = [2, 9, 0], sizes = [16, 16, 32], strides = [1, 1, 1]} : vector<18x32x32xf32> to vector<16x16x32xf32>
    %62 = vector.shape_cast %61 : vector<16x16x32xf32> to vector<256x32xf32>
    %63 = tpu.concatenate %46, %48, %50, %52, %54, %56, %58, %60, %62 in 1 : vector<256x32xf32>, vector<256x32xf32>, vector<256x32xf32>, vector<256x32xf32>, vector<256x32xf32>, vector<256x32xf32>, vector<256x32xf32>, vector<256x32xf32>, vector<256x32xf32> -> vector<256x288xf32>
    %64 = arith.truncf %63 : vector<256x288xf32> to vector<256x288xbf16>
    %c0_28 = arith.constant 0 : index
    %c0_29 = arith.constant 0 : index
    %65 = vector.load %arg5[%c0_28, %c0_29] : memref<288x32xbf16, #tpu.memory_space<vmem>>, vector<288x32xbf16>
    %cst_30 = arith.constant dense<0.000000e+00> : vector<256x32xf32>
    %66 = tpu.matmul %64, %65, %cst_30 {dimension_numbers = #tpu.dot_dimension_numbers<[1], [0], [0], [1], [0, 0, 1, 1], [], []>} : vector<256x288xbf16>, vector<288x32xbf16>, vector<256x32xf32> -> vector<256x32xf32>
    %c0_31 = arith.constant 0 : index
    %c0_32 = arith.constant 0 : index
    %67 = vector.load %arg6[%c0_31, %c0_32] : memref<1x32xf32, #tpu.memory_space<vmem>>, vector<1x32xf32>
    %68 = vector.shape_cast %67 : vector<1x32xf32> to vector<32xf32>
    %69 = vector.shape_cast %68 : vector<32xf32> to vector<1x32xf32>
    %70 = vector.broadcast %69 : vector<1x32xf32> to vector<256x32xf32>
    %71 = arith.mulf %66, %70 : vector<256x32xf32>
    %c0_33 = arith.constant 0 : index
    %c0_34 = arith.constant 0 : index
    %72 = vector.load %arg7[%c0_33, %c0_34] : memref<1x32xf32, #tpu.memory_space<vmem>>, vector<1x32xf32>
    %73 = vector.shape_cast %72 : vector<1x32xf32> to vector<32xf32>
    %74 = vector.shape_cast %73 : vector<32xf32> to vector<1x32xf32>
    %75 = vector.broadcast %74 : vector<1x32xf32> to vector<256x32xf32>
    %76 = arith.addf %71, %75 : vector<256x32xf32>
    %cst_35 = arith.constant 0.000000e+00 : f32
    %77 = vector.broadcast %cst_35 : f32 to vector<256x32xf32>
    %78 = arith.maximumf %76, %77 : vector<256x32xf32>
    %cst_36 = arith.constant dense<0.000000e+00> : vector<32xf32>
    %79 = vector.multi_reduction <add>, %78, %cst_36 [0] : vector<256x32xf32> to vector<32xf32>
    %80 = vector.shape_cast %79 : vector<32xf32> to vector<1x32xf32>
    %cst_37 = arith.constant 2.560000e+02 : f32
    %81 = vector.broadcast %cst_37 : f32 to vector<1x32xf32>
    %82 = arith.divf %80, %81 : vector<1x32xf32>
    %c0_38 = arith.constant 0 : index
    %c0_39 = arith.constant 0 : index
    %83 = vector.load %arg8[%c0_38, %c0_39] : memref<32x2xf32, #tpu.memory_space<vmem>>, vector<32x2xf32>
    %cst_40 = arith.constant dense<0.000000e+00> : vector<1x2xf32>
    %84 = tpu.matmul %82, %83, %cst_40 {dimension_numbers = #tpu.dot_dimension_numbers<[1], [0], [0], [1], [0, 0, 1, 1], [], []>} : vector<1x32xf32>, vector<32x2xf32>, vector<1x2xf32> -> vector<1x2xf32>
    %c0_41 = arith.constant 0 : index
    %c0_42 = arith.constant 0 : index
    %85 = vector.load %arg9[%c0_41, %c0_42] : memref<1x2xf32, #tpu.memory_space<vmem>>, vector<1x2xf32>
    %86 = arith.addf %84, %85 : vector<1x2xf32>
    %cst_43 = arith.constant 0.000000e+00 : f32
    %87 = vector.broadcast %cst_43 : f32 to vector<1x2xf32>
    %88 = arith.maximumf %86, %87 : vector<1x2xf32>
    %c0_44 = arith.constant 0 : index
    %c0_45 = arith.constant 0 : index
    %89 = vector.load %arg10[%c0_44, %c0_45] : memref<2x32xf32, #tpu.memory_space<vmem>>, vector<2x32xf32>
    %cst_46 = arith.constant dense<0.000000e+00> : vector<1x32xf32>
    %90 = tpu.matmul %88, %89, %cst_46 {dimension_numbers = #tpu.dot_dimension_numbers<[1], [0], [0], [1], [0, 0, 1, 1], [], []>} : vector<1x2xf32>, vector<2x32xf32>, vector<1x32xf32> -> vector<1x32xf32>
    %c0_47 = arith.constant 0 : index
    %c0_48 = arith.constant 0 : index
    %91 = vector.load %arg11[%c0_47, %c0_48] : memref<1x32xf32, #tpu.memory_space<vmem>>, vector<1x32xf32>
    %92 = arith.addf %90, %91 : vector<1x32xf32>
    %93 = arith.negf %92 : vector<1x32xf32>
    %94 = math.exp %93 : vector<1x32xf32>
    %cst_49 = arith.constant 1.000000e+00 : f32
    %95 = vector.broadcast %cst_49 : f32 to vector<1x32xf32>
    %96 = arith.addf %95, %94 : vector<1x32xf32>
    %97 = arith.divf %95, %96 : vector<1x32xf32>
    %98 = vector.broadcast %97 : vector<1x32xf32> to vector<256x32xf32>
    %99 = arith.mulf %78, %98 : vector<256x32xf32>
    %100 = vector.shape_cast %99 : vector<256x32xf32> to vector<16x16x32xf32>
    %c0_50 = arith.constant 0 : index
    %c0_51 = arith.constant 0 : index
    %c0_52 = arith.constant 0 : index
    %c0_53 = arith.constant 0 : index
    %101 = vector.load %arg12[%c0_50, %c0_51, %c0_52, %c0_53] : memref<1x16x16x32xf32, #tpu.memory_space<vmem>>, vector<1x16x16x32xf32>
    %102 = vector.shape_cast %101 : vector<1x16x16x32xf32> to vector<16x16x32xf32>
    %103 = vector.shape_cast %100 : vector<16x16x32xf32> to vector<1x16x16x32xf32>
    tpu.vector_store %arg12[%c0_50, %c0_51, %c0_52, %c0_53], %103 {strides = array<i32>} : memref<1x16x16x32xf32, #tpu.memory_space<vmem>>, vector<1x16x16x32xf32>,
    return
  }
  func.func @transform_0(%arg0: i32) -> (i32, i32, i32, i32) {
    %c0_i32 = arith.constant 0 : i32
    %c0_i32_0 = arith.constant 0 : i32
    %c0_i32_1 = arith.constant 0 : i32
    %c0_i32_2 = arith.constant 0 : i32
    return %arg0, %c0_i32, %c0_i32_0, %c0_i32_1 : i32, i32, i32, i32
  }
  func.func @transform_1(%arg0: i32) -> (i32, i32) {
    %c0_i32 = arith.constant 0 : i32
    %c0_i32_0 = arith.constant 0 : i32
    %c0_i32_1 = arith.constant 0 : i32
    return %c0_i32, %c0_i32_0 : i32, i32
  }
  func.func @transform_2(%arg0: i32) -> (i32, i32) {
    %c0_i32 = arith.constant 0 : i32
    %c0_i32_0 = arith.constant 0 : i32
    %c0_i32_1 = arith.constant 0 : i32
    return %c0_i32, %c0_i32_0 : i32, i32
  }
  func.func @transform_3(%arg0: i32) -> (i32, i32) {
    %c0_i32 = arith.constant 0 : i32
    %c0_i32_0 = arith.constant 0 : i32
    %c0_i32_1 = arith.constant 0 : i32
    return %c0_i32, %c0_i32_0 : i32, i32
  }
  func.func @transform_4(%arg0: i32) -> (i32, i32) {
    %c0_i32 = arith.constant 0 : i32
    %c0_i32_0 = arith.constant 0 : i32
    %c0_i32_1 = arith.constant 0 : i32
    return %c0_i32, %c0_i32_0 : i32, i32
  }
  func.func @transform_5(%arg0: i32) -> (i32, i32) {
    %c0_i32 = arith.constant 0 : i32
    %c0_i32_0 = arith.constant 0 : i32
    %c0_i32_1 = arith.constant 0 : i32
    return %c0_i32, %c0_i32_0 : i32, i32
  }
  func.func @transform_6(%arg0: i32) -> (i32, i32) {
    %c0_i32 = arith.constant 0 : i32
    %c0_i32_0 = arith.constant 0 : i32
    %c0_i32_1 = arith.constant 0 : i32
    return %c0_i32, %c0_i32_0 : i32, i32
  }
  func.func @transform_7(%arg0: i32) -> (i32, i32) {
    %c0_i32 = arith.constant 0 : i32
    %c0_i32_0 = arith.constant 0 : i32
    %c0_i32_1 = arith.constant 0 : i32
    return %c0_i32, %c0_i32_0 : i32, i32
  }
  func.func @transform_8(%arg0: i32) -> (i32, i32) {
    %c0_i32 = arith.constant 0 : i32
    %c0_i32_0 = arith.constant 0 : i32
    %c0_i32_1 = arith.constant 0 : i32
    return %c0_i32, %c0_i32_0 : i32, i32
  }
  func.func @transform_9(%arg0: i32) -> (i32, i32) {
    %c0_i32 = arith.constant 0 : i32
    %c0_i32_0 = arith.constant 0 : i32
    %c0_i32_1 = arith.constant 0 : i32
    return %c0_i32, %c0_i32_0 : i32, i32
  }
  func.func @transform_10(%arg0: i32) -> (i32, i32) {
    %c0_i32 = arith.constant 0 : i32
    %c0_i32_0 = arith.constant 0 : i32
    %c0_i32_1 = arith.constant 0 : i32
    return %c0_i32, %c0_i32_0 : i32, i32
  }
  func.func @transform_11(%arg0: i32) -> (i32, i32, i32, i32) {
    %c0_i32 = arith.constant 0 : i32
    %c0_i32_0 = arith.constant 0 : i32
    %c0_i32_1 = arith.constant 0 : i32
    %c0_i32_2 = arith.constant 0 : i32
    return %arg0, %c0_i32, %c0_i32_0, %c0_i32_1 : i32, i32, i32, i32
  }
}

</mosaic_0001>

<bundles_post_ra>
// kernel: conv_block_forward.1
= control target key start
LH: loop header
LB: loop body
LE: loop exit
PB: predicated region body
PF: predicated region fallthrough
CT: control target
= control target key end

     0   :  { %s9483_s0 = inlined_call_operand.vmem [shape: f32[2,16,16,4], index: 0, kind: input, shape index: {}]   ;;  %s9484_s1 = inlined_call_operand.vmem [shape: bf16[36,32], index: 1, kind: input, shape index: {}]   ;;  %s9485_s2 = inlined_call_operand.vmem [shape: f32[1,32], index: 2, kind: input, shape index: {}]   ;;  %s9486_s3 = inlined_call_operand.vmem [shape: f32[1,32], index: 3, kind: input, shape index: {}]   ;;  %s9487_s4 = inlined_call_operand.vmem [shape: bf16[288,32], index: 4, kind: input, shape index: {}]   ;;  %s9488_s5 = inlined_call_operand.vmem [shape: f32[1,32], index: 5, kind: input, shape index: {}]   ;;  %s9489_s6 = inlined_call_operand.vmem [shape: f32[1,32], index: 6, kind: input, shape index: {}]   ;;  %s9490_s7 = inlined_call_operand.vmem [shape: f32[32,2], index: 7, kind: input, shape index: {}]   ;;  %s9491_s8 = inlined_call_operand.vmem [shape: f32[1,2], index: 8, kind: input, shape index: {}]   ;;  %s9492_s9 = inlined_call_operand.vmem [shape: f32[2,32], index: 9, kind: input, shape index: {}]   ;;  %s9493_s10 = inlined_call_operand.vmem [shape: f32[1,32], index: 10, kind: input, shape index: {}]   ;;  %s9494_s11 = inlined_call_operand.hbm [shape: f32[2,16,16,32], index: 11, kind: output, shape index: {}]  }
   0x1   :  { %9597 = sst [smem:[#allocation62_spill]] %s9483_s0 }
   0x2   :  { %16 = vsyncpa [#allocation5], 0 }
   0x3   :  { %18 = vsyncpa [#allocation5 + $0x1], 0  ;;  %s5874_s17 = smov 0   ;;  %s5876_s18 = smov 0  }
   0x4   :  { %s5878_s19 = smov 0   ;;  %s5880_s20 = smov 0  }
   0x5 LB: > { %s5895_s21 = sadd.s32 4294967295, %s5799_s20   ;;  %s4366_s22 = sadd.s32 4294967294, %s5799_s20   ;;  %s5799_s20 = sphi %s5880_s20, %s9783_s20   ;;  %s5795_s19 = sphi %s5878_s19, %s9782_s19   ;;  %s5791_s18 = sphi %s5876_s18, %s9781_s18   ;;  %s5787_s17 = sphi %s5874_s17, %s9780_s17  }
   0x6   : > { %s5899_s23 = sadd.s32 1, %s5799_s20   ;;  %s267_s24 = sadd.s32 1, %s5795_s19 }
   0x7   : > { %s264_s25 = ssub.s32 %s5799_s20, %s5899_s23  ;;  %p277_p0 = scmp.ne.s32.totalorder %s5795_s19, %s5791_s18 }
   0x8   : > { %p265_p1 = scmp.eq.s32.totalorder %s264_s25, 0  ;;  %p278_p2 = scmp.eq.s32.totalorder %s5895_s21, 1 }
   0x9   : > { %p283_p3 = scmp.ne.s32.totalorder %s5791_s18, %s5787_s17  ;;  %p284_p4 = scmp.eq.s32.totalorder %s4366_s22, 1 }
   0xa   : > { %s5910_s26 = scalar_select %p265_p1, %s5795_s19, %s267_s24  }
   0xb   : > { %p5912_p5 = por %p278_p2, %p277_p0  ;;  %p5916_p6 = por %p284_p4, %p283_p3 }
   0xc   : > { %p4369_p7 = scmp.ge.s32.totalorder %s5799_s20, 1  ;;  %p340_p8 = scmp.lt.s32.totalorder %s5799_s20, 3 }
   0xe   : > { %p341_p9 = pnand %p4369_p7, %p340_p8 }
  0x10   : > { %344 = sbr.rel (%p341_p9) target bundleno = 1532 (0x5fc), region = 64 }
  0x15   : > { %vm386_vm0 = vcmask 31744   ;;  %v9495_v0 = vmov 0.0   ;;  %s5802_s29 = smov 4   ;;  %p380_p10 = scmp.lt.s32.totalorder %s5895_s21, 1  ;;  %vm773_vm1 = vcmask 1046528   ;;  %vm644_vm2 = vcmask 1040384  }
  0x16   : > { %388 = vst.msk [vmem:[#allocation2 + $0x8] sm:$0xff] %vm386_vm0, %v9495_v0  ;;  %s9600_s0 = sld [smem:[#allocation62_spill]]  ;;  %s9596_s16 = smov 8   ;;  %vm1998_vm3 = vcmask 1041408   ;;  %vm1880_vm4 = vcmask 261120   ;;  %vm1715_vm5 = vcmask 97280  }
  0x17   : > { %389 = vst.msk [vmem:[#allocation2 + $0x10] sm:$0xff] %vm386_vm0, %v9495_v0  ;;  %s381_s30 = scalar_select %p380_p10, %s5895_s21, 1  ;;  %vm1682_vm6 = vcmask 64512   ;;  %vm1748_vm7 = vcmask 130048   ;;  %vm1781_vm8 = vcmask 162816   ;;  %vm1814_vm9 = vcmask 195584  }
  0x18   : > { %387 = vst.msk [vmem:[#allocation2] sm:$0xff] %vm386_vm0, %v9495_v0  ;;  %s5804_s22 = smov 12   ;;  %s5805_s24 = smov 16   ;;  %vm1847_vm10 = vcmask 228352   ;;  %vm1949_vm11 = vcmask 293888   ;;  %vm3296_vm12 = vcmask 523264  }
  0x19   : > { %390 = vst.msk [vmem:[#allocation2 + $0x18] sm:$0xff] %vm386_vm0, %v9495_v0  ;;  %s4494_s12 = sshll.u32 %s381_s30, 8  ;;  %s5806_s25 = smov 24   ;;  %vm3329_vm13 = vcmask 785408   ;;  %vm4177_vm15 = vcmask 15360  }
  0x1a   : > { %391 = vst.msk [vmem:[#allocation2 + $0x20] sm:$0xff] %vm386_vm0, %v9495_v0  ;;  %s5808_s30 = smov 28   ;;  %s5811_s13 = smov 64  }
  0x1b   : > { %392 = vst.msk [vmem:[#allocation2 + $0x28] sm:$0xff] %vm386_vm0, %v9495_v0 }
  0x1c   : > { %393 = vst.msk [vmem:[#allocation2 + $0x30] sm:$0xff] %vm386_vm0, %v9495_v0  ;;  %s6068_s15 = scalar_lea.vmem %s9600_s0, %s4494_s12  ;;  %s5809_s12 = smov 32  }
  0x1d   : > { %v5936_v1 = vld [vmem:[#allocation2 + $0x8] sm:$0xff]  ;;  %394 = vst.msk [vmem:[#allocation2 + $0x38] sm:$0xff] %vm386_vm0, %v9495_v0  ;;  %v465_v4 = vld [vmem:[%s6068_s15 + $0x30] sm:$0xff]  ;;  %v466_v5 = vld [vmem:[%s6068_s15 + $0x38] sm:$0xff] }
  0x1e   : > { %v5940_v2 = vld [vmem:[#allocation2 + $0x10] sm:$0xff]  ;;  %395 = vst.msk [vmem:[#allocation2 + $0x40] sm:$0xff] %vm386_vm0, %v9495_v0  ;;  %v462_v7 = vld [vmem:[%s6068_s15 + $0x18] sm:$0xff]  ;;  %v459_v8 = vld [vmem:[%s6068_s15] sm:$0xff]  ;;  %v774_v27 = vrot.slane %v5936_v1, 1 }
  0x1f   : > { %v4568_v3 = vpack.i.bf16 %v5940_v2, %v5936_v1  ;;  %396 = vst.msk [vmem:[#allocation2 + $0x48] sm:$0xff] %vm386_vm0, %v9495_v0  ;;  %v461_v6 = vld [vmem:[%s6068_s15 + $0x10] sm:$0xff]  ;;  %v460_v9 = vld [vmem:[%s6068_s15 + $0x8] sm:$0xff]  ;;  %v467_v10 = vld [vmem:[%s6068_s15 + $0x40] sm:$0xff]  ;;  %v775_v26 = vrot.slane %v5940_v2, 1 }
  0x20   : > { %397 = vst.msk [vmem:[#allocation2 + $0x50] sm:$0xff] %vm386_vm0, %v9495_v0  ;;  %v468_v11 = vld [vmem:[%s6068_s15 + $0x48] sm:$0xff]  ;;  %v463_v12 = vld [vmem:[%s6068_s15 + $0x20] sm:$0xff]  ;;  %v469_v15 = vld [vmem:[%s6068_s15 + $0x50] sm:$0xff] }
  0x21   : > { %4569 = vrot.lane.b32.xlu0 %v4568_v3, %s5802_s29  ;;  %398 = vst.msk [vmem:[#allocation2 + $0x58] sm:$0xff] %vm386_vm0, %v9495_v0  ;;  %v464_v13 = vld [vmem:[%s6068_s15 + $0x28] sm:$0xff]  ;;  %v470_v17 = vld [vmem:[%s6068_s15 + $0x58] sm:$0xff]  ;;  %v473_v20 = vld [vmem:[%s6068_s15 + $0x70] sm:$0xff]  ;;  %v6162_v41 = vsel %vm773_vm1, %v774_v27, %v775_v26 }
  0x22   : > { %399 = vst.msk [vmem:[#allocation2 + $0x60] sm:$0xff] %vm386_vm0, %v9495_v0  ;;  %v474_v22 = vld [vmem:[%s6068_s15 + $0x78] sm:$0xff]  ;;  %v471_v25 = vld [vmem:[%s6068_s15 + $0x60] sm:$0xff]  ;;  %v472_v29 = vld [vmem:[%s6068_s15 + $0x68] sm:$0xff] }
  0x23   : > { %400 = vst.msk [vmem:[#allocation2 + $0x68] sm:$0xff] %vm386_vm0, %v9495_v0  ;;  %v475_v32 = vld [vmem:[%s6068_s15 + $0x80] sm:$0xff]  ;;  %v476_v34 = vld [vmem:[%s6068_s15 + $0x88] sm:$0xff]  ;;  %v527_v38 = vld [vmem:[#allocation2 + $0x18] sm:$0xff] }
  0x24   : > { %401 = vst.msk [vmem:[#allocation2 + $0x70] sm:$0xff] %vm386_vm0, %v9495_v0  ;;  %v479_v37 = vld [vmem:[%s6068_s15 + $0xa0] sm:$0xff]  ;;  %v480_v40 = vld [vmem:[%s6068_s15 + $0xa8] sm:$0xff]  ;;  %v777_v42 = vrot.slane %v527_v38, 1  ;;  %v477_v45 = vld [vmem:[%s6068_s15 + $0x90] sm:$0xff] }
  0x25   : > { %402 = vst.msk [vmem:[#allocation2 + $0x78] sm:$0xff] %vm386_vm0, %v9495_v0  ;;  %v478_v47 = vld [vmem:[%s6068_s15 + $0x98] sm:$0xff]  ;;  %v481_v50 = vld [vmem:[%s6068_s15 + $0xb0] sm:$0xff]  ;;  %v483_v60 = vld [vmem:[%s6068_s15 + $0xc0] sm:$0xff] }
  0x26   : > { %403 = vst.msk [vmem:[#allocation2 + $0x80] sm:$0xff] %vm386_vm0, %v9495_v0  ;;  %v6177_v48 = vsel %vm773_vm1, %v775_v26, %v777_v42  ;;  %v482_v54 = vld [vmem:[%s6068_s15 + $0xb8] sm:$0xff]  ;;  %v485_v55 = vld [vmem:[%s6068_s15 + $0xd0] sm:$0xff]  ;;  %v484_v63 = vld [vmem:[%s6068_s15 + $0xc8] sm:$0xff] }
  0x27   : > { %404 = vst.msk [vmem:[#allocation2 + $0x88] sm:$0xff] %vm386_vm0, %v9495_v0  ;;  %v486_v58 = vld [vmem:[%s6068_s15 + $0xd8] sm:$0xff] }
  0x28   : > { %405 = vst.msk [vmem:[#allocation2 + $0x90] sm:$0xff] %vm386_vm0, %v9495_v0 }
  0x29   : > { %406 = vst.msk [vmem:[#allocation2 + $0x98] sm:$0xff] %vm386_vm0, %v9495_v0 }
  0x2a   : > { %407 = vst.msk [vmem:[#allocation2 + $0xa0] sm:$0xff] %vm386_vm0, %v9495_v0 }
  0x2b   : > { %408 = vst.msk [vmem:[#allocation2 + $0xa8] sm:$0xff] %vm386_vm0, %v9495_v0 }
  0x2c   : > { %409 = vst.msk [vmem:[#allocation2 + $0xb0] sm:$0xff] %vm386_vm0, %v9495_v0 }
  0x2d   : > { %410 = vst.msk [vmem:[#allocation2 + $0xb8] sm:$0xff] %vm386_vm0, %v9495_v0 }
  0x2e   : > { %411 = vst.msk [vmem:[#allocation2 + $0xc0] sm:$0xff] %vm386_vm0, %v9495_v0 }
  0x2f   : > { %412 = vst.msk [vmem:[#allocation2 + $0xc8] sm:$0xff] %vm386_vm0, %v9495_v0 }
  0x30   : > { %413 = vst.msk [vmem:[#allocation2 + $0xd0] sm:$0xff] %vm386_vm0, %v9495_v0 }
  0x31   : > { %414 = vst.msk [vmem:[#allocation2 + $0xd8] sm:$0xff] %vm386_vm0, %v9495_v0 }
  0x32   : > { %415 = vst.msk [vmem:[#allocation2 + $0xe0] sm:$0xff] %vm386_vm0, %v9495_v0 }
  0x33   : > { %416 = vst.msk [vmem:[#allocation2 + $0xe8] sm:$0xff] %vm386_vm0, %v9495_v0 }
  0x34   : > { %417 = vst.msk [vmem:[#allocation2 + $0xf0] sm:$0xff] %vm386_vm0, %v9495_v0 }
  0x35   : > { %418 = vst.msk [vmem:[#allocation2 + $0xf8] sm:$0xff] %vm386_vm0, %v9495_v0 }
  0x36   : > { %419 = vst.msk [vmem:[#allocation2 + $0x100] sm:$0xff] %vm386_vm0, %v9495_v0 }
  0x37   : > { %420 = vst.msk [vmem:[#allocation2 + $0x108] sm:$0xff] %vm386_vm0, %v9495_v0 }
  0x38   : > { %421 = vst.msk [vmem:[#allocation2 + $0x110] sm:$0xff] %vm386_vm0, %v9495_v0 }
  0x39   : > { %422 = vst.msk [vmem:[#allocation2 + $0x118] sm:$0xff] %vm386_vm0, %v9495_v0 }
  0x3a   : > { %423 = vst.msk [vmem:[#allocation2 + $0x120] sm:$0xff] %vm386_vm0, %v9495_v0 }
  0x3b   : > { %424 = vst.msk [vmem:[#allocation2 + $0x128] sm:$0xff] %vm386_vm0, %v9495_v0 }
  0x3c   : > { %425 = vst.msk [vmem:[#allocation2 + $0x130] sm:$0xff] %vm386_vm0, %v9495_v0 }
  0x3d   : > { %426 = vst.msk [vmem:[#allocation2 + $0x138] sm:$0xff] %vm386_vm0, %v9495_v0 }
  0x3e   : > { %427 = vst.msk [vmem:[#allocation2 + $0x140] sm:$0xff] %vm386_vm0, %v9495_v0 }
  0x3f   : > { %428 = vst.msk [vmem:[#allocation2 + $0x148] sm:$0xff] %vm386_vm0, %v9495_v0 }
  0x40   : > { %429 = vst.msk [vmem:[#allocation2 + $0x150] sm:$0xff] %vm386_vm0, %v9495_v0 }
  0x41   : > { %430 = vst.msk [vmem:[#allocation2 + $0x158] sm:$0xff] %vm386_vm0, %v9495_v0 }
  0x42   : > { %431 = vst.msk [vmem:[#allocation2 + $0x160] sm:$0xff] %vm386_vm0, %v9495_v0 }
  0x43   : > { %432 = vst.msk [vmem:[#allocation2 + $0x168] sm:$0xff] %vm386_vm0, %v9495_v0 }
  0x44   : > { %433 = vst.msk [vmem:[#allocation2 + $0x170] sm:$0xff] %vm386_vm0, %v9495_v0 }
  0x45   : > { %434 = vst.msk [vmem:[#allocation2 + $0x178] sm:$0xff] %vm386_vm0, %v9495_v0 }
  0x46   : > { %435 = vst.msk [vmem:[#allocation2 + $0x180] sm:$0xff] %vm386_vm0, %v9495_v0 }
  0x47   : > { %436 = vst.msk [vmem:[#allocation2 + $0x188] sm:$0xff] %vm386_vm0, %v9495_v0 }
  0x48   : > { %437 = vst.msk [vmem:[#allocation2 + $0x190] sm:$0xff] %vm386_vm0, %v9495_v0 }
  0x49   : > { %438 = vst.msk [vmem:[#allocation2 + $0x198] sm:$0xff] %vm386_vm0, %v9495_v0 }
  0x4a   : > { %439 = vst.msk [vmem:[#allocation2 + $0x1a0] sm:$0xff] %vm386_vm0, %v9495_v0 }
  0x4b   : > { %440 = vst.msk [vmem:[#allocation2 + $0x1a8] sm:$0xff] %vm386_vm0, %v9495_v0 }
  0x4c   : > { %441 = vst.msk [vmem:[#allocation2 + $0x1b0] sm:$0xff] %vm386_vm0, %v9495_v0 }
  0x4d   : > { %442 = vst.msk [vmem:[#allocation2 + $0x1b8] sm:$0xff] %vm386_vm0, %v9495_v0 }
  0x4e   : > { %443 = vst.msk [vmem:[#allocation2 + $0x1c0] sm:$0xff] %vm386_vm0, %v9495_v0 }
  0x4f   : > { %444 = vst.msk [vmem:[#allocation2 + $0x1c8] sm:$0xff] %vm386_vm0, %v9495_v0 }
  0x50   : > { %445 = vst.msk [vmem:[#allocation2 + $0x1d0] sm:$0xff] %vm386_vm0, %v9495_v0 }
  0x51   : > { %446 = vst.msk [vmem:[#allocation2 + $0x1d8] sm:$0xff] %vm386_vm0, %v9495_v0 }
  0x52   : > { %447 = vst.msk [vmem:[#allocation2 + $0x1e0] sm:$0xff] %vm386_vm0, %v9495_v0 }
  0x53   : > { %448 = vst.msk [vmem:[#allocation2 + $0x1e8] sm:$0xff] %vm386_vm0, %v9495_v0 }
  0x54   : > { %449 = vst.msk [vmem:[#allocation2 + $0x1f0] sm:$0xff] %vm386_vm0, %v9495_v0 }
  0x55   : > { %450 = vst.msk [vmem:[#allocation2 + $0x1f8] sm:$0xff] %vm386_vm0, %v9495_v0 }
  0x56   : > { %451 = vst.msk [vmem:[#allocation2 + $0x200] sm:$0xff] %vm386_vm0, %v9495_v0 }
  0x57   : > { %452 = vst.msk [vmem:[#allocation2 + $0x208] sm:$0xff] %vm386_vm0, %v9495_v0 }
  0x58   : > { %453 = vst.msk [vmem:[#allocation2 + $0x210] sm:$0xff] %vm386_vm0, %v9495_v0 }
  0x59   : > { %454 = vst.msk [vmem:[#allocation2 + $0x218] sm:$0xff] %vm386_vm0, %v9495_v0 }
  0x5a   : > { %455 = vst.msk [vmem:[#allocation2 + $0x220] sm:$0xff] %vm386_vm0, %v9495_v0 }
  0x5b   : > { %456 = vst.msk [vmem:[#allocation2 + $0x228] sm:$0xff] %vm386_vm0, %v9495_v0 }
  0x5c   : > { %457 = vst.msk [vmem:[#allocation2 + $0x230] sm:$0xff] %vm386_vm0, %v9495_v0 }
  0x5d   : > { %458 = vst.msk [vmem:[#allocation2 + $0x238] sm:$0xff] %vm386_vm0, %v9495_v0 }
  0x5e   : > { %498 = vst.msk [vmem:[#allocation2 + $0x88] sm:$0xff] %vm386_vm0, %v465_v4  ;;  %v487_v4 = vld [vmem:[%s6068_s15 + $0xe0] sm:$0xff] }
  0x5f   : > { %499 = vst.msk [vmem:[#allocation2 + $0x90] sm:$0xff] %vm386_vm0, %v466_v5  ;;  %v488_v5 = vld [vmem:[%s6068_s15 + $0xe8] sm:$0xff] }
  0x60   : > { %494 = vst.msk [vmem:[#allocation2 + $0x48] sm:$0xff] %vm386_vm0, %v461_v6 }
  0x61   : > { %495 = vst.msk [vmem:[#allocation2 + $0x50] sm:$0xff] %vm386_vm0, %v462_v7 }
  0x62   : > { %492 = vst.msk [vmem:[#allocation2 + $0x28] sm:$0xff] %vm386_vm0, %v459_v8 }
  0x63   : > { %493 = vst.msk [vmem:[#allocation2 + $0x30] sm:$0xff] %vm386_vm0, %v460_v9 }
  0x64   : > { %500 = vst.msk [vmem:[#allocation2 + $0xa8] sm:$0xff] %vm386_vm0, %v467_v10 }
  0x65   : > { %v6097_v14 = vld [vmem:[#allocation2 + $0x88] sm:$0xff]  ;;  %501 = vst.msk [vmem:[#allocation2 + $0xb0] sm:$0xff] %vm386_vm0, %v468_v11 }
  0x66   : > { %v6101_v16 = vld [vmem:[#allocation2 + $0x90] sm:$0xff]  ;;  %496 = vst.msk [vmem:[#allocation2 + $0x68] sm:$0xff] %vm386_vm0, %v463_v12  ;;  %v794_v51 = vrot.slane %v6097_v14, 1 }
  0x67   : > { %v6107_v18 = vpack.i.bf16 %v6101_v16, %v6097_v14  ;;  %v6109_v19 = vld [vmem:[#allocation2 + $0x48] sm:$0xff]  ;;  %497 = vst.msk [vmem:[#allocation2 + $0x70] sm:$0xff] %vm386_vm0, %v464_v13 }
  0x68   : > { %v6113_v21 = vld [vmem:[#allocation2 + $0x50] sm:$0xff]  ;;  %502 = vst.msk [vmem:[#allocation2 + $0xc8] sm:$0xff] %vm386_vm0, %v469_v15 }
  0x69   : > { %4589 = vrot.lane.b32.xlu2 %v6107_v18, %s5802_s29  ;;  %v6121_v23 = vpack.i.bf16 %v6113_v21, %v6109_v19  ;;  %v6123_v24 = vld [vmem:[#allocation2 + $0x28] sm:$0xff]  ;;  %503 = vst.msk [vmem:[#allocation2 + $0xd0] sm:$0xff] %vm386_vm0, %v470_v17 }
  0x6a   : > { %v6129_v28 = vld [vmem:[#allocation2 + $0x30] sm:$0xff]  ;;  %506 = vst.msk [vmem:[#allocation2 + $0x108] sm:$0xff] %vm386_vm0, %v473_v20 }
  0x6b   : > { %4579 = vrot.lane.b32.xlu1 %v6121_v23, %s5802_s29  ;;  %v6137_v30 = vpack.i.bf16 %v6129_v28, %v6123_v24  ;;  %v6139_v31 = vld [vmem:[#allocation2 + $0xa8] sm:$0xff]  ;;  %507 = vst.msk [vmem:[#allocation2 + $0x110] sm:$0xff] %vm386_vm0, %v474_v22  ;;  %v780_v38 = vrot.slane %v6129_v28, 1 }
  0x6c   : > { %v6143_v33 = vld [vmem:[#allocation2 + $0xb0] sm:$0xff]  ;;  %504 = vst.msk [vmem:[#allocation2 + $0xe8] sm:$0xff] %vm386_vm0, %v471_v25  ;;  %v531_v25 = vld [vmem:[#allocation2 + $0x38] sm:$0xff] }
  0x6d   : > { %4574 = vrot.lane.b32.xlu0 %v6137_v30, %s5802_s29  ;;  %v6151_v35 = vpack.i.bf16 %v6143_v33, %v6139_v31  ;;  %v6153_v36 = vld [vmem:[#allocation2 + $0x68] sm:$0xff]  ;;  %505 = vst.msk [vmem:[#allocation2 + $0xf0] sm:$0xff] %vm386_vm0, %v472_v29 }
  0x6e   : > { %v6157_v39 = vld [vmem:[#allocation2 + $0x70] sm:$0xff]  ;;  %508 = vst.msk [vmem:[#allocation2 + $0x128] sm:$0xff] %vm386_vm0, %v475_v32 }
  0x6f   : > { %v6166_v43 = vpack.i.bf16 %v6157_v39, %v6153_v36  ;;  %v6168_v44 = vld [vmem:[#allocation2 + $0xc8] sm:$0xff]  ;;  %509 = vst.msk [vmem:[#allocation2 + $0x130] sm:$0xff] %vm386_vm0, %v476_v34 }
  0x70   : > { %v6172_v46 = vld [vmem:[#allocation2 + $0xd0] sm:$0xff]  ;;  %512 = vst.msk [vmem:[#allocation2 + $0x168] sm:$0xff] %vm386_vm0, %v479_v37  ;;  %v779_v37 = vrot.slane %v6123_v24, 1 }
  0x71   : > { %4594 = vrot.lane.b32.xlu2 %v6151_v35, %s5802_s29  ;;  %v6183_v49 = vpack.i.bf16 %v6172_v46, %v6168_v44  ;;  %513 = vst.msk [vmem:[#allocation2 + $0x170] sm:$0xff] %vm386_vm0, %v480_v40  ;;  %v6189_v52 = vld [vmem:[#allocation2 + $0x108] sm:$0xff]  ;;  %v782_v40 = vrot.slane %v531_v25, 1  ;;  %v539_v25 = vld [vmem:[#allocation2 + $0x78] sm:$0xff] }
  0x72   : > { %v6191_v53 = vld [vmem:[#allocation2 + $0x110] sm:$0xff]  ;;  %510 = vst.msk [vmem:[#allocation2 + $0x148] sm:$0xff] %vm386_vm0, %v477_v45  ;;  %v535_v45 = vld [vmem:[#allocation2 + $0x58] sm:$0xff] }
  0x73   : > { %4584 = vrot.lane.b32.xlu1 %v6166_v43, %s5802_s29  ;;  %511 = vst.msk [vmem:[#allocation2 + $0x150] sm:$0xff] %vm386_vm0, %v478_v47  ;;  %v6199_v56 = vld [vmem:[#allocation2 + $0xe8] sm:$0xff]  ;;  %v6209_v59 = vpack.i.bf16 %v6191_v53, %v6189_v52 }
  0x74   : > { %v6201_v57 = vld [vmem:[#allocation2 + $0xf0] sm:$0xff]  ;;  %514 = vst.msk [vmem:[#allocation2 + $0x188] sm:$0xff] %vm386_vm0, %v481_v50  ;;  %v784_v50 = vrot.slane %v6109_v19, 1 }
  0x75   : > { %4599 = vrot.lane.b32.xlu0 %v6183_v49, %s5802_s29  ;;  %515 = vst.msk [vmem:[#allocation2 + $0x190] sm:$0xff] %vm386_vm0, %v482_v54  ;;  %v6213_v61 = vld [vmem:[#allocation2 + $0x128] sm:$0xff]  ;;  %v6221_v3 = vpack.i.bf16 %v6201_v57, %v6199_v56  ;;  %v785_v54 = vrot.slane %v6113_v21, 1 }
  0x76   : > { %v6215_v62 = vld [vmem:[#allocation2 + $0x130] sm:$0xff]  ;;  %518 = vst.msk [vmem:[#allocation2 + $0x1c8] sm:$0xff] %vm386_vm0, %v485_v55  ;;  %v781_v55 = vsel %vm773_vm1, %v779_v37, %v780_v38  ;;  %v795_v37 = vrot.slane %v6101_v16, 1 }
  0x77   : > { %519 = vst.msk [vmem:[#allocation2 + $0x1d0] sm:$0xff] %vm386_vm0, %v486_v58  ;;  %v6231_v6 = vpack.i.bf16 %v6215_v62, %v6213_v61  ;;  %v6234_v7 = vld [vmem:[#allocation2 + $0x168] sm:$0xff]  ;;  %v783_v58 = vsel %vm773_vm1, %v780_v38, %v782_v40  ;;  %v547_v40 = vld [vmem:[#allocation2 + $0xb8] sm:$0xff] }
  0x78   : > { %516 = vst.msk [vmem:[#allocation2 + $0x1a8] sm:$0xff] %vm386_vm0, %v483_v60  ;;  %v6236_v8 = vld [vmem:[#allocation2 + $0x170] sm:$0xff]  ;;  %v787_v60 = vrot.slane %v535_v45, 1  ;;  %v789_v45 = vrot.slane %v6153_v36, 1 }
  0x79   : > { %4609 = vrot.lane.b32.xlu2 %v6209_v59, %s5802_s29  ;;  %517 = vst.msk [vmem:[#allocation2 + $0x1b0] sm:$0xff] %vm386_vm0, %v484_v63  ;;  %v6242_v9 = vld [vmem:[#allocation2 + $0x148] sm:$0xff]  ;;  %v6250_v11 = vpack.i.bf16 %v6236_v8, %v6234_v7  ;;  %v543_v63 = vld [vmem:[#allocation2 + $0x98] sm:$0xff] }
  0x7a   : > { %520 = vst.msk [vmem:[#allocation2 + $0x1e8] sm:$0xff] %vm386_vm0, %v487_v4  ;;  %v6244_v10 = vld [vmem:[#allocation2 + $0x150] sm:$0xff]  ;;  %v6306_v4 = vpack.i.bf16 %v783_v58, %v781_v55  ;;  %v788_v0 = vsel %vm773_vm1, %v785_v54, %v787_v60  ;;  %v797_v38 = vrot.slane %v543_v63, 1  ;;  %v796_v58 = vsel %vm773_vm1, %v794_v51, %v795_v37 }
  0x7b   : > { %4604 = vrot.lane.b32.xlu1 %v6221_v3, %s5802_s29  ;;  %521 = vst.msk [vmem:[#allocation2 + $0x1f0] sm:$0xff] %vm386_vm0, %v488_v5  ;;  %v6252_v12 = vld [vmem:[#allocation2 + $0x188] sm:$0xff]  ;;  %v6258_v15 = vpack.i.bf16 %v6244_v10, %v6242_v9  ;;  %v786_v5 = vsel %vm773_vm1, %v784_v50, %v785_v54  ;;  %v799_v50 = vrot.slane %v6139_v31, 1  ;;  %v800_v54 = vrot.slane %v6143_v33, 1 }
  0x7c   : > { %9601 = vst [vmem:[#allocation7_spill] sm:$0xff] %v6250_v11  ;;  %v6254_v13 = vld [vmem:[#allocation2 + $0x190] sm:$0xff]  ;;  %v6316_v55 = vpack.i.bf16 %v788_v0, %v786_v5  ;;  %v798_v60 = vsel %vm773_vm1, %v795_v37, %v797_v38  ;;  %v802_v63 = vrot.slane %v547_v40, 1  ;;  %v809_v38 = vrot.slane %v6199_v56, 1  ;;  %v559_v40 = vld [vmem:[#allocation2 + $0x118] sm:$0xff] }
  0x7d   : > { %4614 = vrot.lane.b32.xlu0 %v6231_v6, %s5802_s29  ;;  %v6264_v17 = vpack.i.bf16 %v6254_v13, %v6252_v12  ;;  %v6266_v20 = vld [vmem:[#allocation2 + $0x1c8] sm:$0xff]  ;;  %9605 = vst [vmem:[#allocation11_spill] sm:$0xff] %v6306_v4  ;;  %v6330_v5 = vpack.i.bf16 %v798_v60, %v796_v58  ;;  %v801_v51 = vsel %vm773_vm1, %v799_v50, %v800_v54  ;;  %v815_v58 = vrot.slane %v6191_v53, 1 }
  0x7e   : > { %v6268_v22 = vld [vmem:[#allocation2 + $0x1d0] sm:$0xff]  ;;  %9606 = vst [vmem:[#allocation12_spill] sm:$0xff] %v6316_v55  ;;  %v803_v37 = vsel %vm773_vm1, %v800_v54, %v802_v63  ;;  %v814_v54 = vrot.slane %v6189_v52, 1  ;;  %v817_v63 = vrot.slane %v559_v40, 1 }
  0x7f   : > { %v6272_v26 = vld [vmem:[#allocation2 + $0x1a8] sm:$0xff]  ;;  %v6280_v29 = vpack.i.bf16 %v6268_v22, %v6266_v20  ;;  %9608 = vst [vmem:[#allocation13_spill] sm:$0xff] %v6330_v5  ;;  %v6342_v50 = vpack.i.bf16 %v803_v37, %v801_v51 }
  0x80   : > { %v6274_v27 = vld [vmem:[#allocation2 + $0x1b0] sm:$0xff]  ;;  %v816_v37 = vsel %vm773_vm1, %v814_v54, %v815_v58 }
  0x81   : > { %4624 = vrot.lane.b32.xlu2 %v6250_v11, %s5802_s29  ;;  %9602 = vst [vmem:[#allocation8_spill] sm:$0xff] %v6280_v29  ;;  %v6282_v32 = vld [vmem:[#allocation2 + $0x1e8] sm:$0xff]  ;;  %v6290_v42 = vpack.i.bf16 %v6274_v27, %v6272_v26 }
  0x82   : > { %v6284_v34 = vld [vmem:[#allocation2 + $0x1f0] sm:$0xff]  ;;  %9610 = vst [vmem:[#allocation15_spill] sm:$0xff] %v6342_v50 }
  0x83   : > { %4619 = vrot.lane.b32.xlu1 %v6258_v15, %s5802_s29  ;;  %9603 = vst [vmem:[#allocation9_spill] sm:$0xff] %v6290_v42  ;;  %v6296_v47 = vpack.i.bf16 %v6284_v34, %v6282_v32 }
  0x85   : > { %4629 = vrot.lane.b32.xlu0 %v6264_v17, %s5802_s29  ;;  %9604 = vst [vmem:[#allocation10_spill] sm:$0xff] %v6296_v47 }
  0x89   : > { %4639 = vrot.lane.b32.xlu2 %v6280_v29, %s5802_s29  ;;  %v790_v29 = vrot.slane %v6157_v39, 1 }
  0x8b   : > { %4634 = vrot.lane.b32.xlu1 %v6290_v42, %s5802_s29  ;;  %v792_v42 = vrot.slane %v539_v25, 1  ;;  %v555_v25 = vld [vmem:[#allocation2 + $0xf8] sm:$0xff]  ;;  %v791_v11 = vsel %vm773_vm1, %v789_v45, %v790_v29 }
  0x8d   : > { %4644 = vrot.lane.b32.xlu0 %v6296_v47, %s5802_s29  ;;  %v9607_v47 = vpack.i.bf16 %v6177_v48, %v6162_v41  ;;  %v793_v0 = vsel %vm773_vm1, %v790_v29, %v792_v42  ;;  %v810_v41 = vrot.slane %v6201_v57, 1  ;;  %v812_v48 = vrot.slane %v555_v25, 1  ;;  %v567_v25 = vld [vmem:[#allocation2 + $0x158] sm:$0xff]  ;;  %s5807_s29 = smov 20  }
  0x8e   : > { %v804_v29 = vrot.slane %v6168_v44, 1  ;;  %v805_v42 = vrot.slane %v6172_v46, 1  ;;  %v827_v40 = vrot.slane %v567_v25, 1 }
  0x8f   : > { %v811_v60 = vsel %vm773_vm1, %v809_v38, %v810_v41  ;;  %v818_v38 = vsel %vm773_vm1, %v815_v58, %v817_v63  ;;  %v829_v58 = vrot.slane %v6234_v7, 1 }
  0x90   : > { %v6366_v54 = vpack.i.bf16 %v818_v38, %v816_v37 }
  0x91   : > { %4654 = vrot.lane.b32.xlu2 %v6306_v4, %s9596_s16  ;;  %v551_v4 = vld [vmem:[#allocation2 + $0xd8] sm:$0xff] }
  0x92   : > { %v807_v45 = vrot.slane %v551_v4, 1  ;;  %v806_v4 = vsel %vm773_vm1, %v804_v29, %v805_v42  ;;  %v571_v29 = vld [vmem:[#allocation2 + $0x178] sm:$0xff]  ;;  %9613 = vst [vmem:[#allocation18_spill] sm:$0xff] %v6366_v54 }
  0x93   : > { %4649 = vrot.lane.b32.xlu1 %v9607_v47, %s9596_s16  ;;  %v6336_v47 = vpack.i.bf16 %v793_v0, %v791_v11  ;;  %v813_v11 = vsel %vm773_vm1, %v810_v41, %v812_v48  ;;  %v824_v41 = vrot.slane %v6242_v9, 1  ;;  %v825_v48 = vrot.slane %v6244_v10, 1 }
  0x94   : > { %v808_v0 = vsel %vm773_vm1, %v805_v42, %v807_v45  ;;  %v6354_v51 = vpack.i.bf16 %v813_v11, %v811_v60  ;;  %v819_v42 = vrot.slane %v6213_v61, 1  ;;  %v820_v45 = vrot.slane %v6215_v62, 1 }
  0x95   : > { %4659 = vrot.lane.b32.xlu0 %v6316_v55, %s9596_s16  ;;  %9609 = vst [vmem:[#allocation14_spill] sm:$0xff] %v6336_v47  ;;  %v830_v60 = vrot.slane %v6236_v8, 1  ;;  %v826_v11 = vsel %vm773_vm1, %v824_v41, %v825_v48  ;;  %v828_v63 = vsel %vm773_vm1, %v825_v48, %v827_v40  ;;  %v832_v25 = vrot.slane %v571_v29, 1 }
  0x96   : > { %9611 = vst [vmem:[#allocation16_spill] sm:$0xff] %v6354_v51  ;;  %v6378_v37 = vpack.i.bf16 %v828_v63, %v826_v11  ;;  %v839_v48 = vrot.slane %v6272_v26, 1  ;;  %v840_v40 = vrot.slane %v6274_v27, 1  ;;  %v845_v11 = vrot.slane %v6268_v22, 1 }
  0x97   : > { %v831_v38 = vsel %vm773_vm1, %v829_v58, %v830_v60  ;;  %v833_v41 = vsel %vm773_vm1, %v830_v60, %v832_v25  ;;  %v844_v60 = vrot.slane %v6266_v20, 1 }
  0x98   : > { %9614 = vst [vmem:[#allocation19_spill] sm:$0xff] %v6378_v37  ;;  %v6390_v58 = vpack.i.bf16 %v833_v41, %v831_v38  ;;  %v841_v63 = vsel %vm773_vm1, %v839_v48, %v840_v40 }
  0x99   : > { %4669 = vrot.lane.b32.xlu2 %v6330_v5, %s9596_s16  ;;  %v563_v5 = vld [vmem:[#allocation2 + $0x138] sm:$0xff]  ;;  %v846_v41 = vsel %vm773_vm1, %v844_v60, %v845_v11 }
  0x9b   : > { %4664 = vrot.lane.b32.xlu1 %v6336_v47, %s9596_s16  ;;  %v6360_v47 = vpack.i.bf16 %v808_v0, %v806_v4  ;;  %v579_v4 = vld [vmem:[#allocation2 + $0x1b8] sm:$0xff] }
  0x9c   : > { %v842_v29 = vrot.slane %v579_v4, 1 }
  0x9d   : > { %4674 = vrot.lane.b32.xlu0 %v6342_v50, %s9596_s16  ;;  %9612 = vst [vmem:[#allocation17_spill] sm:$0xff] %v6360_v47  ;;  %v822_v50 = vrot.slane %v563_v5, 1  ;;  %v821_v5 = vsel %vm773_vm1, %v819_v42, %v820_v45  ;;  %v583_v42 = vld [vmem:[#allocation2 + $0x1d8] sm:$0xff] }
  0x9e   : > { %v843_v25 = vsel %vm773_vm1, %v840_v40, %v842_v29  ;;  %v847_v4 = vrot.slane %v583_v42, 1  ;;  %v651_v29 = vrot.slane %v6123_v24, 7  ;;  %v653_v42 = vrot.slane %v6129_v28, 7 }
  0x9f   : > { %v823_v0 = vsel %vm773_vm1, %v820_v45, %v822_v50  ;;  %v834_v50 = vrot.slane %v6252_v12, 1  ;;  %v835_v45 = vrot.slane %v6254_v13, 1  ;;  %v6402_v38 = vpack.i.bf16 %v843_v25, %v841_v63 }
  0xa0   : > { %v848_v48 = vsel %vm773_vm1, %v845_v11, %v847_v4  ;;  %v656_v24 = vrot.slane %v6109_v19, 7  ;;  %v658_v28 = vrot.slane %v6113_v21, 7  ;;  %v648_v63 = vrot.slane %v5940_v2, 7 }
  0xa1   : > { %4684 = vrot.lane.b32.xlu2 %v6354_v51, %s9596_s16  ;;  %v575_v51 = vld [vmem:[#allocation2 + $0x198] sm:$0xff]  ;;  %v6414_v60 = vpack.i.bf16 %v848_v48, %v846_v41  ;;  %v9521_v25 = vrot.slane %v5936_v1, 7  ;;  %v489_v41 = vld [vmem:[%s6068_s15 + $0xf0] sm:$0xff] }
  0xa2   : > { %522 = vst.msk [vmem:[#allocation2 + $0x208] sm:$0xff] %vm386_vm0, %v489_v41 }
  0xa3   : > { %4679 = vrot.lane.b32.xlu1 %v6360_v47, %s9596_s16  ;;  %v6384_v47 = vpack.i.bf16 %v823_v0, %v821_v5  ;;  %v528_v5 = vld [vmem:[#allocation2 + $0x20] sm:$0xff] }
  0xa4   : > { %v650_v40 = vrot.slane %v528_v5, 7 }
  0xa5   : > { %4689 = vrot.lane.b32.xlu0 %v6366_v54, %s9596_s16  ;;  %9615 = vst [vmem:[#allocation20_spill] sm:$0xff] %v6384_v47  ;;  %v837_v54 = vrot.slane %v575_v51, 1  ;;  %v836_v51 = vsel %vm773_vm1, %v834_v50, %v835_v45  ;;  %v850_v50 = vrot.slane %v6284_v34, 1 }
  0xa6   : > { %v6421_v4 = vsel %vm644_vm2, %v650_v40, %v651_v29  ;;  %v666_v40 = vrot.slane %v6097_v14, 7  ;;  %v663_v14 = vrot.slane %v6157_v39, 7  ;;  %v552_v39 = vld [vmem:[#allocation2 + $0xe0] sm:$0xff] }
  0xa7   : > { %v838_v0 = vsel %vm773_vm1, %v835_v45, %v837_v54  ;;  %v849_v54 = vrot.slane %v6282_v32, 1 }
  0xa8   : > { %v6408_v55 = vpack.i.bf16 %v838_v0, %v836_v51  ;;  %v6438_v51 = vsel %vm644_vm2, %v656_v24, %v658_v28  ;;  %v536_v0 = vld [vmem:[#allocation2 + $0x60] sm:$0xff] }
  0xa9   : > { %4699 = vrot.lane.b32.xlu2 %v6378_v37, %s9596_s16  ;;  %v587_v37 = vld [vmem:[#allocation2 + $0x1f8] sm:$0xff]  ;;  %v851_v5 = vsel %vm773_vm1, %v849_v54, %v850_v50  ;;  %v6446_v54 = vsel %vm644_vm2, %v9521_v25, %v648_v63  ;;  %v671_v63 = vrot.slane %v6139_v31, 7 }
  0xaa   : > { %v852_v45 = vrot.slane %v587_v37, 1  ;;  %v6424_v37 = vsel %vm644_vm2, %v651_v29, %v653_v42  ;;  %v668_v29 = vrot.slane %v6101_v16, 7  ;;  %v544_v42 = vld [vmem:[#allocation2 + $0xa0] sm:$0xff] }
  0xab   : > { %4694 = vrot.lane.b32.xlu1 %v6384_v47, %s9596_s16  ;;  %v532_v47 = vld [vmem:[#allocation2 + $0x40] sm:$0xff]  ;;  %v4728_v2 = vpack.i.bf16 %v6424_v37, %v6421_v4  ;;  %v670_v28 = vrot.slane %v544_v42, 7 }
  0xac   : > { %v655_v11 = vrot.slane %v532_v47, 7  ;;  %v540_v47 = vld [vmem:[#allocation2 + $0x80] sm:$0xff]  ;;  %v853_v19 = vsel %vm773_vm1, %v850_v50, %v852_v45  ;;  %v490_v50 = vld [vmem:[%s6068_s15 + $0xf8] sm:$0xff] }
  0xad   : > { %4704 = vrot.lane.b32.xlu0 %v6390_v58, %s9596_s16  ;;  %v665_v48 = vrot.slane %v540_v47, 7  ;;  %v6450_v45 = vpack.i.bf16 %v853_v19, %v851_v5  ;;  %523 = vst.msk [vmem:[#allocation2 + $0x210] sm:$0xff] %vm386_vm0, %v490_v50  ;;  %v6465_v5 = vsel %vm644_vm2, %v666_v40, %v668_v29  ;;  %v683_v29 = vrot.slane %v6201_v57, 7  ;;  %v556_v42 = vld [vmem:[#allocation2 + $0x100] sm:$0xff] }
  0xae   : > { %v6435_v21 = vsel %vm644_vm2, %v655_v11, %v656_v24  ;;  %v660_v11 = vrot.slane %v536_v0, 7  ;;  %v661_v24 = vrot.slane %v6153_v36, 7  ;;  %v673_v36 = vrot.slane %v6143_v33, 7  ;;  %v548_v33 = vld [vmem:[#allocation2 + $0xc0] sm:$0xff] }
  0xaf   : > { %v6458_v16 = vpack.i.bf16 %v6438_v51, %v6435_v21  ;;  %v6462_v47 = vsel %vm644_vm2, %v665_v48, %v666_v40  ;;  %v6483_v0 = vsel %vm644_vm2, %v670_v28, %v671_v63  ;;  %v680_v48 = vrot.slane %v552_v39, 7  ;;  %v564_v39 = vld [vmem:[#allocation2 + $0x140] sm:$0xff] }
  0xb0   : > { %v6471_v19 = vsel %vm644_vm2, %v660_v11, %v661_v24  ;;  %v6480_v31 = vpack.i.bf16 %v6465_v5, %v6462_v47  ;;  %9616 = vst [vmem:[#allocation21_spill] sm:$0xff] %v6483_v0  ;;  %v6486_v41 = vsel %vm644_vm2, %v671_v63, %v673_v36  ;;  %v681_v40 = vrot.slane %v6199_v56, 7 }
  0xb1   : > { %4714 = vrot.lane.b32.xlu2 %v6402_v38, %s9596_s16  ;;  %v675_v11 = vrot.slane %v548_v33, 7  ;;  %v6500_v28 = vpack.i.bf16 %v6486_v41, %v6483_v0  ;;  %v685_v56 = vrot.slane %v556_v42, 7  ;;  %v686_v57 = vrot.slane %v6189_v52, 7 }
  0xb2   : > { %v6504_v63 = vsel %vm644_vm2, %v680_v48, %v681_v40  ;;  %v6507_v36 = vsel %vm644_vm2, %v681_v40, %v683_v29  ;;  %v560_v48 = vld [vmem:[#allocation2 + $0x120] sm:$0xff]  ;;  %v695_v29 = vrot.slane %v564_v39, 7 }
  0xb3   : > { %4709 = vrot.lane.b32.xlu1 %v6408_v55, %s9596_s16  ;;  %9617 = vst [vmem:[#allocation22_spill] sm:$0xff] %v6504_v63  ;;  %v6524_v52 = vpack.i.bf16 %v6507_v36, %v6504_v63  ;;  %v690_v0 = vrot.slane %v560_v48, 7  ;;  %v691_v63 = vrot.slane %v6213_v61, 7  ;;  %v703_v61 = vrot.slane %v6236_v8, 7  ;;  %v576_v48 = vld [vmem:[#allocation2 + $0x1a0] sm:$0xff] }
  0xb4   : > { %9618 = vst [vmem:[#allocation23_spill] sm:$0xff] %v6507_v36 }
  0xb5   : > { %4719 = vrot.lane.b32.xlu0 %v6414_v60, %s9596_s16 }
  0xb9   : > { %4729 = vrot.lane.b32.xlu2 %v4728_v2, %s5804_s22  ;;  %v6474_v2 = vsel %vm644_vm2, %v661_v24, %v663_v14  ;;  %v676_v24 = vrot.slane %v6168_v44, 7  ;;  %v678_v14 = vrot.slane %v6172_v46, 7  ;;  %v688_v44 = vrot.slane %v6191_v53, 7 }
  0xba   : > { %v6492_v50 = vpack.i.bf16 %v6474_v2, %v6471_v19  ;;  %v6527_v53 = vsel %vm644_vm2, %v685_v56, %v686_v57  ;;  %v693_v56 = vrot.slane %v6215_v62, 7 }
  0xbb   : > { %4724 = vrot.lane.b32.xlu1 %v6450_v45, %s9596_s16  ;;  %v6515_v33 = vsel %vm644_vm2, %v675_v11, %v676_v24  ;;  %v6518_v42 = vsel %vm644_vm2, %v676_v24, %v678_v14  ;;  %9619 = vst [vmem:[#allocation24_spill] sm:$0xff] %v6527_v53  ;;  %v6530_v40 = vsel %vm644_vm2, %v686_v57, %v688_v44  ;;  %v696_v11 = vrot.slane %v6242_v9, 7  ;;  %v568_v14 = vld [vmem:[#allocation2 + $0x160] sm:$0xff] }
  0xbc   : > { %9620 = vst [vmem:[#allocation25_spill] sm:$0xff] %v6530_v40  ;;  %v698_v24 = vrot.slane %v6244_v10, 7  ;;  %v6536_v25 = vpack.i.bf16 %v6518_v42, %v6515_v33  ;;  %v6544_v57 = vpack.i.bf16 %v6530_v40, %v6527_v53  ;;  %v700_v9 = vrot.slane %v568_v14, 7 }
  0xbd   : > { %4734 = vrot.lane.b32.xlu0 %v6458_v16, %s5804_s22  ;;  %v701_v10 = vrot.slane %v6234_v7, 7  ;;  %v6548_v44 = vsel %vm644_vm2, %v695_v29, %v696_v11  ;;  %v6559_v53 = vsel %vm644_vm2, %v690_v0, %v691_v63  ;;  %v6562_v14 = vsel %vm644_vm2, %v691_v63, %v693_v56  ;;  %v572_v29 = vld [vmem:[#allocation2 + $0x180] sm:$0xff] }
  0xbe   : > { %9621 = vst [vmem:[#allocation26_spill] sm:$0xff] %v6548_v44  ;;  %v6551_v39 = vsel %vm644_vm2, %v696_v11, %v698_v24  ;;  %v710_v24 = vrot.slane %v576_v48, 7  ;;  %v711_v0 = vrot.slane %v6272_v26, 7  ;;  %v713_v63 = vrot.slane %v6274_v27, 7  ;;  %v580_v56 = vld [vmem:[#allocation2 + $0x1c0] sm:$0xff] }
  0xbf   : > { %9622 = vst [vmem:[#allocation27_spill] sm:$0xff] %v6551_v39  ;;  %v6568_v7 = vpack.i.bf16 %v6551_v39, %v6548_v44  ;;  %v6571_v8 = vsel %vm644_vm2, %v700_v9, %v701_v10  ;;  %v6574_v11 = vsel %vm644_vm2, %v701_v10, %v703_v61  ;;  %v6580_v40 = vpack.i.bf16 %v6562_v14, %v6559_v53 }
  0xc0   : > { %9623 = vst [vmem:[#allocation28_spill] sm:$0xff] %v6559_v53  ;;  %v705_v36 = vrot.slane %v572_v29, 7  ;;  %v706_v44 = vrot.slane %v6252_v12, 7  ;;  %v708_v9 = vrot.slane %v6254_v13, 7  ;;  %v6588_v10 = vpack.i.bf16 %v6574_v11, %v6571_v8  ;;  %v588_v29 = vld [vmem:[#allocation2 + $0x200] sm:$0xff]  ;;  %v6602_v53 = vld [vmem:[#allocation2 + $0x208] sm:$0xff] }
  0xc1   : > { %4744 = vrot.lane.b32.xlu2 %v6480_v31, %s5804_s22  ;;  %9624 = vst [vmem:[#allocation29_spill] sm:$0xff] %v6562_v14  ;;  %v715_v26 = vrot.slane %v580_v56, 7  ;;  %v716_v61 = vrot.slane %v6266_v20, 7  ;;  %v6592_v48 = vsel %vm644_vm2, %v710_v24, %v711_v0  ;;  %v6595_v39 = vsel %vm644_vm2, %v711_v0, %v713_v63  ;;  %v584_v56 = vld [vmem:[#allocation2 + $0x1e0] sm:$0xff] }
  0xc2   : > { %9625 = vst [vmem:[#allocation30_spill] sm:$0xff] %v6571_v8  ;;  %v718_v12 = vrot.slane %v6268_v22, 7  ;;  %v6604_v8 = vld [vmem:[#allocation2 + $0x210] sm:$0xff]  ;;  %v6607_v20 = vsel %vm644_vm2, %v705_v36, %v706_v44  ;;  %v6610_v24 = vsel %vm644_vm2, %v706_v44, %v708_v9  ;;  %v6614_v22 = vpop.permute.xlu0 %4569  ;;  %v6618_v0 = vpack.i.bf16 %v6595_v39, %v6592_v48 }
  0xc3   : > { %4739 = vrot.lane.b32.xlu1 %v6492_v50, %s5804_s22  ;;  %v6512_v46 = vpop.permute.xlu2 %4589  ;;  %9626 = vst [vmem:[#allocation31_spill] sm:$0xff] %v6574_v11  ;;  %v6621_v63 = vsel %vm644_vm2, %v715_v26, %v716_v61  ;;  %v857_v36 = vrot.slane %v588_v29, 7  ;;  %v858_v44 = vrot.slane %v6602_v53, 7  ;;  %v860_v9 = vrot.slane %v6604_v8, 7 }
  0xc4   : > { %9627 = vst [vmem:[#allocation32_spill] sm:$0xff] %v6592_v48  ;;  %v6624_v11 = vsel %vm644_vm2, %v716_v61, %v718_v12  ;;  %v6630_v14 = vpack.i.bf16 %v6610_v24, %v6607_v20  ;;  %v721_v48 = vrot.slane %v6282_v32, 7 }
  0xc5   : > { %4749 = vrot.lane.b32.xlu0 %v6500_v28, %s5804_s22  ;;  %9628 = vst [vmem:[#allocation33_spill] sm:$0xff] %v6595_v39  ;;  %v723_v39 = vrot.slane %v6284_v34, 7  ;;  %v6638_v26 = vpack.i.bf16 %v6624_v11, %v6621_v63  ;;  %v859_v61 = vsel %vm644_vm2, %v857_v36, %v858_v44  ;;  %v861_v12 = vsel %vm644_vm2, %v858_v44, %v860_v9 }
  0xc6   : > { %9630 = vst [vmem:[#allocation35_spill] sm:$0xff] %v6607_v20  ;;  %v9646_v20 = vld [vmem:[#allocation7_spill] sm:$0xff] }
  0xc7   : > { %9631 = vst [vmem:[#allocation36_spill] sm:$0xff] %v6610_v24  ;;  %v6650_v34 = vsel %vm644_vm2, %v721_v48, %v723_v39 }
  0xc8   : > { %9632 = vst [vmem:[#allocation37_spill] sm:$0xff] %v6621_v63  ;;  %v6656_v63 = vpack.i.bf16 %v861_v12, %v859_v61 }
  0xc9   : > { %4759 = vrot.lane.b32.xlu2 %v6524_v52, %s5804_s22  ;;  %9633 = vst [vmem:[#allocation38_spill] sm:$0xff] %v6624_v11 }
  0xca   : > { %9636 = vst [vmem:[#allocation41_spill] sm:$0xff] %v6650_v34 }
  0xcb   : > { %4754 = vrot.lane.b32.xlu1 %v6536_v25, %s5804_s22  ;;  %v6556_v62 = vpop.permute.xlu2 %4594  ;;  %9637 = vst [vmem:[#allocation42_spill] sm:$0xff] %v6656_v63 }
  0xcd   : > { %4764 = vrot.lane.b32.xlu0 %v6544_v57, %s5804_s22 }
  0xd1   : > { %4774 = vrot.lane.b32.xlu2 %v6568_v7, %s5804_s22 }
  0xd3   : > { %4769 = vrot.lane.b32.xlu1 %v6580_v40, %s5804_s22  ;;  %v6600_v13 = vpop.permute.xlu2 %4609 }
  0xd4   : > { %9629 = vst [vmem:[#allocation34_spill] sm:$0xff] %v6600_v13  ;;  %v720_v13 = vrot.slane %v584_v56, 7 }
  0xd5   : > { %4779 = vrot.lane.b32.xlu0 %v6588_v10, %s5804_s22 }
  0xd6   : > { %v6647_v32 = vsel %vm644_vm2, %v720_v13, %v721_v48 }
  0xd7   : > { %9635 = vst [vmem:[#allocation40_spill] sm:$0xff] %v6647_v32  ;;  %v6662_v44 = vpack.i.bf16 %v6650_v34, %v6647_v32 }
  0xd9   : > { %4789 = vrot.lane.b32.xlu2 %v6618_v0, %s5804_s22 }
  0xdb   : > { %4784 = vrot.lane.b32.xlu1 %v6630_v14, %s5804_s22  ;;  %v6644_v29 = vpop.permute.xlu2 %4624 }
  0xdc   : > { %9634 = vst [vmem:[#allocation39_spill] sm:$0xff] %v6644_v29  ;;  %v9648_v29 = vld [vmem:[#allocation9_spill] sm:$0xff] }
  0xdd   : > { %v6652_v56 = vpop.permute.xlu1 %4579  ;;  %4794 = vrot.lane.b32.xlu0 %v6638_v26, %s5804_s22 }
  0xdf   : > { %v6658_v36 = vpop.permute.xlu0 %4574 }
  0xe1   : > { %4804 = vrot.lane.b32.xlu2 %v6656_v63, %s5804_s22 }
  0xe3   : > { %4799 = vrot.lane.b32.xlu1 %v6662_v44, %s5804_s22  ;;  %v6668_v39 = vpop.permute.xlu2 %4639 }
  0xe4   : > { %9638 = vst [vmem:[#allocation43_spill] sm:$0xff] %v6668_v39 }
  0xe5   : > { %v6670_v48 = vpop.permute.xlu1 %4584  ;;  %4809 = vrot.lane.b32.xlu0 %v6137_v30, %s5805_s24 }
  0xe7   : > { %v6674_v13 = vpop.permute.xlu0 %4599 }
  0xe9   : > { %4819 = vrot.lane.b32.xlu2 %v6166_v43, %s5805_s24 }
  0xeb   : > { %4814 = vrot.lane.b32.xlu1 %v6121_v23, %s5805_s24  ;;  %v6680_v9 = vpop.permute.xlu2 %4654 }
  0xed   : > { %v6682_v61 = vpop.permute.xlu1 %4604  ;;  %4824 = vrot.lane.b32.xlu0 %v6107_v18, %s5805_s24 }
  0xee   : > { %9639 = vst [vmem:[#allocation44_spill] sm:$0xff] %v6682_v61 }
  0xef   : > { %v6686_v12 = vpop.permute.xlu0 %4614 }
  0xf0   : > { %9640 = vst [vmem:[#allocation45_spill] sm:$0xff] %v6686_v12  ;;  %v9650_v12 = vld [vmem:[#allocation8_spill] sm:$0xff] }
  0xf1   : > { %4834 = vrot.lane.b32.xlu2 %v6183_v49, %s5805_s24 }
  0xf3   : > { %4829 = vrot.lane.b32.xlu1 %v6151_v35, %s5805_s24  ;;  %v6692_v30 = vpop.permute.xlu2 %4669 }
  0xf5   : > { %v6694_v32 = vpop.permute.xlu1 %4619  ;;  %4839 = vrot.lane.b32.xlu0 %v6221_v3, %s5805_s24 }
  0xf6   : > { %9641 = vst [vmem:[#allocation46_spill] sm:$0xff] %v6694_v32 }
  0xf7   : > { %v6698_v34 = vpop.permute.xlu0 %4629 }
  0xf8   : > { %9642 = vst [vmem:[#allocation47_spill] sm:$0xff] %v6698_v34 }
  0xf9   : > { %4849 = vrot.lane.b32.xlu2 %v6231_v6, %s5805_s24 }
  0xfb   : > { %4844 = vrot.lane.b32.xlu1 %v6209_v59, %s5805_s24  ;;  %v6704_v11 = vpop.permute.xlu2 %4684 }
  0xfc   : > { %9643 = vst [vmem:[#allocation48_spill] sm:$0xff] %v6704_v11 }
  0xfd   : > { %v6706_v39 = vpop.permute.xlu1 %4634  ;;  %4854 = vrot.lane.b32.xlu0 %v6258_v15, %s5805_s24 }
  0xfe   : > { %9644 = vst [vmem:[#allocation49_spill] sm:$0xff] %v6706_v39  ;;  %v9649_v39 = vld [vmem:[#allocation10_spill] sm:$0xff] }
  0xff   : > { %v6710_v63 = vpop.permute.xlu0 %4644 }
 0x100   : > { %9645 = vst [vmem:[#allocation50_spill] sm:$0xff] %v6710_v63  ;;  %v4883_v63 = vpack.i.bf16 %v6604_v8, %v6602_v53 }
 0x101   : > { %4864 = vrot.lane.b32.xlu2 %v6264_v17, %s5805_s24 }
 0x103   : > { %4859 = vrot.lane.b32.xlu1 %v9646_v20, %s5805_s24  ;;  %v6716_v24 = vpop.permute.xlu2 %4699 }
 0x104   : > { %9647 = vst [vmem:[#allocation7_spill] sm:$0xff] %v6716_v24 }
 0x105   : > { %v6718_v34 = vpop.permute.xlu1 %4649  ;;  %4869 = vrot.lane.b32.xlu0 %v9648_v29, %s5805_s24  ;;  %v9652_v29 = vld [vmem:[#allocation11_spill] sm:$0xff] }
 0x107   : > { %v6722_v32 = vpop.permute.xlu0 %4659 }
 0x109   : > { %4879 = vrot.lane.b32.xlu2 %v9649_v39, %s5805_s24  ;;  %v9654_v39 = vld [vmem:[#allocation12_spill] sm:$0xff] }
 0x10b   : > { %4874 = vrot.lane.b32.xlu1 %v9650_v12, %s5805_s24  ;;  %v6733_v24 = vpop.permute.xlu2 %4714 }
 0x10c   : > { %9651 = vst [vmem:[#allocation9_spill] sm:$0xff] %v6733_v24 }
 0x10d   : > { %v6730_v11 = vpop.permute.xlu1 %4664  ;;  %4884 = vrot.lane.b32.xlu0 %v4883_v63, %s5805_s24  ;;  %s5810_s24 = smov 96  }
 0x10f   : > { %v6735_v61 = vpop.permute.xlu0 %4674 }
 0x111   : > { %4894 = vrot.lane.b32.xlu2 %v6458_v16, %s5806_s25 }
 0x113   : > { %4889 = vrot.lane.b32.xlu1 %v9652_v29, %s5807_s29  ;;  %v6745_v8 = vpop.permute.xlu2 %4729 }
 0x115   : > { %v6741_v53 = vpop.permute.xlu1 %4679  ;;  %4899 = vrot.lane.b32.xlu0 %v6121_v23, %s5808_s30  ;;  %v9657_v23 = vld [vmem:[#allocation14_spill] sm:$0xff] }
 0x117   : > { %v6747_v63 = vpop.permute.xlu0 %4689 }
 0x118   : > { %9653 = vst [vmem:[#allocation10_spill] sm:$0xff] %v6747_v63 }
 0x119   : > { %4909 = vrot.lane.b32.xlu2 %v9654_v39, %s5807_s29 }
 0x11b   : > { %4904 = vrot.lane.b32.xlu1 %v9654_v39, %s5809_s12  ;;  %v6759_v29 = vpop.permute.xlu2 %4744 }
 0x11d   : > { %v6753_v16 = vpop.permute.xlu1 %4694  ;;  %4914 = vrot.lane.b32.xlu0 %v6492_v50, %s5806_s25 }
 0x11e   : > { %9655 = vst [vmem:[#allocation8_spill] sm:$0xff] %v6753_v16  ;;  %v9661_v16 = vld [vmem:[#allocation13_spill] sm:$0xff] }
 0x11f   : > { %v6757_v12 = vpop.permute.xlu0 %4704 }
 0x120   : > { %9656 = vst [vmem:[#allocation11_spill] sm:$0xff] %v6757_v12 }
 0x121   : > { %4924 = vrot.lane.b32.xlu2 %v9657_v23, %s5809_s12 }
 0x123   : > { %4919 = vrot.lane.b32.xlu1 %v6166_v43, %s5808_s30  ;;  %v6773_v50 = vpop.permute.xlu2 %4759 }
 0x125   : > { %v6765_v24 = vpop.permute.xlu1 %4709  ;;  %4929 = vrot.lane.b32.xlu0 %v9657_v23, %s5807_s29 }
 0x126   : > { %9658 = vst [vmem:[#allocation12_spill] sm:$0xff] %v6765_v24  ;;  %v9665_v24 = vld [vmem:[#allocation17_spill] sm:$0xff] }
 0x127   : > { %v6769_v39 = vpop.permute.xlu0 %4719 }
 0x128   : > { %9659 = vst [vmem:[#allocation14_spill] sm:$0xff] %v6769_v39 }
 0x129   : > { %4939 = vrot.lane.b32.xlu2 %v6107_v18, %s5808_s30 }
 0x12b   : > { %4934 = vrot.lane.b32.xlu1 %v6480_v31, %s5806_s25  ;;  %v6787_v23 = vpop.permute.xlu2 %4774 }
 0x12c   : > { %9662 = vst [vmem:[#allocation13_spill] sm:$0xff] %v6787_v23 }
 0x12d   : > { %v6777_v12 = vpop.permute.xlu1 %4724  ;;  %4944 = vrot.lane.b32.xlu0 %v9661_v16, %s5809_s12 }
 0x12e   : > { %9660 = vst [vmem:[#allocation51_spill] sm:$0xff] %v6777_v12  ;;  %v9663_v12 = vld [vmem:[#allocation15_spill] sm:$0xff] }
 0x12f   : > { %v6781_v43 = vpop.permute.xlu0 %4734 }
 0x131   : > { %4954 = vrot.lane.b32.xlu2 %v6500_v28, %s5806_s25 }
 0x133   : > { %4949 = vrot.lane.b32.xlu1 %v9661_v16, %s5807_s29  ;;  %v6803_v28 = vpop.permute.xlu2 %4789 }
 0x134   : > { %9664 = vst [vmem:[#allocation15_spill] sm:$0xff] %v6803_v28  ;;  %v9670_v28 = vld [vmem:[#allocation16_spill] sm:$0xff] }
 0x135   : > { %v6789_v18 = vpop.permute.xlu1 %4739  ;;  %4959 = vrot.lane.b32.xlu0 %v6151_v35, %s5808_s30 }
 0x137   : > { %v6793_v31 = vpop.permute.xlu0 %4749 }
 0x139   : > { %4969 = vrot.lane.b32.xlu2 %v9663_v12, %s5807_s29 }
 0x13b   : > { %4964 = vrot.lane.b32.xlu1 %v9663_v12, %s5809_s12  ;;  %v6817_v23 = vpop.permute.xlu2 %4804 }
 0x13c   : > { %9668 = vst [vmem:[#allocation53_spill] sm:$0xff] %v6817_v23 }
 0x13d   : > { %v6799_v39 = vpop.permute.xlu1 %4754  ;;  %4974 = vrot.lane.b32.xlu0 %v6536_v25, %s5806_s25 }
 0x13f   : > { %v6805_v16 = vpop.permute.xlu0 %4764 }
 0x141   : > { %4984 = vrot.lane.b32.xlu2 %v9665_v24, %s5809_s12 }
 0x143   : > { %4979 = vrot.lane.b32.xlu1 %v6183_v49, %s5808_s30 }
 0x145   : > { %v6811_v35 = vpop.permute.xlu1 %4769  ;;  %4989 = vrot.lane.b32.xlu0 %v9665_v24, %s5807_s29  ;;  %v6831_v24 = vpop.permute.xlu2 %4819 }
 0x146   : > { %9666 = vst [vmem:[#allocation17_spill] sm:$0xff] %v6811_v35 }
 0x147   : > { %v6815_v12 = vpop.permute.xlu0 %4779 }
 0x148   : > { %9667 = vst [vmem:[#allocation52_spill] sm:$0xff] %v6815_v12 }
 0x149   : > { %4999 = vrot.lane.b32.xlu2 %v6221_v3, %s5808_s30 }
 0x14b   : > { %4994 = vrot.lane.b32.xlu1 %v6524_v52, %s5806_s25  ;;  %v9673_v52 = vld [vmem:[#allocation18_spill] sm:$0xff] }
 0x14d   : > { %v6823_v25 = vpop.permute.xlu1 %4784  ;;  %5004 = vrot.lane.b32.xlu0 %v9670_v28, %s5809_s12 }
 0x14e   : > { %9669 = vst [vmem:[#allocation54_spill] sm:$0xff] %v6823_v25 }
 0x14f   : > { %v6827_v49 = vpop.permute.xlu0 %4794 }
 0x150   : > { %9671 = vst [vmem:[#allocation16_spill] sm:$0xff] %v6827_v49  ;;  %v6845_v49 = vpop.permute.xlu2 %4834 }
 0x151   : > { %5014 = vrot.lane.b32.xlu2 %v6544_v57, %s5806_s25 }
 0x153   : > { %5009 = vrot.lane.b32.xlu1 %v9670_v28, %s5807_s29 }
 0x155   : > { %v6835_v23 = vpop.permute.xlu1 %4799  ;;  %5019 = vrot.lane.b32.xlu0 %v6209_v59, %s5808_s30  ;;  %v1933_v59 = vld [vmem:[%s9484_s1 + $0x10] sm:$0x3] }
 0x156   : > { %9672 = vst [vmem:[#allocation55_spill] sm:$0xff] %v6835_v23  ;;  %v9674_v23 = vld [vmem:[#allocation20_spill] sm:$0xff] }
 0x157   : > { %v6839_v3 = vpop.permute.xlu0 %4809 }
 0x159   : > { %5029 = vrot.lane.b32.xlu2 %v9673_v52, %s5807_s29 }
 0x15b   : > { %5024 = vrot.lane.b32.xlu1 %v9673_v52, %s5809_s12  ;;  %v1943_v52 = vunpack.c.l.b16 %v1933_v59  ;;  %v9677_v59 = vld [vmem:[#allocation19_spill] sm:$0xff] }
 0x15d   : > { %v6847_v57 = vpop.permute.xlu1 %4814  ;;  %5034 = vrot.lane.b32.xlu0 %v6580_v40, %s5806_s25  ;;  %v1946_v12 = vpack.c.b16 %v1943_v52, %v1943_v52  ;;  %v6864_v40 = vpop.permute.xlu2 %4849 }
 0x15e   : > { %9675 = vst [vmem:[#allocation18_spill] sm:$0xff] %v6864_v40 }
 0x15f   : > { %v6851_v28 = vpop.permute.xlu0 %4824  ;;  %v2000_v63 = vsel %vm1998_vm3, %v1946_v12, 0 }
 0x160   : > { %2007 = vmatpush.bf16.msra.mxu0 %v2000_v63  ;;  %v9679_v63 = vmov 0.0  }
 0x161   : > { %5044 = vrot.lane.b32.xlu2 %v9674_v23, %s5809_s12  ;;  %2195 = vst.msk [vmem:[#allocation3] sm:$0xff] %vm1880_vm4, %v9679_v63 }
 0x162   : > { %2196 = vst.msk [vmem:[#allocation3 + $0x8] sm:$0xff] %vm1880_vm4, %v9679_v63 }
 0x163   : > { %5039 = vrot.lane.b32.xlu1 %v6231_v6, %s5808_s30  ;;  %v4496_v6 = vld [vmem:[%s9484_s1 + $0x8] sm:$0xff]  ;;  %2197 = vst.msk [vmem:[#allocation3 + $0x10] sm:$0xff] %vm1880_vm4, %v9679_v63 }
 0x164   : > { %2008 = vmatpush.bf16.msra.mxu0 %v4496_v6  ;;  %2198 = vst.msk [vmem:[#allocation3 + $0x18] sm:$0xff] %vm1880_vm4, %v9679_v63 }
 0x165   : > { %v6860_v25 = vpop.permute.xlu1 %4829  ;;  %5049 = vrot.lane.b32.xlu0 %v9674_v23, %s5807_s29  ;;  %v6887_v12 = vpop.permute.xlu2 %4864  ;;  %2199 = vst.msk [vmem:[#allocation3 + $0x20] sm:$0xff] %vm1880_vm4, %v9679_v63 }
 0x166   : > { %9680 = vst [vmem:[#allocation56_spill] sm:$0xff] %v6887_v12  ;;  %v4732_v12 = vunpack.i.h.bf16 %v6745_v8 }
 0x167   : > { %v6866_v35 = vpop.permute.xlu0 %4839  ;;  %2200 = vst.msk [vmem:[#allocation3 + $0x28] sm:$0xff] %vm1880_vm4, %v9679_v63 }
 0x168   : > { %2201 = vst.msk [vmem:[#allocation3 + $0x30] sm:$0xff] %vm1880_vm4, %v9679_v63 }
 0x169   : > { %5059 = vrot.lane.b32.xlu2 %v6258_v15, %s5808_s30  ;;  %v4495_v15 = vld [vmem:[%s9484_s1] sm:$0xff]  ;;  %2202 = vst.msk [vmem:[#allocation3 + $0x38] sm:$0xff] %vm1880_vm4, %v9679_v63 }
 0x16a   : > { %2009 = vmatpush.bf16.msra.mxu0 %v4495_v15  ;;  %2203 = vst.msk [vmem:[#allocation3 + $0x40] sm:$0xff] %vm1880_vm4, %v9679_v63 }
 0x16b   : > { %5054 = vrot.lane.b32.xlu1 %v6568_v7, %s5806_s25  ;;  %2204 = vst.msk [vmem:[#allocation3 + $0x48] sm:$0xff] %vm1880_vm4, %v9679_v63 }
 0x16c   : > { %2205 = vst.msk [vmem:[#allocation3 + $0x50] sm:$0xff] %vm1880_vm4, %v9679_v63 }
 0x16d   : > { %v6876_v23 = vpop.permute.xlu1 %4844  ;;  %5064 = vrot.lane.b32.xlu0 %v9677_v59, %s5809_s12  ;;  %v6921_v6 = vpop.permute.xlu2 %4879  ;;  %2206 = vst.msk [vmem:[#allocation3 + $0x58] sm:$0xff] %vm1880_vm4, %v9679_v63 }
 0x16e   : > { %9676 = vst [vmem:[#allocation20_spill] sm:$0xff] %v6876_v23 }
 0x16f   : > { %v6883_v52 = vpop.permute.xlu0 %4854  ;;  %9683 = vst [vmem:[#allocation59_spill] sm:$0xff] %v6921_v6 }
 0x170   : > { %9678 = vst [vmem:[#allocation19_spill] sm:$0xff] %v6883_v52  ;;  %v5698_v52 = vld [vmem:[#allocation2 + $0x1a8] sm:$0xff] }
 0x171   : > { %5074 = vrot.lane.b32.xlu2 %v6588_v10, %s5806_s25  ;;  %2207 = vst.msk [vmem:[#allocation3 + $0x60] sm:$0xff] %vm1880_vm4, %v9679_v63 }
 0x172   : > { %2208 = vst.msk [vmem:[#allocation3 + $0x68] sm:$0xff] %vm1880_vm4, %v9679_v63 }
 0x173   : > { %5069 = vrot.lane.b32.xlu1 %v9677_v59, %s5807_s29  ;;  %2209 = vst.msk [vmem:[#allocation3 + $0x70] sm:$0xff] %vm1880_vm4, %v9679_v63 }
 0x174   : > { %2210 = vst.msk [vmem:[#allocation3 + $0x78] sm:$0xff] %vm1880_vm4, %v9679_v63 }
 0x175   : > { %v6901_v7 = vpop.permute.xlu1 %4859  ;;  %5079 = vrot.lane.b32.xlu0 %v9646_v20, %s5808_s30  ;;  %v524_v20 = vld [vmem:[#allocation2] sm:$0xff]  ;;  %2211 = vst.msk [vmem:[#allocation3 + $0x80] sm:$0xff] %vm1880_vm4, %v9679_v63 }
 0x176   : > { %9681 = vst [vmem:[#allocation57_spill] sm:$0xff] %v6901_v7  ;;  %v645_v15 = vrot.slane %v524_v20, 7  ;;  %v9686_v20 = vrot.slane %v5936_v1, 7  ;;  %v4895_v7 = vpop.permute.xlu2 %4894 }
 0x177   : > { %v6909_v10 = vpop.permute.xlu0 %4869  ;;  %2212 = vst.msk [vmem:[#allocation3 + $0x88] sm:$0xff] %vm1880_vm4, %v9679_v63 }
 0x178   : > { %9682 = vst [vmem:[#allocation58_spill] sm:$0xff] %v6909_v10  ;;  %v4651_v10 = vunpack.i.l.bf16 %v6718_v34 }
 0x179   : > { %5089 = vrot.lane.b32.xlu2 %v6390_v58, %s5807_s29  ;;  %2213 = vst.msk [vmem:[#allocation3 + $0x90] sm:$0xff] %vm1880_vm4, %v9679_v63 }
 0x17a   : > { %2214 = vst.msk [vmem:[#allocation3 + $0x98] sm:$0xff] %vm1880_vm4, %v9679_v63 }
 0x17b   : > { %5084 = vrot.lane.b32.xlu1 %v6390_v58, %s5809_s12  ;;  %v4572_v58 = vunpack.i.h.bf16 %v6614_v22  ;;  %2215 = vst.msk [vmem:[#allocation3 + $0xa0] sm:$0xff] %vm1880_vm4, %v9679_v63 }
 0x17c   : > { %2216 = vst.msk [vmem:[#allocation3 + $0xa8] sm:$0xff] %vm1880_vm4, %v9679_v63 }
 0x17d   : > { %v6929_v59 = vpop.permute.xlu1 %4874  ;;  %5094 = vrot.lane.b32.xlu0 %v6630_v14, %s5806_s25  ;;  %v4652_v14 = vunpack.i.h.bf16 %v6718_v34  ;;  %v1651_v1 = vsel %vm386_vm0, %v6446_v54, %v4572_v58  ;;  %v4812_v34 = vunpack.i.h.bf16 %v6839_v3  ;;  %v5118_v54 = vpack.i.bf16 %v6274_v27, %v5698_v52  ;;  %2217 = vst.msk [vmem:[#allocation3 + $0xb0] sm:$0xff] %vm1880_vm4, %v9679_v63 }
 0x17e   : > { %9684 = vst [vmem:[#allocation60_spill] sm:$0xff] %v6929_v59  ;;  %v4571_v59 = vunpack.i.l.bf16 %v6614_v22  ;;  %v4731_v22 = vunpack.i.l.bf16 %v6745_v8  ;;  %v4897_v52 = vunpack.i.h.bf16 %v4895_v7 }
 0x17f   : > { %v6937_v6 = vpop.permute.xlu0 %4884  ;;  %v1684_v8 = vsel %vm1682_vm6, %v1651_v1, %v4652_v14  ;;  %2218 = vst.msk [vmem:[#allocation3 + $0xb8] sm:$0xff] %vm1880_vm4, %v9679_v63 }
 0x180   : > { %9685 = vst [vmem:[#allocation61_spill] sm:$0xff] %v6937_v6  ;;  %v647_v6 = vsel %vm644_vm2, %v645_v15, %v9686_v20  ;;  %v4811_v15 = vunpack.i.l.bf16 %v6839_v3  ;;  %v1717_v58 = vsel %vm1715_vm5, %v1684_v8, %v4732_v12 }
 0x181   : > { %5104 = vrot.lane.b32.xlu2 %v6408_v55, %s5809_s12  ;;  %v1650_v20 = vsel %vm386_vm0, %v647_v6, %v4571_v59  ;;  %2219 = vst.msk [vmem:[#allocation3 + $0xc0] sm:$0xff] %vm1880_vm4, %v9679_v63 }
 0x182   : > { %v1683_v3 = vsel %vm1682_vm6, %v1650_v20, %v4651_v10  ;;  %v4896_v10 = vunpack.i.l.bf16 %v4895_v7  ;;  %2220 = vst.msk [vmem:[#allocation3 + $0xc8] sm:$0xff] %vm1880_vm4, %v9679_v63  ;;  %v4910_v20 = vpop.permute.xlu2 %4909 }
 0x183   : > { %5099 = vrot.lane.b32.xlu1 %v6264_v17, %s5808_s30  ;;  %v1716_v6 = vsel %vm1715_vm5, %v1683_v3, %v4731_v22  ;;  %2221 = vst.msk [vmem:[#allocation3 + $0xd0] sm:$0xff] %vm1880_vm4, %v9679_v63 }
 0x184   : > { %v1749_v27 = vsel %vm1748_vm7, %v1716_v6, %v4811_v15  ;;  %2222 = vst.msk [vmem:[#allocation3 + $0xd8] sm:$0xff] %vm1880_vm4, %v9679_v63  ;;  %v4577_v15 = vunpack.i.h.bf16 %v6658_v36  ;;  %v4656_v6 = vunpack.i.l.bf16 %v6680_v9 }
 0x185   : > { %5109 = vrot.lane.b32.xlu0 %v6408_v55, %s5807_s29  ;;  %v4890_v17 = vpop.permute.xlu1 %4889  ;;  %v1750_v55 = vsel %vm1748_vm7, %v1717_v58, %v4812_v34  ;;  %2223 = vst.msk [vmem:[#allocation3 + $0xe0] sm:$0xff] %vm1880_vm4, %v9679_v63 }
 0x186   : > { %v4892_v40 = vunpack.i.h.bf16 %v4890_v17  ;;  %v4891_v23 = vunpack.i.l.bf16 %v4890_v17  ;;  %2224 = vst.msk [vmem:[#allocation3 + $0xe8] sm:$0xff] %vm1880_vm4, %v9679_v63 }
 0x187   : > { %v4900_v59 = vpop.permute.xlu0 %4899  ;;  %2225 = vst.msk [vmem:[#allocation3 + $0xf0] sm:$0xff] %vm1880_vm4, %v9679_v63 }
 0x188   : > { %v1782_v12 = vsel %vm1781_vm8, %v1749_v27, %v4891_v23  ;;  %v1783_v14 = vsel %vm1781_vm8, %v1750_v55, %v4892_v40  ;;  %v4902_v22 = vunpack.i.h.bf16 %v4900_v59  ;;  %v4901_v1 = vunpack.i.l.bf16 %v4900_v59  ;;  %2226 = vst.msk [vmem:[#allocation3 + $0xf8] sm:$0xff] %vm1880_vm4, %v9679_v63  ;;  %v5699_v55 = vld [vmem:[#allocation2 + $0x1c8] sm:$0xff] }
 0x189   : > { %5119 = vrot.lane.b32.xlu2 %v5118_v54, %s5808_s30  ;;  %v1815_v23 = vsel %vm1814_vm9, %v1782_v12, %v4896_v10  ;;  %v1816_v40 = vsel %vm1814_vm9, %v1783_v14, %v4897_v52  ;;  %v4576_v54 = vunpack.i.l.bf16 %v6658_v36  ;;  %2227 = vst.msk [vmem:[#allocation3 + $0x100] sm:$0xff] %vm1880_vm4, %v9679_v63  ;;  %v5700_v52 = vld [vmem:[#allocation2 + $0x1d0] sm:$0xff]  ;;  %v4657_v10 = vunpack.i.h.bf16 %v6680_v9 }
 0x18a   : > { %v1848_v8 = vsel %vm1847_vm10, %v1815_v23, %v4901_v1  ;;  %v1849_v17 = vsel %vm1847_vm10, %v1816_v40, %v4902_v22  ;;  %2228 = vst.msk [vmem:[#allocation3 + $0x108] sm:$0xff] %vm1880_vm4, %v9679_v63  ;;  %v5138_v36 = vpack.i.bf16 %v5700_v52, %v5699_v55  ;;  %v4736_v59 = vunpack.i.l.bf16 %v6781_v43 }
 0x18b   : > { %5114 = vrot.lane.b32.xlu1 %v6618_v0, %s5806_s25  ;;  %2229 = vst.msk [vmem:[#allocation3 + $0x110] sm:$0xff] %vm1880_vm4, %v9679_v63  ;;  %v4737_v12 = vunpack.i.h.bf16 %v6781_v43  ;;  %v1653_v9 = vsel %vm386_vm0, %v6424_v37, %v4577_v15  ;;  %v4817_v22 = vunpack.i.h.bf16 %v6847_v57  ;;  %v4816_v1 = vunpack.i.l.bf16 %v6847_v57 }
 0x18c   : > { %2230 = vst.msk [vmem:[#allocation3 + $0x118] sm:$0xff] %vm1880_vm4, %v9679_v63  ;;  %v4912_v43 = vunpack.i.h.bf16 %v4910_v20  ;;  %v4911_v23 = vunpack.i.l.bf16 %v4910_v20  ;;  %v1686_v40 = vsel %vm1682_vm6, %v1653_v9, %v4657_v10  ;;  %v5702_v9 = vld [vmem:[#allocation2 + $0x1f0] sm:$0xff] }
 0x18d   : > { %5124 = vrot.lane.b32.xlu0 %v6402_v38, %s5809_s12  ;;  %v4905_v7 = vpop.permute.xlu1 %4904  ;;  %2231 = vst.msk [vmem:[#allocation3 + $0x120] sm:$0xff] %vm1880_vm4, %v9679_v63  ;;  %v1719_v57 = vsel %vm1715_vm5, %v1686_v40, %v4737_v12  ;;  %v4582_v12 = vunpack.i.h.bf16 %v6652_v56  ;;  %v4821_v40 = vunpack.i.l.bf16 %v6831_v24 }
 0x18e   : > { %v4907_v34 = vunpack.i.h.bf16 %v4905_v7  ;;  %v4906_v0 = vunpack.i.l.bf16 %v4905_v7  ;;  %2232 = vst.msk [vmem:[#allocation3 + $0x128] sm:$0xff] %vm1880_vm4, %v9679_v63 }
 0x18f   : > { %v4915_v14 = vpop.permute.xlu0 %4914  ;;  %2233 = vst.msk [vmem:[#allocation3 + $0x130] sm:$0xff] %vm1880_vm4, %v9679_v63 }
 0x190   : > { %v1881_v3 = vsel %vm1880_vm4, %v1848_v8, %v4906_v0  ;;  %v1882_v58 = vsel %vm1880_vm4, %v1849_v17, %v4907_v34  ;;  %v4917_v7 = vunpack.i.h.bf16 %v4915_v14  ;;  %v4916_v34 = vunpack.i.l.bf16 %v4915_v14  ;;  %2234 = vst.msk [vmem:[#allocation3 + $0x138] sm:$0xff] %vm1880_vm4, %v9679_v63 }
 0x191   : > { %5134 = vrot.lane.b32.xlu2 %v6638_v26, %s5806_s25  ;;  %v1913_v27 = vpack.c.bf16 %v1882_v58, %v1881_v3  ;;  %v1652_v26 = vsel %vm386_vm0, %v6421_v4, %v4576_v54  ;;  %v1752_v8 = vsel %vm1748_vm7, %v1719_v57, %v4817_v22  ;;  %2235 = vst.msk [vmem:[#allocation3 + $0x140] sm:$0xff] %vm1880_vm4, %v9679_v63  ;;  %v4925_v3 = vpop.permute.xlu2 %4924  ;;  %v4581_v14 = vunpack.i.l.bf16 %v6652_v56 }
 0x192   : > { %v1785_v17 = vsel %vm1781_vm8, %v1752_v8, %v4912_v43  ;;  %2236 = vst.msk [vmem:[#allocation3 + $0x148] sm:$0xff] %vm1880_vm4, %v9679_v63  ;;  %v4927_v58 = vunpack.i.h.bf16 %v4925_v3  ;;  %v4741_v43 = vunpack.i.l.bf16 %v6789_v18 }
 0x193   : > { %5129 = vrot.lane.b32.xlu1 %v6402_v38, %s5807_s29  ;;  %4381 = vmatmul.msk.bf16.vlgmr.msra.gmra.mxu0 %vm1949_vm11, %v1913_v27  ;;  %v1685_v38 = vsel %vm1682_vm6, %v1652_v26, %v4656_v6  ;;  %v4926_v6 = vunpack.i.l.bf16 %v4925_v3  ;;  %v1818_v55 = vsel %vm1814_vm9, %v1785_v17, %v4917_v7  ;;  %2237 = vst.msk [vmem:[#allocation3 + $0x150] sm:$0xff] %vm1880_vm4, %v9679_v63  ;;  %v5701_v26 = vld [vmem:[#allocation2 + $0x1e8] sm:$0xff] }
 0x194   : > { %v1718_v37 = vsel %vm1715_vm5, %v1685_v38, %v4736_v59  ;;  %2238 = vst.msk [vmem:[#allocation3 + $0x158] sm:$0xff] %vm1880_vm4, %v9679_v63  ;;  %v5158_v22 = vpack.i.bf16 %v5702_v9, %v5701_v26  ;;  %v4742_v38 = vunpack.i.h.bf16 %v6789_v18  ;;  %v1655_v18 = vsel %vm386_vm0, %v6438_v51, %v4582_v12 }
 0x195   : > { %5139 = vrot.lane.b32.xlu0 %v5138_v36, %s5808_s30  ;;  %v4920_v4 = vpop.permute.xlu1 %4919  ;;  %v1751_v20 = vsel %vm1748_vm7, %v1718_v37, %v4816_v1  ;;  %2239 = vst.msk [vmem:[#allocation3 + $0x160] sm:$0xff] %vm1880_vm4, %v9679_v63  ;;  %v4662_v1 = vunpack.i.h.bf16 %v6722_v32  ;;  %v4587_v26 = vunpack.i.h.bf16 %v6670_v48  ;;  %v4586_v9 = vunpack.i.l.bf16 %v6670_v48 }
 0x196   : > { %v4922_v0 = vunpack.i.h.bf16 %v4920_v4  ;;  %v4921_v15 = vunpack.i.l.bf16 %v4920_v4  ;;  %v1784_v54 = vsel %vm1781_vm8, %v1751_v20, %v4911_v23  ;;  %2240 = vst.msk [vmem:[#allocation3 + $0x168] sm:$0xff] %vm1880_vm4, %v9679_v63  ;;  %v4822_v4 = vunpack.i.h.bf16 %v6831_v24 }
 0x197   : > { %v1817_v27 = vsel %vm1814_vm9, %v1784_v54, %v4916_v34  ;;  %v4930_v10 = vpop.permute.xlu0 %4929  ;;  %2241 = vst.msk [vmem:[#allocation3 + $0x170] sm:$0xff] %vm1880_vm4, %v9679_v63  ;;  %v1688_v24 = vsel %vm1682_vm6, %v1655_v18, %v4662_v1  ;;  %v4666_v1 = vunpack.i.l.bf16 %v6730_v11  ;;  %v4827_v48 = vunpack.i.h.bf16 %v6851_v28 }
 0x198   : > { %v1850_v52 = vsel %vm1847_vm10, %v1817_v27, %v4921_v15  ;;  %v1851_v36 = vsel %vm1847_vm10, %v1818_v55, %v4922_v0  ;;  %2242 = vst.msk [vmem:[#allocation3 + $0x178] sm:$0xff] %vm1880_vm4, %v9679_v63  ;;  %v4932_v37 = vunpack.i.h.bf16 %v4930_v10  ;;  %v4931_v7 = vunpack.i.l.bf16 %v4930_v10 }
 0x199   : > { %5149 = vrot.lane.b32.xlu2 %v6414_v60, %s5807_s29  ;;  %v1883_v59 = vsel %vm1880_vm4, %v1850_v52, %v4926_v6  ;;  %2243 = vst.msk [vmem:[#allocation3 + $0x180] sm:$0xff] %vm1880_vm4, %v9679_v63  ;;  %v1721_v0 = vsel %vm1715_vm5, %v1688_v24, %v4742_v38  ;;  %v4940_v8 = vpop.permute.xlu2 %4939  ;;  %v4746_v38 = vunpack.i.l.bf16 %v6759_v29 }
 0x19a   : > { %2244 = vst.msk [vmem:[#allocation3 + $0x188] sm:$0xff] %vm1880_vm4, %v9679_v63  ;;  %v1754_v15 = vsel %vm1748_vm7, %v1721_v0, %v4822_v4  ;;  %v4942_v17 = vunpack.i.h.bf16 %v4940_v8  ;;  %v4941_v54 = vunpack.i.l.bf16 %v4940_v8 }
 0x19b   : > { %5144 = vrot.lane.b32.xlu1 %v6414_v60, %s5809_s12  ;;  %v1884_v60 = vsel %vm1880_vm4, %v1851_v36, %v4927_v58  ;;  %2245 = vst.msk [vmem:[#allocation3 + $0x190] sm:$0xff] %vm1880_vm4, %v9679_v63  ;;  %v1787_v58 = vsel %vm1781_vm8, %v1754_v15, %v4932_v37 }
 0x19c   : > { %v1914_v23 = vpack.c.bf16 %v1884_v60, %v1883_v59  ;;  %2246 = vst.msk [vmem:[#allocation3 + $0x198] sm:$0xff] %vm1880_vm4, %v9679_v63 }
 0x19d   : > { %5154 = vrot.lane.b32.xlu0 %v6662_v44, %s5806_s25  ;;  %v4661_v44 = vunpack.i.l.bf16 %v6722_v32  ;;  %v4935_v56 = vpop.permute.xlu1 %4934  ;;  %v1654_v32 = vsel %vm386_vm0, %v6435_v21, %v4581_v14  ;;  %2247 = vst.msk [vmem:[#allocation3 + $0x1a0] sm:$0xff] %vm1880_vm4, %v9679_v63 }
 0x19e   : > { %v4937_v21 = vunpack.i.h.bf16 %v4935_v56  ;;  %v4936_v57 = vunpack.i.l.bf16 %v4935_v56  ;;  %2248 = vst.msk [vmem:[#allocation3 + $0x1a8] sm:$0xff] %vm1880_vm4, %v9679_v63  ;;  %v4826_v56 = vunpack.i.l.bf16 %v6851_v28 }
 0x19f   : > { %v1687_v34 = vsel %vm1682_vm6, %v1654_v32, %v4661_v44  ;;  %2249 = vst.msk [vmem:[#allocation3 + $0x1b0] sm:$0xff] %vm1880_vm4, %v9679_v63  ;;  %v4945_v6 = vpop.permute.xlu0 %4944  ;;  %v4747_v44 = vunpack.i.h.bf16 %v6759_v29 }
 0x1a0   : > { %v1720_v51 = vsel %vm1715_vm5, %v1687_v34, %v4741_v43  ;;  %2250 = vst.msk [vmem:[#allocation3 + $0x1b8] sm:$0xff] %vm1880_vm4, %v9679_v63  ;;  %v1820_v55 = vsel %vm1814_vm9, %v1787_v58, %v4937_v21  ;;  %v4947_v52 = vunpack.i.h.bf16 %v4945_v6  ;;  %v4946_v36 = vunpack.i.l.bf16 %v4945_v6 }
 0x1a1   : > { %5164 = vrot.lane.b32.xlu2 %v6450_v45, %s5809_s12  ;;  %v1753_v20 = vsel %vm1748_vm7, %v1720_v51, %v4821_v40  ;;  %2251 = vst.msk [vmem:[#allocation3 + $0x1c0] sm:$0xff] %vm1880_vm4, %v9679_v63  ;;  %v1853_v59 = vsel %vm1847_vm10, %v1820_v55, %v4942_v17  ;;  %v4955_v18 = vpop.permute.xlu2 %4954  ;;  %v4592_v55 = vunpack.i.h.bf16 %v6512_v46 }
 0x1a2   : > { %v1786_v3 = vsel %vm1781_vm8, %v1753_v20, %v4931_v7  ;;  %2252 = vst.msk [vmem:[#allocation3 + $0x1c8] sm:$0xff] %vm1880_vm4, %v9679_v63  ;;  %v1886_v14 = vsel %vm1880_vm4, %v1853_v59, %v4947_v52  ;;  %v4957_v7 = vunpack.i.h.bf16 %v4955_v18  ;;  %v4956_v24 = vunpack.i.l.bf16 %v4955_v18 }
 0x1a3   : > { %5159 = vrot.lane.b32.xlu1 %v5158_v22, %s5808_s30  ;;  %4382 = vmatmul.msk.bf16.gmra.mxu0 %vm1949_vm11, %v1914_v23  ;;  %v1819_v27 = vsel %vm1814_vm9, %v1786_v3, %v4936_v57  ;;  %2253 = vst.msk [vmem:[#allocation3 + $0x1d0] sm:$0xff] %vm1880_vm4, %v9679_v63  ;;  %v4667_v22 = vunpack.i.h.bf16 %v6730_v11  ;;  %v1657_v11 = vsel %vm386_vm0, %v6474_v2, %v4587_v26  ;;  %v4591_v52 = vunpack.i.l.bf16 %v6512_v46 }
 0x1a4   : > { %2254 = vst.msk [vmem:[#allocation3 + $0x1d8] sm:$0xff] %vm1880_vm4, %v9679_v63  ;;  %v1852_v10 = vsel %vm1847_vm10, %v1819_v27, %v4941_v54  ;;  %v1656_v23 = vsel %vm386_vm0, %v6471_v19, %v4586_v9  ;;  %v4671_v59 = vunpack.i.l.bf16 %v6692_v30  ;;  %v4832_v26 = vunpack.i.h.bf16 %v6860_v25 }
 0x1a5   : > { %2255 = vst.msk [vmem:[#allocation3 + $0x1e0] sm:$0xff] %vm1880_vm4, %v9679_v63  ;;  %v4950_v60 = vpop.permute.xlu1 %4949  ;;  %v1885_v12 = vsel %vm1880_vm4, %v1852_v10, %v4946_v36  ;;  %v1689_v40 = vsel %vm1682_vm6, %v1656_v23, %v4666_v1  ;;  %v1690_v28 = vsel %vm1682_vm6, %v1657_v11, %v4667_v22  ;;  %v4672_v10 = vunpack.i.h.bf16 %v6692_v30 }
 0x1a6   : > { %2256 = vst.msk [vmem:[#allocation3 + $0x1e8] sm:$0xff] %vm1880_vm4, %v9679_v63  ;;  %v1915_v43 = vpack.c.bf16 %v1886_v14, %v1885_v12  ;;  %v4952_v29 = vunpack.i.h.bf16 %v4950_v60  ;;  %v4951_v4 = vunpack.i.l.bf16 %v4950_v60  ;;  %v1723_v32 = vsel %vm1715_vm5, %v1690_v28, %v4747_v44 }
 0x1a7   : > { %2257 = vst.msk [vmem:[#allocation3 + $0x1f0] sm:$0xff] %vm1880_vm4, %v9679_v63  ;;  %v1722_v2 = vsel %vm1715_vm5, %v1689_v40, %v4746_v38  ;;  %v1756_v37 = vsel %vm1748_vm7, %v1723_v32, %v4827_v48  ;;  %v4960_v34 = vpop.permute.xlu0 %4959  ;;  %v4752_v60 = vunpack.i.h.bf16 %v6793_v31  ;;  %v4751_v12 = vunpack.i.l.bf16 %v6793_v31 }
 0x1a8   : > { %2258 = vst.msk [vmem:[#allocation3 + $0x1f8] sm:$0xff] %vm1880_vm4, %v9679_v63  ;;  %v1755_v19 = vsel %vm1748_vm7, %v1722_v2, %v4826_v56  ;;  %v1789_v57 = vsel %vm1781_vm8, %v1756_v37, %v4952_v29  ;;  %v4962_v0 = vunpack.i.h.bf16 %v4960_v34  ;;  %v4961_v15 = vunpack.i.l.bf16 %v4960_v34 }
 0x1a9   : > { %2259 = vst.msk [vmem:[#allocation3 + $0x200] sm:$0xff] %vm1880_vm4, %v9679_v63  ;;  %v1788_v21 = vsel %vm1781_vm8, %v1755_v19, %v4951_v4  ;;  %v1822_v8 = vsel %vm1814_vm9, %v1789_v57, %v4957_v7  ;;  %v4970_v27 = vpop.permute.xlu2 %4969  ;;  %v4831_v9 = vunpack.i.l.bf16 %v6860_v25  ;;  %v1658_v46 = vsel %vm386_vm0, %v6462_v47, %v4591_v52 }
 0x1aa   : > { %2260 = vst.msk [vmem:[#allocation3 + $0x208] sm:$0xff] %vm1880_vm4, %v9679_v63  ;;  %v1821_v20 = vsel %vm1814_vm9, %v1788_v21, %v4956_v24  ;;  %v1855_v58 = vsel %vm1847_vm10, %v1822_v8, %v4962_v0  ;;  %v1659_v1 = vsel %vm386_vm0, %v6465_v5, %v4592_v55  ;;  %v4972_v44 = vunpack.i.h.bf16 %v4970_v27 }
 0x1ab   : > { %2261 = vst.msk [vmem:[#allocation3 + $0x210] sm:$0xff] %vm1880_vm4, %v9679_v63  ;;  %v1854_v3 = vsel %vm1847_vm10, %v1821_v20, %v4961_v15  ;;  %v4971_v30 = vunpack.i.l.bf16 %v4970_v27  ;;  %v1692_v38 = vsel %vm1682_vm6, %v1659_v1, %v4672_v10  ;;  %v1691_v31 = vsel %vm1682_vm6, %v1658_v46, %v4671_v59 }
 0x1ac   : > { %2262 = vst.msk [vmem:[#allocation3 + $0x218] sm:$0xff] %vm1880_vm4, %v9679_v63  ;;  %v1724_v56 = vsel %vm1715_vm5, %v1691_v31, %v4751_v12  ;;  %v1725_v11 = vsel %vm1715_vm5, %v1692_v38, %v4752_v60  ;;  %v4597_v21 = vunpack.i.h.bf16 %v6556_v62  ;;  %v4596_v57 = vunpack.i.l.bf16 %v6556_v62 }
 0x1ad   : > { %2263 = vst.msk [vmem:[#allocation3 + $0x220] sm:$0xff] %vm1880_vm4, %v9679_v63  ;;  %v4965_v51 = vpop.permute.xlu1 %4964  ;;  %v1757_v29 = vsel %vm1748_vm7, %v1724_v56, %v4831_v9  ;;  %v1758_v47 = vsel %vm1748_vm7, %v1725_v11, %v4832_v26  ;;  %v4676_v0 = vunpack.i.l.bf16 %v6735_v61  ;;  %v4757_v15 = vunpack.i.h.bf16 %v6799_v39 }
 0x1ae   : > { %2264 = vst.msk [vmem:[#allocation3 + $0x228] sm:$0xff] %vm1880_vm4, %v9679_v63  ;;  %v4967_v17 = vunpack.i.h.bf16 %v4965_v51  ;;  %v4966_v54 = vunpack.i.l.bf16 %v4965_v51  ;;  %v1791_v5 = vsel %vm1781_vm8, %v1758_v47, %v4972_v44  ;;  %v1790_v4 = vsel %vm1781_vm8, %v1757_v29, %v4971_v30 }
 0x1af   : > { %2265 = vst.msk [vmem:[#allocation3 + $0x230] sm:$0xff] %vm1880_vm4, %v9679_v63  ;;  %v4975_v14 = vpop.permute.xlu0 %4974  ;;  %v4677_v51 = vunpack.i.h.bf16 %v6735_v61  ;;  %v4756_v20 = vunpack.i.l.bf16 %v6799_v39  ;;  %v4602_v56 = vunpack.i.h.bf16 %v6674_v13  ;;  %v4601_v11 = vunpack.i.l.bf16 %v6674_v13 }
 0x1b0   : > { %2266 = vst.msk [vmem:[#allocation3 + $0x238] sm:$0xff] %vm1880_vm4, %v9679_v63  ;;  %v1887_v6 = vsel %vm1880_vm4, %v1854_v3, %v4966_v54  ;;  %v1888_v63 = vsel %vm1880_vm4, %v1855_v58, %v4967_v17  ;;  %v4976_v48 = vunpack.i.l.bf16 %v4975_v14  ;;  %v4837_v54 = vunpack.i.h.bf16 %v6845_v49 }
 0x1b1   : > { %v1916_v36 = vpack.c.bf16 %v1888_v63, %v1887_v6  ;;  %v4985_v40 = vpop.permute.xlu2 %4984  ;;  %v4836_v3 = vunpack.i.l.bf16 %v6845_v49  ;;  %v1661_v58 = vsel %vm386_vm0, %v6486_v41, %v4597_v21  ;;  %v9687_v6 = vld [vmem:[#allocation21_spill] sm:$0xff]  ;;  %v4762_v29 = vunpack.i.h.bf16 %v6773_v50 }
 0x1b2   : > { %v4987_v28 = vunpack.i.h.bf16 %v4985_v40  ;;  %v4986_v32 = vunpack.i.l.bf16 %v4985_v40  ;;  %v1823_v2 = vsel %vm1814_vm9, %v1790_v4, %v4976_v48  ;;  %v1660_v62 = vsel %vm386_vm0, %v9687_v6, %v4596_v57 }
 0x1b3   : > { %4383 = vmatmul.msk.bf16.gmra.mxu0 %vm1949_vm11, %v1915_v43  ;;  %v4977_v43 = vunpack.i.h.bf16 %v4975_v14  ;;  %v1694_v61 = vsel %vm1682_vm6, %v1661_v58, %v4677_v51  ;;  %v1693_v39 = vsel %vm1682_vm6, %v1660_v62, %v4676_v0  ;;  %v4761_v47 = vunpack.i.l.bf16 %v6773_v50 }
 0x1b4   : > { %v1727_v49 = vsel %vm1715_vm5, %v1694_v61, %v4757_v15  ;;  %v4842_v4 = vunpack.i.h.bf16 %v6866_v35  ;;  %v4841_v40 = vunpack.i.l.bf16 %v6866_v35 }
 0x1b5   : > { %v4980_v22 = vpop.permute.xlu1 %4979  ;;  %v1824_v18 = vsel %vm1814_vm9, %v1791_v5, %v4977_v43  ;;  %v1760_v10 = vsel %vm1748_vm7, %v1727_v49, %v4837_v54  ;;  %v4767_v49 = vunpack.i.h.bf16 %v6805_v16 }
 0x1b6   : > { %v4982_v25 = vunpack.i.h.bf16 %v4980_v22  ;;  %v4981_v23 = vunpack.i.l.bf16 %v4980_v22 }
 0x1b7   : > { %v4990_v7 = vpop.permute.xlu0 %4989 }
 0x1b8   : > { %v1856_v19 = vsel %vm1847_vm10, %v1823_v2, %v4981_v23  ;;  %v1857_v37 = vsel %vm1847_vm10, %v1824_v18, %v4982_v25  ;;  %v4992_v63 = vunpack.i.h.bf16 %v4990_v7  ;;  %v4991_v27 = vunpack.i.l.bf16 %v4990_v7 }
 0x1b9   : > { %v1889_v24 = vsel %vm1880_vm4, %v1856_v19, %v4986_v32  ;;  %v1890_v34 = vsel %vm1880_vm4, %v1857_v37, %v4987_v28  ;;  %v5000_v59 = vpop.permute.xlu2 %4999  ;;  %v4682_v25 = vunpack.i.h.bf16 %v6741_v53  ;;  %v4681_v23 = vunpack.i.l.bf16 %v6741_v53 }
 0x1ba   : > { %v1917_v17 = vpack.c.bf16 %v1890_v34, %v1889_v24  ;;  %v5002_v60 = vunpack.i.h.bf16 %v5000_v59  ;;  %v5001_v12 = vunpack.i.l.bf16 %v5000_v59  ;;  %v1793_v26 = vsel %vm1781_vm8, %v1760_v10, %v4992_v63  ;;  %v9688_v63 = vld [vmem:[#allocation44_spill] sm:$0xff] }
 0x1bb   : > { %v1663_v28 = vsel %vm386_vm0, %v6518_v42, %v4602_v56  ;;  %v1662_v32 = vsel %vm386_vm0, %v6515_v33, %v4601_v11  ;;  %v4606_v61 = vunpack.i.l.bf16 %v9688_v63  ;;  %v4766_v10 = vunpack.i.l.bf16 %v6805_v16  ;;  %v9690_v59 = vld [vmem:[#allocation20_spill] sm:$0xff] }
 0x1bc   : > { %v1695_v53 = vsel %vm1682_vm6, %v1662_v32, %v4681_v23  ;;  %v1696_v18 = vsel %vm1682_vm6, %v1663_v28, %v4682_v25 }
 0x1bd   : > { %v4995_v8 = vpop.permute.xlu1 %4994  ;;  %v1729_v50 = vsel %vm1715_vm5, %v1696_v18, %v4762_v29  ;;  %v1728_v19 = vsel %vm1715_vm5, %v1695_v53, %v4761_v47 }
 0x1be   : > { %v4997_v55 = vunpack.i.h.bf16 %v4995_v8  ;;  %v4996_v52 = vunpack.i.l.bf16 %v4995_v8  ;;  %v1761_v35 = vsel %vm1748_vm7, %v1728_v19, %v4841_v40  ;;  %v1762_v42 = vsel %vm1748_vm7, %v1729_v50, %v4842_v4  ;;  %v9693_v19 = vld [vmem:[#allocation34_spill] sm:$0xff] }
 0x1bf   : > { %v5005_v9 = vpop.permute.xlu0 %5004 }
 0x1c0   : > { %v1826_v46 = vsel %vm1814_vm9, %v1793_v26, %v4997_v55  ;;  %v5007_v1 = vunpack.i.h.bf16 %v5005_v9  ;;  %v5006_v44 = vunpack.i.l.bf16 %v5005_v9  ;;  %v9689_v55 = vld [vmem:[#allocation48_spill] sm:$0xff]  ;;  %v9691_v26 = vld [vmem:[#allocation23_spill] sm:$0xff] }
 0x1c1   : > { %v1859_v38 = vsel %vm1847_vm10, %v1826_v46, %v5002_v60  ;;  %v5015_v37 = vpop.permute.xlu2 %5014  ;;  %v4847_v60 = vunpack.i.h.bf16 %v9690_v59 }
 0x1c2   : > { %v1892_v48 = vsel %vm1880_vm4, %v1859_v38, %v5007_v1  ;;  %v5017_v7 = vunpack.i.h.bf16 %v5015_v37  ;;  %v5016_v24 = vunpack.i.l.bf16 %v5015_v37  ;;  %v4612_v37 = vunpack.i.h.bf16 %v9693_v19 }
 0x1c3   : > { %4384 = vmatmul.msk.bf16.gmra.mxu0 %vm1949_vm11, %v1916_v36  ;;  %v1726_v36 = vsel %vm1715_vm5, %v1693_v39, %v4756_v20 }
 0x1c4   : > { %v1759_v41 = vsel %vm1748_vm7, %v1726_v36, %v4836_v3  ;;  %v4686_v36 = vunpack.i.l.bf16 %v9689_v55 }
 0x1c5   : > { %v1792_v14 = vsel %vm1781_vm8, %v1759_v41, %v4991_v27  ;;  %v5010_v31 = vpop.permute.xlu1 %5009  ;;  %v4607_v27 = vunpack.i.h.bf16 %v9688_v63 }
 0x1c6   : > { %v1825_v22 = vsel %vm1814_vm9, %v1792_v14, %v4996_v52  ;;  %v5012_v13 = vunpack.i.h.bf16 %v5010_v31  ;;  %v5011_v2 = vunpack.i.l.bf16 %v5010_v31  ;;  %v4687_v52 = vunpack.i.h.bf16 %v9689_v55 }
 0x1c7   : > { %v1858_v30 = vsel %vm1847_vm10, %v1825_v22, %v5001_v12  ;;  %v5020_v33 = vpop.permute.xlu0 %5019  ;;  %v4846_v12 = vunpack.i.l.bf16 %v9690_v59  ;;  %v1665_v9 = vsel %vm386_vm0, %v9691_v26, %v4607_v27  ;;  %v9692_v22 = vld [vmem:[#allocation22_spill] sm:$0xff] }
 0x1c8   : > { %v1891_v43 = vsel %vm1880_vm4, %v1858_v30, %v5006_v44  ;;  %v1794_v34 = vsel %vm1781_vm8, %v1761_v35, %v5011_v2  ;;  %v1795_v21 = vsel %vm1781_vm8, %v1762_v42, %v5012_v13  ;;  %v5022_v51 = vunpack.i.h.bf16 %v5020_v33  ;;  %v9694_v42 = vld [vmem:[#allocation10_spill] sm:$0xff] }
 0x1c9   : > { %v1918_v5 = vpack.c.bf16 %v1892_v48, %v1891_v43  ;;  %v5021_v0 = vunpack.i.l.bf16 %v5020_v33  ;;  %v1827_v15 = vsel %vm1814_vm9, %v1794_v34, %v5016_v24  ;;  %v1828_v20 = vsel %vm1814_vm9, %v1795_v21, %v5017_v7  ;;  %v5030_v62 = vpop.permute.xlu2 %5029  ;;  %v9695_v33 = vld [vmem:[#allocation17_spill] sm:$0xff] }
 0x1ca   : > { %v1861_v3 = vsel %vm1847_vm10, %v1828_v20, %v5022_v51  ;;  %v1664_v46 = vsel %vm386_vm0, %v9692_v22, %v4606_v61  ;;  %v5032_v1 = vunpack.i.h.bf16 %v5030_v62  ;;  %v5031_v44 = vunpack.i.l.bf16 %v5030_v62 }
 0x1cb   : > { %v1860_v54 = vsel %vm1847_vm10, %v1827_v15, %v5021_v0  ;;  %v1698_v30 = vsel %vm1682_vm6, %v1665_v9, %v4687_v52  ;;  %v1697_v16 = vsel %vm1682_vm6, %v1664_v46, %v4686_v36  ;;  %v4611_v35 = vunpack.i.l.bf16 %v9693_v19  ;;  %v9696_v0 = vld [vmem:[#allocation18_spill] sm:$0xff]  ;;  %v9704_v19 = vld [vmem:[#allocation28_spill] sm:$0xff] }
 0x1cc   : > { %v1730_v43 = vsel %vm1715_vm5, %v1697_v16, %v4766_v10  ;;  %v1731_v48 = vsel %vm1715_vm5, %v1698_v30, %v4767_v49  ;;  %v4692_v7 = vunpack.i.h.bf16 %v9694_v42  ;;  %v4691_v24 = vunpack.i.l.bf16 %v9694_v42  ;;  %v7324_v30 = vld [vmem:[%s9485_s2] ss:$0 sm:$0xff]  ;;  %v9699_v16 = vld [vmem:[#allocation45_spill] sm:$0xff] }
 0x1cd   : > { %v5025_v57 = vpop.permute.xlu1 %5024  ;;  %v1763_v25 = vsel %vm1748_vm7, %v1730_v43, %v4846_v12  ;;  %v1764_v23 = vsel %vm1748_vm7, %v1731_v48, %v4847_v60  ;;  %v4772_v34 = vunpack.i.h.bf16 %v9695_v33  ;;  %v4771_v21 = vunpack.i.l.bf16 %v9695_v33  ;;  %v4514_v33 = vld [vmem:[%s9487_s4 + $0x88] sm:$0xff] }
 0x1ce   : > { %v5027_v8 = vunpack.i.h.bf16 %v5025_v57  ;;  %v1797_v29 = vsel %vm1781_vm8, %v1764_v23, %v5032_v1  ;;  %v1796_v47 = vsel %vm1781_vm8, %v1763_v25, %v5031_v44  ;;  %v4852_v15 = vunpack.i.h.bf16 %v9696_v0  ;;  %3882 = vmatpush.bf16.msra.mxu3 %v4514_v33 }
 0x1cf   : > { %v5035_v41 = vpop.permute.xlu0 %5034  ;;  %v4851_v20 = vunpack.i.l.bf16 %v9696_v0  ;;  %v4616_v48 = vunpack.i.l.bf16 %v9699_v16 }
 0x1d0   : > { %v1894_v6 = vsel %vm1880_vm4, %v1861_v3, %v5027_v8  ;;  %v5037_v38 = vunpack.i.h.bf16 %v5035_v41  ;;  %v5036_v31 = vunpack.i.l.bf16 %v5035_v41  ;;  %v9697_v8 = vld [vmem:[#allocation25_spill] sm:$0xff] }
 0x1d2   : > { %v1829_v28 = vsel %vm1814_vm9, %v1796_v47, %v5036_v31  ;;  %v1830_v32 = vsel %vm1814_vm9, %v1797_v29, %v5037_v38  ;;  %v4617_v38 = vunpack.i.h.bf16 %v9699_v16  ;;  %v9701_v47 = vld [vmem:[#allocation13_spill] sm:$0xff] }
 0x1d3   : > { %4385 = vmatmul.msk.bf16.gmra.mxu0 %vm1949_vm11, %v1917_v17  ;;  %v5026_v17 = vunpack.i.l.bf16 %v5025_v57 }
 0x1d5   : > { %v1893_v58 = vsel %vm1880_vm4, %v1860_v54, %v5026_v17  ;;  %v5040_v14 = vpop.permute.xlu1 %5039  ;;  %v1667_v17 = vsel %vm386_vm0, %v9697_v8, %v4612_v37  ;;  %v9698_v54 = vld [vmem:[#allocation24_spill] sm:$0xff]  ;;  %v1668_v37 = vsel %vm386_vm0, %v9704_v19, %v4616_v48 }
 0x1d6   : > { %v1919_v39 = vpack.c.bf16 %v1894_v6, %v1893_v58  ;;  %v5042_v56 = vunpack.i.h.bf16 %v5040_v14  ;;  %v5041_v11 = vunpack.i.l.bf16 %v5040_v14  ;;  %v1666_v3 = vsel %vm386_vm0, %v9698_v54, %v4611_v35 }
 0x1d7   : > { %v5050_v53 = vpop.permute.xlu0 %5049  ;;  %v1700_v62 = vsel %vm1682_vm6, %v1667_v17, %v4692_v7  ;;  %v1699_v63 = vsel %vm1682_vm6, %v1666_v3, %v4691_v24 }
 0x1d8   : > { %v1862_v13 = vsel %vm1847_vm10, %v1829_v28, %v5041_v11  ;;  %v1863_v2 = vsel %vm1847_vm10, %v1830_v32, %v5042_v56  ;;  %v5052_v58 = vunpack.i.h.bf16 %v5050_v53  ;;  %v5051_v6 = vunpack.i.l.bf16 %v5050_v53  ;;  %v7333_v56 = vld [vmem:[%s9486_s3] ss:$0 sm:$0xff]  ;;  %v9700_v11 = vld [vmem:[#allocation8_spill] sm:$0xff]  ;;  %v9702_v32 = vld [vmem:[#allocation29_spill] sm:$0xff] }
 0x1d9   : > { %v1733_v55 = vsel %vm1715_vm5, %v1700_v62, %v4772_v34  ;;  %v4697_v25 = vunpack.i.h.bf16 %v9700_v11  ;;  %v4696_v23 = vunpack.i.l.bf16 %v9700_v11 }
 0x1da   : > { %v1766_v52 = vsel %vm1748_vm7, %v1733_v55, %v4852_v15 }
 0x1db   : > { %v1799_v60 = vsel %vm1781_vm8, %v1766_v52, %v5052_v58  ;;  %v1701_v34 = vsel %vm1682_vm6, %v1668_v37, %v4696_v23 }
 0x1dd   : > { %v5055_v57 = vpop.permute.xlu1 %5054 }
 0x1de   : > { %v5057_v27 = vunpack.i.h.bf16 %v5055_v57  ;;  %v5056_v61 = vunpack.i.l.bf16 %v5055_v57 }
 0x1df   : > { %v5065_v12 = vpop.permute.xlu0 %5064 }
 0x1e0   : > { %v1832_v26 = vsel %vm1814_vm9, %v1799_v60, %v5057_v27  ;;  %v5067_v9 = vunpack.i.h.bf16 %v5065_v12  ;;  %v5066_v22 = vunpack.i.l.bf16 %v5065_v12 }
 0x1e3   : > { %4386 = vmatmul.msk.bf16.gmra.mxu0 %vm1949_vm11, %v1918_v5  ;;  %v5045_v5 = vpop.permute.xlu2 %5044 }
 0x1e4   : > { %v5047_v4 = vunpack.i.h.bf16 %v5045_v5  ;;  %v5046_v40 = vunpack.i.l.bf16 %v5045_v5  ;;  %v4777_v5 = vunpack.i.h.bf16 %v9701_v47 }
 0x1e5   : > { %v5070_v44 = vpop.permute.xlu1 %5069 }
 0x1e6   : > { %v1895_v18 = vsel %vm1880_vm4, %v1862_v13, %v5046_v40  ;;  %v1896_v50 = vsel %vm1880_vm4, %v1863_v2, %v5047_v4  ;;  %v4776_v4 = vunpack.i.l.bf16 %v9701_v47  ;;  %v1669_v13 = vsel %vm386_vm0, %v9702_v32, %v4617_v38  ;;  %v9703_v2 = vld [vmem:[#allocation19_spill] sm:$0xff] }
 0x1e7   : > { %v1920_v51 = vpack.c.bf16 %v1896_v50, %v1895_v18  ;;  %v4857_v53 = vunpack.i.h.bf16 %v9703_v2  ;;  %v4856_v18 = vunpack.i.l.bf16 %v9703_v2  ;;  %v5072_v35 = vunpack.i.h.bf16 %v5070_v44  ;;  %v5080_v7 = vpop.permute.xlu0 %5079 }
 0x1e8   : > { %v5071_v42 = vunpack.i.l.bf16 %v5070_v44  ;;  %v5081_v27 = vunpack.i.l.bf16 %v5080_v7 }
 0x1eb   : > { %v5060_v49 = vpop.permute.xlu2 %5059 }
 0x1ec   : > { %v5062_v10 = vunpack.i.h.bf16 %v5060_v49  ;;  %v5061_v41 = vunpack.i.l.bf16 %v5060_v49 }
 0x1ed   : > { %v5085_v58 = vpop.permute.xlu1 %5084 }
 0x1ee   : > { %v1865_v1 = vsel %vm1847_vm10, %v1832_v26, %v5062_v10  ;;  %v5087_v52 = vunpack.i.h.bf16 %v5085_v58 }
 0x1ef   : > { %v1898_v43 = vsel %vm1880_vm4, %v1865_v1, %v5067_v9  ;;  %v5095_v60 = vpop.permute.xlu0 %5094  ;;  %v9706_v1 = vld [vmem:[#allocation7_spill] sm:$0xff] }
 0x1f0   : > { %v4702_v44 = vunpack.i.h.bf16 %v9706_v1  ;;  %v4701_v16 = vunpack.i.l.bf16 %v9706_v1 }
 0x1f3   : > { %4387 = vmatmul.msk.bf16.gmra.mxu0 %vm1949_vm11, %v1919_v39  ;;  %v1732_v39 = vsel %vm1715_vm5, %v1699_v63, %v4771_v21  ;;  %v5075_v50 = vpop.permute.xlu2 %5074  ;;  %v1702_v21 = vsel %vm1682_vm6, %v1669_v13, %v4697_v25  ;;  %v5082_v63 = vunpack.i.h.bf16 %v5080_v7  ;;  %v2307_v13 = vld [vmem:[#allocation3 + $0x38] sm:$0xff] }
 0x1f4   : > { %v1765_v36 = vsel %vm1748_vm7, %v1732_v39, %v4851_v20  ;;  %v1735_v57 = vsel %vm1715_vm5, %v1702_v21, %v4777_v5  ;;  %v5077_v8 = vunpack.i.h.bf16 %v5075_v50  ;;  %v5076_v17 = vunpack.i.l.bf16 %v5075_v50  ;;  %v9709_v5 = vld [vmem:[#allocation27_spill] sm:$0xff] }
 0x1f5   : > { %v1798_v59 = vsel %vm1781_vm8, %v1765_v36, %v5051_v6  ;;  %v1768_v20 = vsel %vm1748_vm7, %v1735_v57, %v4857_v53  ;;  %v4513_v6 = vld [vmem:[%s9487_s4 + $0x80] sm:$0xff]  ;;  %v5086_v36 = vunpack.i.l.bf16 %v5085_v58  ;;  %v5100_v11 = vpop.permute.xlu1 %5099  ;;  %v9711_v53 = vld [vmem:[#allocation26_spill] sm:$0xff] }
 0x1f6   : > { %v1831_v14 = vsel %vm1814_vm9, %v1798_v59, %v5056_v61  ;;  %v1801_v3 = vsel %vm1781_vm8, %v1768_v20, %v5072_v35  ;;  %3883 = vmatpush.bf16.msra.mxu3 %v4513_v6  ;;  %v9712_v35 = vld [vmem:[#allocation11_spill] sm:$0xff]  ;;  %v5101_v58 = vunpack.i.l.bf16 %v5100_v11 }
 0x1f7   : > { %v1864_v46 = vsel %vm1847_vm10, %v1831_v14, %v5061_v41  ;;  %v1834_v55 = vsel %vm1814_vm9, %v1801_v3, %v5077_v8  ;;  %v9705_v14 = vld [vmem:[#allocation46_spill] sm:$0xff]  ;;  %v5097_v8 = vunpack.i.h.bf16 %v5095_v60  ;;  %v5102_v3 = vunpack.i.h.bf16 %v5100_v11  ;;  %v5110_v6 = vpop.permute.xlu0 %5109 }
 0x1f8   : > { %v1897_v31 = vsel %vm1880_vm4, %v1864_v46, %v5066_v22  ;;  %v1867_v59 = vsel %vm1847_vm10, %v1834_v55, %v5082_v63  ;;  %v4622_v26 = vunpack.i.h.bf16 %v9705_v14  ;;  %v4621_v46 = vunpack.i.l.bf16 %v9705_v14 }
 0x1f9   : > { %v1921_v28 = vpack.c.bf16 %v1898_v43, %v1897_v31  ;;  %v1900_v22 = vsel %vm1880_vm4, %v1867_v59, %v5087_v52  ;;  %v9707_v31 = vld [vmem:[#allocation52_spill] sm:$0xff] }
 0x1fa   : > { %v4782_v43 = vunpack.i.h.bf16 %v9707_v31  ;;  %v4781_v48 = vunpack.i.l.bf16 %v9707_v31  ;;  %v9715_v31 = vld [vmem:[#allocation30_spill] sm:$0xff] }
 0x1fb   : > { %v5090_v10 = vpop.permute.xlu2 %5089 }
 0x1fc   : > { %v5092_v7 = vunpack.i.h.bf16 %v5090_v10 }
 0x1fd   : > { %v5115_v1 = vpop.permute.xlu1 %5114 }
 0x203   : > { %4388 = vmatmul.msk.bf16.gmra.mxu0 %vm1949_vm11, %v1920_v51  ;;  %v1734_v51 = vsel %vm1715_vm5, %v1701_v34, %v4776_v4  ;;  %v1671_v4 = vsel %vm386_vm0, %v9709_v5, %v4622_v26  ;;  %v5105_v20 = vpop.permute.xlu2 %5104  ;;  %v5111_v5 = vunpack.i.l.bf16 %v5110_v6 }
 0x204   : > { %v1767_v15 = vsel %vm1748_vm7, %v1734_v51, %v4856_v18  ;;  %v1670_v18 = vsel %vm386_vm0, %v9711_v53, %v4621_v46  ;;  %v1704_v50 = vsel %vm1682_vm6, %v1671_v4, %v4702_v44  ;;  %v2556_v51 = vrot.slane %v2307_v13, 1 }
 0x205   : > { %v1800_v54 = vsel %vm1781_vm8, %v1767_v15, %v5071_v42  ;;  %v1703_v37 = vsel %vm1682_vm6, %v1670_v18, %v4701_v16  ;;  %v4707_v42 = vunpack.i.h.bf16 %v9712_v35  ;;  %v1737_v21 = vsel %vm1715_vm5, %v1704_v50, %v4782_v43  ;;  %v9714_v16 = vld [vmem:[#allocation31_spill] sm:$0xff] }
 0x206   : > { %v1833_v39 = vsel %vm1814_vm9, %v1800_v54, %v5076_v17  ;;  %v1736_v34 = vsel %vm1715_vm5, %v1703_v37, %v4781_v48  ;;  %v5096_v17 = vunpack.i.l.bf16 %v5095_v60  ;;  %v5106_v60 = vunpack.i.l.bf16 %v5105_v20  ;;  %v9716_v48 = vld [vmem:[#allocation56_spill] sm:$0xff] }
 0x207   : > { %v1866_v41 = vsel %vm1847_vm10, %v1833_v39, %v5081_v27  ;;  %v4706_v27 = vunpack.i.l.bf16 %v9712_v35  ;;  %v4867_v11 = vunpack.i.h.bf16 %v9716_v48  ;;  %v5117_v50 = vunpack.i.h.bf16 %v5115_v1 }
 0x208   : > { %v1899_v9 = vsel %vm1880_vm4, %v1866_v41, %v5086_v36 }
 0x209   : > { %v1922_v23 = vpack.c.bf16 %v1900_v22, %v1899_v9 }
 0x20b   : > { %v5120_v35 = vpop.permute.xlu2 %5119 }
 0x210   : > { %v2011_v29 = vpop.f32.mrf.mxu0 }
 0x211   : > { %v2095_v40 = vmul.f32 %v7324_v30, %v2011_v29  ;;  %v9708_v29 = vld [vmem:[#allocation39_spill] sm:$0xff] }
 0x212   : > { %v4627_v47 = vunpack.i.h.bf16 %v9708_v29  ;;  %v4626_v2 = vunpack.i.l.bf16 %v9708_v29 }
 0x213   : > { %v2131_v24 = vadd.f32 %v7333_v56, %v2095_v40  ;;  %4389 = vmatmul.msk.bf16.gmra.mxu0 %vm1949_vm11, %v1921_v28  ;;  %v9710_v40 = vld [vmem:[#allocation57_spill] sm:$0xff] }
 0x214   : > { %v4862_v28 = vunpack.i.h.bf16 %v9710_v40  ;;  %v4861_v32 = vunpack.i.l.bf16 %v9710_v40  ;;  %v1672_v43 = vsel %vm386_vm0, %v9715_v31, %v4626_v2  ;;  %v7428_v40 = vld [vmem:[#allocation3 + $0x8] sm:$0xff] }
 0x215   : > { %v2163_v0 = vmax.f32 %v2131_v24, 0.0  ;;  %v5091_v24 = vunpack.i.l.bf16 %v5090_v10  ;;  %v1705_v29 = vsel %vm1682_vm6, %v1672_v43, %v4706_v27 }
 0x216   : > { %v1770_v15 = vsel %vm1748_vm7, %v1737_v21, %v4862_v28  ;;  %v7430_v28 = vld [vmem:[#allocation3 + $0x10] sm:$0xff]  ;;  %v7442_v21 = vpop.permute.xlu0 %5124 }
 0x217   : > { %2268 = vst.msk [vmem:[#allocation3 + $0x28] sm:$0xff] %vm1880_vm4, %v2163_v0  ;;  %v1769_v0 = vsel %vm1748_vm7, %v1736_v34, %v4861_v32  ;;  %v1803_v55 = vsel %vm1781_vm8, %v1770_v15, %v5092_v7  ;;  %v5116_v32 = vunpack.i.l.bf16 %v5115_v1  ;;  %v5183_v7 = vpack.i.bf16 %v7430_v28, %v7428_v40  ;;  %v2308_v15 = vld [vmem:[#allocation3 + $0x40] sm:$0xff] }
 0x218   : > { %v2013_v62 = vpop.f32.mrf.mxu0  ;;  %v1802_v52 = vsel %vm1781_vm8, %v1769_v0, %v5091_v24  ;;  %v1836_v14 = vsel %vm1814_vm9, %v1803_v55, %v5097_v8  ;;  %v5121_v24 = vunpack.i.l.bf16 %v5120_v35  ;;  %v2430_v55 = vrot.slane %v2308_v15, 7 }
 0x219   : > { %v2096_v61 = vmul.f32 %v7324_v30, %v2013_v62  ;;  %v1869_v46 = vsel %vm1847_vm10, %v1836_v14, %v5102_v3  ;;  %v2304_v3 = vld [vmem:[#allocation3 + $0x20] sm:$0xff] }
 0x21b   : > { %v2132_v49 = vadd.f32 %v7333_v56, %v2096_v61  ;;  %v9713_v61 = vld [vmem:[#allocation54_spill] sm:$0xff] }
 0x21c   : > { %v4787_v39 = vunpack.i.h.bf16 %v9713_v61  ;;  %v4786_v9 = vunpack.i.l.bf16 %v9713_v61  ;;  %v5127_v61 = vunpack.i.h.bf16 %v7442_v21 }
 0x21d   : > { %v2164_v12 = vmax.f32 %v2132_v49, 0.0  ;;  %v5107_v49 = vunpack.i.h.bf16 %v5105_v20 }
 0x21e   : > { %v7392_v33 = vld [vmem:[#allocation3 + $0x28] sm:$0xff]  ;;  %v1738_v53 = vsel %vm1715_vm5, %v1705_v29, %v4786_v9 }
 0x21f   : > { %2269 = vst.msk [vmem:[#allocation3 + $0x30] sm:$0xff] %vm1880_vm4, %v2164_v12  ;;  %v2553_v62 = vrot.slane %v7392_v33, 1  ;;  %v1835_v12 = vsel %vm1814_vm9, %v1802_v52, %v5096_v17  ;;  %v1902_v2 = vsel %vm1880_vm4, %v1869_v46, %v5107_v49  ;;  %v2311_v17 = vld [vmem:[#allocation3 + $0x58] sm:$0xff]  ;;  %v7457_v9 = vld [vmem:[#allocation2 + $0x208] sm:$0xff] }
 0x220   : > { %v2016_v38 = vpop.f32.mrf.mxu0  ;;  %v1868_v22 = vsel %vm1847_vm10, %v1835_v12, %v5101_v58  ;;  %v9717_v58 = vld [vmem:[#allocation47_spill] sm:$0xff]  ;;  %v2561_v49 = vrot.slane %v2311_v17, 1  ;;  %v2548_v12 = vrot.slane %v7428_v40, 1 }
 0x221   : > { %v2097_v25 = vmul.f32 %v7324_v30, %v2016_v38  ;;  %v1673_v38 = vsel %vm386_vm0, %v9714_v16, %v4627_v47  ;;  %v5112_v47 = vunpack.i.h.bf16 %v5110_v6  ;;  %v1901_v13 = vsel %vm1880_vm4, %v1868_v22, %v5106_v60 }
 0x222   : > { %v4632_v6 = vunpack.i.h.bf16 %v9717_v58  ;;  %v2549_v60 = vrot.slane %v7430_v28, 1  ;;  %v863_v22 = vrot.slane %v7457_v9, 1 }
 0x223   : > { %v2133_v19 = vadd.f32 %v7333_v56, %v2097_v25  ;;  %4390 = vmatmul.msk.bf16.gmra.mxu0 %vm1949_vm11, %v1922_v23  ;;  %v4866_v25 = vunpack.i.l.bf16 %v9716_v48  ;;  %v1706_v23 = vsel %vm1682_vm6, %v1673_v38, %v4707_v42  ;;  %v2303_v38 = vld [vmem:[#allocation3 + $0x18] sm:$0xff] }
 0x224   : > { %v1739_v18 = vsel %vm1715_vm5, %v1706_v23, %v4787_v39  ;;  %v5126_v39 = vunpack.i.l.bf16 %v7442_v21  ;;  %v9720_v21 = vld [vmem:[#allocation15_spill] sm:$0xff] }
 0x225   : > { %v2165_v57 = vmax.f32 %v2133_v19, 0.0  ;;  %v1772_v19 = vsel %vm1748_vm7, %v1739_v18, %v4867_v11  ;;  %v1771_v37 = vsel %vm1748_vm7, %v1738_v53, %v4866_v25  ;;  %v7467_v11 = vld [vmem:[#allocation2 + $0x210] sm:$0xff]  ;;  %v2551_v53 = vrot.slane %v2303_v38, 1  ;;  %v9718_v18 = vld [vmem:[#allocation36_spill] sm:$0xff] }
 0x226   : > { %v7398_v54 = vld [vmem:[#allocation3 + $0x30] sm:$0xff]  ;;  %v1804_v34 = vsel %vm1781_vm8, %v1771_v37, %v5111_v5  ;;  %v1805_v20 = vsel %vm1781_vm8, %v1772_v19, %v5112_v47  ;;  %v864_v25 = vrot.slane %v7467_v11, 1  ;;  %v4631_v19 = vunpack.i.l.bf16 %v9717_v58  ;;  %v5130_v37 = vpop.permute.xlu1 %5129 }
 0x227   : > { %2270 = vst.msk [vmem:[#allocation3 + $0x48] sm:$0xff] %vm1880_vm4, %v2165_v57  ;;  %v2554_v63 = vrot.slane %v7398_v54, 1  ;;  %v1837_v8 = vsel %vm1814_vm9, %v1804_v34, %v5116_v32  ;;  %v2428_v48 = vrot.slane %v7398_v54, 7  ;;  %v2552_v58 = vsel %vm773_vm1, %v2549_v60, %v2551_v53 }
 0x228   : > { %v2018_v36 = vpop.f32.mrf.mxu0 }
 0x229   : > { %v2098_v10 = vmul.f32 %v7324_v30, %v2018_v36  ;;  %v2555_v41 = vsel %vm773_vm1, %v2553_v62, %v2554_v63  ;;  %v2557_v59 = vsel %vm773_vm1, %v2554_v63, %v2556_v51  ;;  %v1923_v51 = vpack.c.bf16 %v1902_v2, %v1901_v13 }
 0x22a   : > { %v7412_v26 = vpack.i.bf16 %v2557_v59, %v2555_v41  ;;  %v5122_v62 = vunpack.i.h.bf16 %v5120_v35  ;;  %v1838_v63 = vsel %vm1814_vm9, %v1805_v20, %v5117_v50  ;;  %v1870_v41 = vsel %vm1847_vm10, %v1837_v8, %v5121_v24  ;;  %v591_v59 = vld [vmem:[#allocation2 + $0x218] sm:$0xff] }
 0x22b   : > { %v2134_v44 = vadd.f32 %v7333_v56, %v2098_v10  ;;  %v2425_v10 = vrot.slane %v2304_v3, 7  ;;  %v866_v23 = vrot.slane %v591_v59, 1  ;;  %v2426_v2 = vrot.slane %v7392_v33, 7 }
 0x22c   : > { %5169 = vrot.lane.b32.xlu0 %v7412_v26, %s5809_s12  ;;  %v1675_v50 = vsel %vm386_vm0, %v9718_v18, %v4632_v6  ;;  %v1903_v15 = vsel %vm1880_vm4, %v1870_v41, %v5126_v39  ;;  %v865_v20 = vsel %vm773_vm1, %v863_v22, %v864_v25  ;;  %v2550_v3 = vsel %vm773_vm1, %v2548_v12, %v2549_v60  ;;  %v9721_v6 = vld [vmem:[#allocation35_spill] sm:$0xff] }
 0x22d   : > { %v2166_v4 = vmax.f32 %v2134_v44, 0.0  ;;  %v867_v8 = vsel %vm773_vm1, %v864_v25, %v866_v23  ;;  %v7509_v17 = vsel %vm644_vm2, %v2425_v10, %v2426_v2  ;;  %v5132_v41 = vunpack.i.h.bf16 %v5130_v37 }
 0x22e   : > { %v2309_v0 = vld [vmem:[#allocation3 + $0x48] sm:$0xff]  ;;  %v7523_v10 = vpack.i.bf16 %v867_v8, %v865_v20  ;;  %v5188_v12 = vpack.i.bf16 %v2552_v58, %v2550_v3  ;;  %v5145_v18 = vpop.permute.xlu1 %5144 }
 0x22f   : > { %2271 = vst.msk [vmem:[#allocation3 + $0x50] sm:$0xff] %vm1880_vm4, %v2166_v4  ;;  %v2431_v52 = vrot.slane %v2309_v0, 7  ;;  %v2558_v1 = vrot.slane %v2309_v0, 1  ;;  %v5146_v20 = vunpack.i.l.bf16 %v5145_v18 }
 0x230   : > { %v2021_v42 = vpop.f32.mrf.mxu0 }
 0x231   : > { %v2099_v57 = vmul.f32 %v7324_v30, %v2021_v42  ;;  %v7464_v43 = vsel %vm644_vm2, %v2430_v55, %v2431_v52  ;;  %v1871_v42 = vsel %vm1847_vm10, %v1838_v63, %v5122_v62  ;;  %v1674_v62 = vsel %vm386_vm0, %v9721_v6, %v4631_v19 }
 0x232   : > { %v4792_v63 = vunpack.i.h.bf16 %v9720_v21  ;;  %v5208_v19 = vpack.i.bf16 %v7467_v11, %v7457_v9 }
 0x233   : > { %v2135_v27 = vadd.f32 %v7333_v56, %v2099_v57  ;;  %4391 = vmatmul.msk.bf16.gmra.mxu0 %vm1949_vm11, %v1923_v51  ;;  %v4791_v57 = vunpack.i.l.bf16 %v9720_v21  ;;  %v7501_v51 = vsel %vm644_vm2, %v2426_v2, %v2428_v48  ;;  %v5140_v48 = vpop.permute.xlu0 %5139 }
 0x234   : > { %5184 = vrot.lane.b32.xlu0 %v5183_v7, %s5809_s12  ;;  %v9719_v7 = vld [vmem:[#allocation12_spill] sm:$0xff]  ;;  %v5193_v55 = vpack.i.bf16 %v7501_v51, %v7509_v17 }
 0x235   : > { %v2167_v36 = vmax.f32 %v2135_v27, 0.0  ;;  %v4712_v24 = vunpack.i.h.bf16 %v9719_v7  ;;  %v4711_v34 = vunpack.i.l.bf16 %v9719_v7  ;;  %v9722_v27 = vld [vmem:[#allocation58_spill] sm:$0xff]  ;;  %v5141_v7 = vunpack.i.l.bf16 %v5140_v48 }
 0x236   : > { %v2310_v14 = vld [vmem:[#allocation3 + $0x50] sm:$0xff]  ;;  %v4871_v39 = vunpack.i.l.bf16 %v9722_v27 }
 0x237   : > { %2272 = vst.msk [vmem:[#allocation3 + $0x68] sm:$0xff] %vm1880_vm4, %v2167_v36  ;;  %v7461_v46 = vpack.i.bf16 %v2310_v14, %v2309_v0  ;;  %v2559_v44 = vrot.slane %v2310_v14, 1  ;;  %v2433_v16 = vrot.slane %v2310_v14, 7  ;;  %v5131_v36 = vunpack.i.l.bf16 %v5130_v37 }
 0x238   : > { %v2023_v31 = vpop.f32.mrf.mxu0  ;;  %v1708_v14 = vsel %vm1682_vm6, %v1675_v50, %v4712_v24 }
 0x239   : > { %v2100_v29 = vmul.f32 %v7324_v30, %v2023_v31  ;;  %5179 = vrot.lane.b32.xlu2 %v7461_v46, %s5810_s24  ;;  %v7474_v5 = vsel %vm773_vm1, %v2558_v1, %v2559_v44  ;;  %v7477_v4 = vsel %vm773_vm1, %v2559_v44, %v2561_v49  ;;  %v7480_v47 = vsel %vm644_vm2, %v2431_v52, %v2433_v16  ;;  %v5135_v1 = vpop.permute.xlu2 %5134  ;;  %v2315_v44 = vld [vmem:[#allocation3 + $0x78] sm:$0xff] }
 0x23a   : > { %v3460_v32 = vpack.c.bf16 %v7477_v4, %v7474_v5  ;;  %v7486_v13 = vpack.i.bf16 %v7480_v47, %v7464_v43  ;;  %v1707_v52 = vsel %vm1682_vm6, %v1674_v62, %v4711_v34  ;;  %v1741_v16 = vsel %vm1715_vm5, %v1708_v14, %v4792_v63 }
 0x23b   : > { %v2136_v35 = vadd.f32 %v7333_v56, %v2100_v29  ;;  %v1740_v22 = vsel %vm1715_vm5, %v1707_v52, %v4791_v57  ;;  %v5136_v31 = vunpack.i.l.bf16 %v5135_v1  ;;  %v5137_v29 = vunpack.i.h.bf16 %v5135_v1  ;;  %v2312_v57 = vld [vmem:[#allocation3 + $0x60] sm:$0xff]  ;;  %v9726_v1 = vld [vmem:[#allocation16_spill] sm:$0xff] }
 0x23c   : > { %5199 = vrot.lane.b32.xlu0 %v6450_v45, %s5807_s29  ;;  %4469 = vmatmul.msk.bf16.vlgmr.msra.gmra.mxu3 %vm1880_vm4, %v3460_v32  ;;  %v1904_v45 = vsel %vm1880_vm4, %v1871_v42, %v5127_v61  ;;  %v4872_v61 = vunpack.i.h.bf16 %v9722_v27  ;;  %v1773_v38 = vsel %vm1748_vm7, %v1740_v22, %v4871_v39  ;;  %v2566_v37 = vrot.slane %v2315_v44, 1  ;;  %v9723_v39 = vld [vmem:[#allocation49_spill] sm:$0xff]  ;;  %v9725_v22 = vld [vmem:[#allocation42_spill] sm:$0xff] }
 0x23d   : > { %v2168_v0 = vmax.f32 %v2136_v35, 0.0  ;;  %5174 = vrot.lane.b32.xlu1 %v7486_v13, %s5811_s13  ;;  %v1924_v60 = vpack.c.bf16 %v1904_v45, %v1903_v15  ;;  %v1806_v32 = vsel %vm1781_vm8, %v1773_v38, %v5131_v36  ;;  %v5142_v35 = vunpack.i.h.bf16 %v5140_v48 }
 0x23e   : > { %v1774_v23 = vsel %vm1748_vm7, %v1741_v16, %v4872_v61  ;;  %v2313_v2 = vld [vmem:[#allocation3 + $0x68] sm:$0xff]  ;;  %v1839_v24 = vsel %vm1814_vm9, %v1806_v32, %v5136_v31  ;;  %v5147_v15 = vunpack.i.h.bf16 %v5145_v18  ;;  %v2435_v62 = vrot.slane %v2312_v57, 7  ;;  %v9724_v61 = vld [vmem:[#allocation9_spill] sm:$0xff] }
 0x23f   : > { %2273 = vst.msk [vmem:[#allocation3 + $0x70] sm:$0xff] %vm1880_vm4, %v2168_v0  ;;  %v1807_v53 = vsel %vm1781_vm8, %v1774_v23, %v5132_v41  ;;  %v2563_v34 = vrot.slane %v2313_v2, 1  ;;  %v2436_v63 = vrot.slane %v2313_v2, 7  ;;  %v4636_v52 = vunpack.i.l.bf16 %v9723_v39  ;;  %v9728_v32 = vld [vmem:[#allocation33_spill] sm:$0xff] }
 0x240   : > { %v2026_v49 = vpop.f32.mrf.mxu0  ;;  %v1840_v0 = vsel %vm1814_vm9, %v1807_v53, %v5137_v29  ;;  %v4717_v36 = vunpack.i.h.bf16 %v9724_v61  ;;  %v4716_v41 = vunpack.i.l.bf16 %v9724_v61  ;;  %v4797_v44 = vunpack.i.h.bf16 %v9726_v1  ;;  %v9729_v53 = vld [vmem:[#allocation32_spill] sm:$0xff] }
 0x241   : > { %v2101_v59 = vmul.f32 %v7324_v30, %v2026_v49  ;;  %5194 = vrot.lane.b32.xlu2 %v5193_v55, %s5810_s24  ;;  %v4637_v55 = vunpack.i.h.bf16 %v9723_v39  ;;  %v7575_v31 = vsel %vm644_vm2, %v2435_v62, %v2436_v63  ;;  %v4796_v48 = vunpack.i.l.bf16 %v9726_v1 }
 0x242   : > { %v1676_v18 = vsel %vm386_vm0, %v9729_v53, %v4636_v52 }
 0x243   : > { %v2137_v25 = vadd.f32 %v7333_v56, %v2101_v59  ;;  %4392 = vmatmul.msk.bf16.gmra.mxu0 %vm1949_vm11, %v1924_v60  ;;  %v5150_v59 = vpop.permute.xlu2 %5149  ;;  %v1872_v60 = vsel %vm1847_vm10, %v1839_v24, %v5141_v7  ;;  %v5155_v24 = vpop.permute.xlu0 %5154 }
 0x244   : > { %5214 = vrot.lane.b32.xlu0 %v7523_v10, %s5809_s12  ;;  %v1905_v16 = vsel %vm1880_vm4, %v1872_v60, %v5146_v20  ;;  %v5157_v52 = vunpack.i.h.bf16 %v5155_v24 }
 0x245   : > { %v2169_v50 = vmax.f32 %v2137_v25, 0.0  ;;  %5189 = vrot.lane.b32.xlu1 %v5188_v12, %s5811_s13  ;;  %v1873_v12 = vsel %vm1847_vm10, %v1840_v0, %v5142_v35  ;;  %v9727_v25 = vld [vmem:[#allocation60_spill] sm:$0xff]  ;;  %v2319_v0 = vld [vmem:[#allocation3 + $0x98] sm:$0xff] }
 0x246   : > { %v2314_v42 = vld [vmem:[#allocation3 + $0x70] sm:$0xff]  ;;  %v1906_v38 = vsel %vm1880_vm4, %v1873_v12, %v5147_v15  ;;  %v4877_v23 = vunpack.i.h.bf16 %v9727_v25 }
 0x247   : > { %2274 = vst.msk [vmem:[#allocation3 + $0x88] sm:$0xff] %vm1880_vm4, %v2169_v50  ;;  %v2564_v21 = vrot.slane %v2314_v42, 1  ;;  %v2438_v45 = vrot.slane %v2314_v42, 7  ;;  %v7552_v58 = vpack.i.bf16 %v2314_v42, %v2313_v2  ;;  %v1677_v2 = vsel %vm386_vm0, %v9728_v32, %v4637_v55 }
 0x248   : > { %v2028_v8 = vpop.f32.mrf.mxu0  ;;  %v4876_v50 = vunpack.i.l.bf16 %v9727_v25  ;;  %v1710_v35 = vsel %vm1682_vm6, %v1677_v2, %v4717_v36  ;;  %v5151_v42 = vunpack.i.l.bf16 %v5150_v59  ;;  %v1925_v7 = vpack.c.bf16 %v1906_v38, %v1905_v16 }
 0x249   : > { %v2102_v3 = vmul.f32 %v7324_v30, %v2028_v8  ;;  %5209 = vrot.lane.b32.xlu2 %v5208_v19, %s5808_s30  ;;  %v7547_v9 = vsel %vm773_vm1, %v2563_v34, %v2564_v21  ;;  %v7550_v11 = vsel %vm773_vm1, %v2564_v21, %v2566_v37  ;;  %v7564_v49 = vsel %vm644_vm2, %v2436_v63, %v2438_v45  ;;  %v5160_v8 = vpop.permute.xlu1 %5159 }
 0x24a   : > { %v3463_v6 = vpack.c.bf16 %v7550_v11, %v7547_v9  ;;  %v7582_v29 = vpack.i.bf16 %v7564_v49, %v7575_v31  ;;  %v5152_v19 = vunpack.i.h.bf16 %v5150_v59  ;;  %v1709_v21 = vsel %vm1682_vm6, %v1676_v18, %v4716_v41 }
 0x24b   : > { %v2138_v27 = vadd.f32 %v7333_v56, %v2102_v3  ;;  %v1743_v57 = vsel %vm1715_vm5, %v1710_v35, %v4797_v44  ;;  %v1742_v15 = vsel %vm1715_vm5, %v1709_v21, %v4796_v48  ;;  %v7601_v3 = vpack.i.bf16 %v7477_v4, %v7474_v5  ;;  %v5165_v61 = vpop.permute.xlu2 %5164  ;;  %v593_v5 = vld [vmem:[#allocation2 + $0x228] sm:$0xff]  ;;  %v594_v4 = vld [vmem:[#allocation2 + $0x230] sm:$0xff] }
 0x24c   : > { %5229 = vrot.lane.b32.xlu0 %v7552_v58, %s5810_s24  ;;  %4470 = vmatmul.msk.bf16.gmra.mxu3 %vm1880_vm4, %v3463_v6  ;;  %v1776_v20 = vsel %vm1748_vm7, %v1743_v57, %v4877_v23  ;;  %v592_v6 = vld [vmem:[#allocation2 + $0x220] sm:$0xff]  ;;  %v1775_v62 = vsel %vm1748_vm7, %v1742_v15, %v4876_v50  ;;  %v2571_v41 = vrot.slane %v2319_v0, 1  ;;  %v5161_v59 = vunpack.i.l.bf16 %v5160_v8 }
 0x24d   : > { %v2170_v14 = vmax.f32 %v2138_v27, 0.0  ;;  %5204 = vrot.lane.b32.xlu1 %v9725_v22, %s5806_s25  ;;  %v1809_v63 = vsel %vm1781_vm8, %v1776_v20, %v5152_v19  ;;  %v5156_v27 = vunpack.i.l.bf16 %v5155_v24  ;;  %v1808_v55 = vsel %vm1781_vm8, %v1775_v62, %v5151_v42  ;;  %v2316_v42 = vld [vmem:[#allocation3 + $0x80] sm:$0xff] }
 0x24e   : > { %v7607_v39 = vld [vmem:[#allocation3 + $0x88] sm:$0xff]  ;;  %v874_v60 = vrot.slane %v594_v4, 7  ;;  %v872_v12 = vrot.slane %v593_v5, 7  ;;  %v871_v22 = vrot.slane %v592_v6, 7  ;;  %v5167_v38 = vunpack.i.h.bf16 %v5165_v61 }
 0x24f   : > { %2275 = vst.msk [vmem:[#allocation3 + $0x90] sm:$0xff] %vm1880_vm4, %v2170_v14  ;;  %v2568_v1 = vrot.slane %v7607_v39, 1  ;;  %v1841_v16 = vsel %vm1814_vm9, %v1808_v55, %v5156_v27  ;;  %v5166_v48 = vunpack.i.l.bf16 %v5165_v61  ;;  %v5258_v23 = vpack.i.bf16 %v594_v4, %v593_v5 }
 0x250   : > { %v2031_v37 = vpop.f32.mrf.mxu0  ;;  %v1842_v32 = vsel %vm1814_vm9, %v1809_v63, %v5157_v52  ;;  %v1874_v50 = vsel %vm1847_vm10, %v1841_v16, %v5161_v59  ;;  %v875_v35 = vsel %vm644_vm2, %v872_v12, %v874_v60  ;;  %v5233_v24 = vpack.i.bf16 %v7398_v54, %v7392_v33  ;;  %v595_v54 = vld [vmem:[#allocation2 + $0x238] sm:$0xff] }
 0x251   : > { %v2103_v34 = vmul.f32 %v7324_v30, %v2031_v37  ;;  %5224 = vrot.lane.b32.xlu2 %v7582_v29, %s5811_s13  ;;  %v873_v37 = vsel %vm644_vm2, %v871_v22, %v872_v12  ;;  %v2440_v0 = vrot.slane %v2316_v42, 7  ;;  %v2441_v15 = vrot.slane %v7607_v39, 7 }
 0x252   : > { %v5253_v57 = vpack.i.bf16 %v875_v35, %v873_v37  ;;  %v1907_v20 = vsel %vm1880_vm4, %v1874_v50, %v5166_v48  ;;  %v878_v27 = vrot.slane %v594_v4, 1  ;;  %v877_v55 = vrot.slane %v593_v5, 1 }
 0x253   : > { %v2139_v45 = vadd.f32 %v7333_v56, %v2103_v34  ;;  %4393 = vmatmul.msk.bf16.gmra.mxu0 %vm1949_vm11, %v1925_v7  ;;  %v7651_v63 = vsel %vm644_vm2, %v2440_v0, %v2441_v15  ;;  %v880_v61 = vrot.slane %v595_v54, 1  ;;  %v4512_v0 = vld [vmem:[%s9487_s4 + $0x78] sm:$0xff] }
 0x254   : > { %5244 = vrot.lane.b32.xlu0 %v7486_v13, %s5810_s24  ;;  %v5162_v13 = vunpack.i.h.bf16 %v5160_v8  ;;  %v879_v4 = vsel %vm773_vm1, %v877_v55, %v878_v27  ;;  %3787 = vmatpush.bf16.msra.mxu2 %v4512_v0  ;;  %v2328_v0 = vld [vmem:[#allocation3 + $0xe0] sm:$0xff] }
 0x255   : > { %v2171_v36 = vmax.f32 %v2139_v45, 0.0  ;;  %5219 = vrot.lane.b32.xlu1 %v7601_v3, %s5809_s12  ;;  %v881_v12 = vsel %vm773_vm1, %v878_v27, %v880_v61 }
 0x256   : > { %v7612_v14 = vld [vmem:[#allocation3 + $0x90] sm:$0xff]  ;;  %v1875_v7 = vsel %vm1847_vm10, %v1842_v32, %v5162_v13  ;;  %v5268_v13 = vpack.i.bf16 %v7550_v11, %v7547_v9  ;;  %v2320_v9 = vld [vmem:[#allocation3 + $0xa0] sm:$0xff] }
 0x257   : > { %2276 = vst.msk [vmem:[#allocation3 + $0xa8] sm:$0xff] %vm1880_vm4, %v2171_v36  ;;  %v2569_v44 = vrot.slane %v7612_v14, 1  ;;  %v2443_v34 = vrot.slane %v7612_v14, 7  ;;  %v1908_v8 = vsel %vm1880_vm4, %v1875_v7, %v5167_v38  ;;  %v2323_v36 = vld [vmem:[#allocation3 + $0xb8] sm:$0xff]  ;;  %v2445_v50 = vrot.slane %v2320_v9, 7 }
 0x258   : > { %v2033_v25 = vpop.f32.mrf.mxu0  ;;  %v1926_v6 = vpack.c.bf16 %v1908_v8, %v1907_v20  ;;  %v2576_v5 = vrot.slane %v2323_v36, 1 }
 0x259   : > { %v2104_v2 = vmul.f32 %v7324_v30, %v2033_v25  ;;  %5239 = vrot.lane.b32.xlu2 %v7412_v26, %s5811_s13  ;;  %v7623_v53 = vsel %vm773_vm1, %v2568_v1, %v2569_v44  ;;  %v7626_v18 = vsel %vm773_vm1, %v2569_v44, %v2571_v41  ;;  %v7646_v33 = vsel %vm644_vm2, %v2441_v15, %v2443_v34 }
 0x25a   : > { %v3466_v19 = vpack.c.bf16 %v7626_v18, %v7623_v53  ;;  %v7655_v52 = vpack.i.bf16 %v7646_v33, %v7651_v63  ;;  %v7708_v34 = vpack.i.bf16 %v7612_v14, %v7607_v39  ;;  %v7724_v39 = vpack.i.bf16 %v7626_v18, %v7623_v53  ;;  %v4511_v53 = vld [vmem:[%s9487_s4 + $0x70] sm:$0xff] }
 0x25b   : > { %v2140_v26 = vadd.f32 %v7333_v56, %v2104_v2  ;;  %3788 = vmatpush.bf16.msra.mxu2 %v4511_v53 }
 0x25c   : > { %5259 = vrot.lane.b32.xlu0 %v5258_v23, %s5808_s30  ;;  %4471 = vmatmul.msk.bf16.gmra.mxu3 %vm1880_vm4, %v3466_v19 }
 0x25d   : > { %v2172_v21 = vmax.f32 %v2140_v26, 0.0  ;;  %5234 = vrot.lane.b32.xlu1 %v5233_v24, %s5809_s12  ;;  %v2327_v26 = vld [vmem:[#allocation3 + $0xd8] sm:$0xff] }
 0x25e   : > { %v7661_v59 = vld [vmem:[#allocation3 + $0xa8] sm:$0xff] }
 0x25f   : > { %2277 = vst.msk [vmem:[#allocation3 + $0xb0] sm:$0xff] %vm1880_vm4, %v2172_v21  ;;  %v2573_v1 = vrot.slane %v7661_v59, 1  ;;  %v2446_v19 = vrot.slane %v7661_v59, 7 }
 0x260   : > { %v2036_v45 = vpop.f32.mrf.mxu0 }
 0x261   : > { %v2105_v62 = vmul.f32 %v7324_v30, %v2036_v45  ;;  %5254 = vrot.lane.b32.xlu2 %v5253_v57, %s5806_s25  ;;  %v2581_v57 = vrot.slane %v2327_v26, 1 }
 0x263   : > { %v2141_v41 = vadd.f32 %v7333_v56, %v2105_v62  ;;  %4394 = vmatmul.msk.bf16.gmra.mxu0 %vm1949_vm11, %v1926_v6  ;;  %v2324_v62 = vld [vmem:[#allocation3 + $0xc0] sm:$0xff] }
 0x264   : > { %5274 = vrot.lane.b32.xlu0 %v7655_v52, %s5811_s13  ;;  %v2450_v36 = vrot.slane %v2324_v62, 7 }
 0x265   : > { %v2173_v60 = vmax.f32 %v2141_v41, 0.0  ;;  %5249 = vrot.lane.b32.xlu1 %v7523_v10, %s5807_s29  ;;  %v5263_v10 = vpack.i.bf16 %v881_v12, %v879_v4 }
 0x266   : > { %v7667_v22 = vld [vmem:[#allocation3 + $0xb0] sm:$0xff] }
 0x267   : > { %2278 = vst.msk [vmem:[#allocation3 + $0xc8] sm:$0xff] %vm1880_vm4, %v2173_v60  ;;  %v2574_v44 = vrot.slane %v7667_v22, 1  ;;  %v2448_v32 = vrot.slane %v7667_v22, 7  ;;  %v4504_v60 = vld [vmem:[%s9487_s4 + $0x38] sm:$0xff]  ;;  %v7780_v9 = vpack.i.bf16 %v7667_v22, %v7661_v59 }
 0x268   : > { %v2038_v16 = vpop.f32.mrf.mxu0  ;;  %3698 = vmatpush.bf16.msra.mxu1 %v4504_v60  ;;  %v4508_v59 = vld [vmem:[%s9487_s4 + $0x58] sm:$0xff] }
 0x269   : > { %v2106_v38 = vmul.f32 %v7324_v30, %v2038_v16  ;;  %5269 = vrot.lane.b32.xlu2 %v5268_v13, %s5809_s12  ;;  %v7677_v48 = vsel %vm773_vm1, %v2573_v1, %v2574_v44  ;;  %v7680_v25 = vsel %vm773_vm1, %v2574_v44, %v2576_v5  ;;  %v7693_v37 = vsel %vm644_vm2, %v2446_v19, %v2448_v32  ;;  %v4510_v5 = vld [vmem:[%s9487_s4 + $0x68] sm:$0xff]  ;;  %v4503_v1 = vld [vmem:[%s9487_s4 + $0x30] sm:$0xff]  ;;  %v4509_v44 = vld [vmem:[%s9487_s4 + $0x60] sm:$0xff] }
 0x26a   : > { %v3469_v23 = vpack.c.bf16 %v7680_v25, %v7677_v48  ;;  %3789 = vmatpush.bf16.msra.mxu2 %v4510_v5  ;;  %v2335_v60 = vld [vmem:[#allocation3 + $0x118] sm:$0xff] }
 0x26b   : > { %v2142_v11 = vadd.f32 %v7333_v56, %v2106_v38  ;;  %v2331_v38 = vld [vmem:[#allocation3 + $0xf8] sm:$0xff] }
 0x26c   : > { %5289 = vrot.lane.b32.xlu0 %v7601_v3, %s5811_s13  ;;  %4472 = vmatmul.msk.bf16.gmra.mxu3 %vm1880_vm4, %v3469_v23  ;;  %v7699_v3 = vsel %vm644_vm2, %v2445_v50, %v2446_v19  ;;  %v7799_v50 = vpack.i.bf16 %v7680_v25, %v7677_v48 }
 0x26d   : > { %v2174_v2 = vmax.f32 %v2142_v11, 0.0  ;;  %5264 = vrot.lane.b32.xlu1 %v5263_v10, %s5809_s12  ;;  %v7703_v7 = vpack.i.bf16 %v7693_v37, %v7699_v3  ;;  %v2423_v10 = vrot.slane %v7430_v28, 7  ;;  %3699 = vmatpush.bf16.msra.mxu1 %v4503_v1  ;;  %v2586_v28 = vrot.slane %v2331_v38, 1 }
 0x26e   : > { %v7712_v21 = vld [vmem:[#allocation3 + $0xc8] sm:$0xff]  ;;  %3790 = vmatpush.bf16.msra.mxu2 %v4509_v44  ;;  %v2591_v38 = vrot.slane %v2335_v60, 1 }
 0x26f   : > { %2279 = vst.msk [vmem:[#allocation3 + $0xd0] sm:$0xff] %vm1880_vm4, %v2174_v2  ;;  %v2578_v14 = vrot.slane %v7712_v21, 1  ;;  %v2451_v41 = vrot.slane %v7712_v21, 7  ;;  %v4502_v2 = vld [vmem:[%s9487_s4 + $0x28] sm:$0xff] }
 0x270   : > { %v2041_v35 = vpop.f32.mrf.mxu0 }
 0x271   : > { %v2107_v42 = vmul.f32 %v7324_v30, %v2041_v35  ;;  %5284 = vrot.lane.b32.xlu2 %v7461_v46, %s5809_s12  ;;  %3700 = vmatpush.bf16.msra.mxu1 %v4502_v2 }
 0x272   : > { %3791 = vmatpush.bf16.msra.mxu2 %v4508_v59 }
 0x273   : > { %v2143_v24 = vadd.f32 %v7333_v56, %v2107_v42 }
 0x274   : > { %5304 = vrot.lane.b32.xlu0 %v7703_v7, %s5811_s13 }
 0x275   : > { %v2175_v46 = vmax.f32 %v2143_v24, 0.0  ;;  %5279 = vrot.lane.b32.xlu1 %v7708_v34, %s5810_s24 }
 0x276   : > { %v7719_v15 = vld [vmem:[#allocation3 + $0xd0] sm:$0xff] }
 0x277   : > { %2280 = vst.msk [vmem:[#allocation3 + $0xe8] sm:$0xff] %vm1880_vm4, %v2175_v46  ;;  %v2579_v20 = vrot.slane %v7719_v15, 1  ;;  %v2453_v55 = vrot.slane %v7719_v15, 7  ;;  %v4501_v46 = vld [vmem:[%s9487_s4 + $0x20] sm:$0xff] }
 0x278   : > { %v2043_v8 = vpop.f32.mrf.mxu0  ;;  %3701 = vmatpush.bf16.msra.mxu1 %v4501_v46 }
 0x279   : > { %v2108_v54 = vmul.f32 %v7324_v30, %v2043_v8  ;;  %5299 = vrot.lane.b32.xlu2 %v7724_v39, %s5809_s12  ;;  %v7732_v45 = vsel %vm773_vm1, %v2578_v14, %v2579_v20  ;;  %v7735_v6 = vsel %vm773_vm1, %v2579_v20, %v2581_v57  ;;  %v7757_v4 = vsel %vm644_vm2, %v2451_v41, %v2453_v55  ;;  %v4507_v57 = vld [vmem:[%s9487_s4 + $0x50] sm:$0xff] }
 0x27a   : > { %v3472_v18 = vpack.c.bf16 %v7735_v6, %v7732_v45  ;;  %3792 = vmatpush.bf16.msra.mxu2 %v4507_v57 }
 0x27b   : > { %v2144_v27 = vadd.f32 %v7333_v56, %v2108_v54  ;;  %v2455_v54 = vrot.slane %v2328_v0, 7 }
 0x27c   : > { %5319 = vrot.lane.b32.xlu0 %v5268_v13, %s5811_s13  ;;  %4473 = vmatmul.msk.bf16.gmra.mxu3 %vm1880_vm4, %v3472_v18  ;;  %v7763_v13 = vsel %vm644_vm2, %v2450_v36, %v2451_v41  ;;  %v4506_v18 = vld [vmem:[%s9487_s4 + $0x48] sm:$0xff]  ;;  %v4505_v36 = vld [vmem:[%s9487_s4 + $0x40] sm:$0xff] }
 0x27d   : > { %v2176_v61 = vmax.f32 %v2144_v27, 0.0  ;;  %5294 = vrot.lane.b32.xlu1 %v7582_v29, %s5810_s24  ;;  %v7773_v16 = vpack.i.bf16 %v7757_v4, %v7763_v13 }
 0x27e   : > { %v7784_v11 = vld [vmem:[#allocation3 + $0xe8] sm:$0xff]  ;;  %3793 = vmatpush.bf16.msra.mxu2 %v4506_v18 }
 0x27f   : > { %2281 = vst.msk [vmem:[#allocation3 + $0xf0] sm:$0xff] %vm1880_vm4, %v2176_v61  ;;  %v2583_v19 = vrot.slane %v7784_v11, 1  ;;  %v2456_v53 = vrot.slane %v7784_v11, 7  ;;  %v4499_v61 = vld [vmem:[%s9487_s4 + $0x10] sm:$0xff] }
 0x280   : > { %v2046_v12 = vpop.f32.mrf.mxu0 }
 0x281   : > { %v2109_v29 = vmul.f32 %v7324_v30, %v2046_v12  ;;  %5314 = vrot.lane.b32.xlu2 %v7552_v58, %s5809_s12  ;;  %v2421_v58 = vrot.slane %v7428_v40, 7  ;;  %v7852_v55 = vsel %vm644_vm2, %v2455_v54, %v2456_v53  ;;  %v9735_v40 = vld [vmem:[#allocation59_spill] sm:$0xff] }
 0x282   : > { %3794 = vmatpush.bf16.msra.mxu2 %v4505_v36 }
 0x283   : > { %v2145_v23 = vadd.f32 %v7333_v56, %v2109_v29  ;;  %v7806_v42 = vsel %vm644_vm2, %v2421_v58, %v2423_v10  ;;  %v7874_v29 = vpack.i.bf16 %v7719_v15, %v7712_v21  ;;  %v4498_v10 = vld [vmem:[%s9487_s4 + $0x8] sm:$0xff]  ;;  %v5358_v21 = vpack.i.bf16 %v7735_v6, %v7732_v45  ;;  %v4497_v45 = vld [vmem:[%s9487_s4] sm:$0xff] }
 0x284   : > { %5334 = vrot.lane.b32.xlu0 %v7773_v16, %s5811_s13 }
 0x285   : > { %v2177_v32 = vmax.f32 %v2145_v23, 0.0  ;;  %5309 = vrot.lane.b32.xlu1 %v7780_v9, %s5810_s24 }
 0x286   : > { %v7794_v22 = vld [vmem:[#allocation3 + $0xf0] sm:$0xff] }
 0x287   : > { %2282 = vst.msk [vmem:[#allocation3 + $0x108] sm:$0xff] %vm1880_vm4, %v2177_v32  ;;  %v2584_v35 = vrot.slane %v7794_v22, 1  ;;  %v2458_v20 = vrot.slane %v7794_v22, 7  ;;  %v7936_v18 = vpack.i.bf16 %v7794_v22, %v7784_v11 }
 0x288   : > { %v2048_v26 = vpop.f32.mrf.mxu0 }
 0x289   : > { %v2110_v24 = vmul.f32 %v7324_v30, %v2048_v26  ;;  %5329 = vrot.lane.b32.xlu2 %v7799_v50, %s5809_s12  ;;  %v7812_v48 = vsel %vm773_vm1, %v2583_v19, %v2584_v35  ;;  %v7815_v25 = vsel %vm773_vm1, %v2584_v35, %v2586_v28  ;;  %v2332_v35 = vld [vmem:[#allocation3 + $0x100] sm:$0xff] }
 0x28a   : > { %v3475_v30 = vpack.c.bf16 %v7815_v25, %v7812_v48  ;;  %v7951_v11 = vpack.i.bf16 %v7815_v25, %v7812_v48  ;;  %v2300_v48 = vld [vmem:[#allocation3] sm:$0xff] }
 0x28b   : > { %v2146_v14 = vadd.f32 %v7333_v56, %v2110_v24  ;;  %v4500_v56 = vld [vmem:[%s9487_s4 + $0x18] sm:$0xff] }
 0x28c   : > { %5349 = vrot.lane.b32.xlu0 %v7724_v39, %s5811_s13  ;;  %4474 = vmatmul.msk.bf16.gmra.mxu3 %vm1880_vm4, %v3475_v30  ;;  %v7841_v39 = vsel %vm644_vm2, %v2456_v53, %v2458_v20  ;;  %v2460_v30 = vrot.slane %v2332_v35, 7 }
 0x28d   : > { %v2178_v8 = vmax.f32 %v2146_v14, 0.0  ;;  %5324 = vrot.lane.b32.xlu1 %v7655_v52, %s5810_s24  ;;  %3702 = vmatpush.bf16.msra.mxu1 %v4500_v56  ;;  %v7846_v52 = vld [vmem:[%s9485_s2] ss:$0 sm:$0xff]  ;;  %v7862_v41 = vpack.i.bf16 %v7841_v39, %v7852_v55 }
 0x28e   : > { %v7878_v1 = vld [vmem:[#allocation3 + $0x108] sm:$0xff] }
 0x28f   : > { %2283 = vst.msk [vmem:[#allocation3 + $0x110] sm:$0xff] %vm1880_vm4, %v2178_v8  ;;  %v2588_v15 = vrot.slane %v7878_v1, 1  ;;  %v2461_v0 = vrot.slane %v7878_v1, 7 }
 0x290   : > { %v2051_v62 = vpop.f32.mrf.mxu0 }
 0x291   : > { %v2111_v27 = vmul.f32 %v7846_v52, %v2051_v62  ;;  %5344 = vrot.lane.b32.xlu2 %v7708_v34, %s5809_s12  ;;  %v7867_v34 = vld [vmem:[%s9486_s3] ss:$0 sm:$0xff]  ;;  %3703 = vmatpush.bf16.msra.mxu1 %v4499_v61  ;;  %v2339_v62 = vld [vmem:[#allocation3 + $0x138] sm:$0xff] }
 0x292   : > { %v2596_v60 = vrot.slane %v2339_v62, 1  ;;  %v9732_v62 = vld [vmem:[#allocation14_spill] sm:$0xff] }
 0x293   : > { %v2147_v5 = vadd.f32 %v7867_v34, %v2111_v27  ;;  %v7870_v12 = vpop.permute.xlu2 %5179 }
 0x294   : > { %5364 = vrot.lane.b32.xlu0 %v7862_v41, %s5811_s13 }
 0x295   : > { %v2179_v44 = vmax.f32 %v2147_v5, 0.0  ;;  %5339 = vrot.lane.b32.xlu1 %v7874_v29, %s5810_s24  ;;  %3704 = vmatpush.bf16.msra.mxu1 %v4498_v10 }
 0x296   : > { %v7885_v23 = vld [vmem:[#allocation3 + $0x110] sm:$0xff] }
 0x297   : > { %2284 = vst.msk [vmem:[#allocation3 + $0x128] sm:$0xff] %vm1880_vm4, %v2179_v44  ;;  %v2589_v32 = vrot.slane %v7885_v23, 1  ;;  %v2463_v46 = vrot.slane %v7885_v23, 7  ;;  %v9730_v44 = vld [vmem:[#allocation43_spill] sm:$0xff] }
 0x298   : > { %v2053_v28 = vpop.f32.mrf.mxu0 }
 0x299   : > { %v2112_v2 = vmul.f32 %v7846_v52, %v2053_v28  ;;  %5359 = vrot.lane.b32.xlu2 %v5358_v21, %s5809_s12  ;;  %v7895_v59 = vsel %vm773_vm1, %v2588_v15, %v2589_v32  ;;  %v7898_v19 = vsel %vm773_vm1, %v2589_v32, %v2591_v38  ;;  %3705 = vmatpush.bf16.msra.mxu1 %v4497_v45  ;;  %v4642_v38 = vunpack.i.h.bf16 %v9730_v44  ;;  %v2336_v28 = vld [vmem:[#allocation3 + $0x120] sm:$0xff] }
 0x29a   : > { %v3478_v6 = vpack.c.bf16 %v7898_v19, %v7895_v59  ;;  %v7919_v20 = vsel %vm644_vm2, %v2461_v0, %v2463_v46 }
 0x29b   : > { %v2148_v26 = vadd.f32 %v7867_v34, %v2112_v2  ;;  %v7906_v24 = vpop.permute.xlu2 %5194 }
 0x29c   : > { %5379 = vrot.lane.b32.xlu0 %v7799_v50, %s5811_s13  ;;  %4475 = vmatmul.msk.bf16.gmra.mxu3 %vm1880_vm4, %v3478_v6  ;;  %v7925_v50 = vsel %vm644_vm2, %v2460_v30, %v2461_v0  ;;  %v2465_v30 = vrot.slane %v2336_v28, 7  ;;  %v7993_v28 = vpack.i.bf16 %v7885_v23, %v7878_v1 }
 0x29d   : > { %v2180_v57 = vmax.f32 %v2148_v26, 0.0  ;;  %5354 = vrot.lane.b32.xlu1 %v7703_v7, %s5810_s24  ;;  %v7929_v7 = vpack.i.bf16 %v7919_v20, %v7925_v50  ;;  %v9731_v26 = vld [vmem:[#allocation38_spill] sm:$0xff] }
 0x29e   : > { %v7915_v14 = vpop.permute.xlu0 %5169  ;;  %v1679_v46 = vsel %vm386_vm0, %v9731_v26, %v4642_v38 }
 0x29f   : > { %2285 = vst.msk [vmem:[#allocation3 + $0x130] sm:$0xff] %vm1880_vm4, %v2180_v57  ;;  %v4641_v57 = vunpack.i.l.bf16 %v9730_v44  ;;  %v5172_v0 = vunpack.i.h.bf16 %v7915_v14 }
 0x2a0   : > { %v2056_v8 = vpop.f32.mrf.mxu0 }
 0x2a1   : > { %v2113_v54 = vmul.f32 %v7846_v52, %v2056_v8  ;;  %5374 = vrot.lane.b32.xlu2 %v7780_v9, %s5809_s12  ;;  %v7940_v9 = vld [vmem:[#allocation3 + $0x128] sm:$0xff]  ;;  %v5171_v8 = vunpack.i.l.bf16 %v7915_v14 }
 0x2a2   : > { %v2593_v22 = vrot.slane %v7940_v9, 1 }
 0x2a3   : > { %v2149_v53 = vadd.f32 %v7867_v34, %v2113_v54  ;;  %v7932_v56 = vpop.permute.xlu2 %5209 }
 0x2a4   : > { %5394 = vrot.lane.b32.xlu0 %v7929_v7, %s5811_s13 }
 0x2a5   : > { %v2181_v27 = vmax.f32 %v2149_v53, 0.0  ;;  %5369 = vrot.lane.b32.xlu1 %v7936_v18, %s5810_s24  ;;  %v2466_v53 = vrot.slane %v7940_v9, 7 }
 0x2a6   : > { %v7944_v61 = vpop.permute.xlu0 %5184  ;;  %v7946_v36 = vld [vmem:[#allocation3 + $0x130] sm:$0xff] }
 0x2a7   : > { %2286 = vst.msk [vmem:[#allocation3 + $0x148] sm:$0xff] %vm1880_vm4, %v2181_v27  ;;  %v2594_v5 = vrot.slane %v7946_v36, 1  ;;  %v2468_v35 = vrot.slane %v7946_v36, 7  ;;  %v4722_v27 = vunpack.i.h.bf16 %v9732_v62 }
 0x2a8   : > { %v2058_v10 = vpop.f32.mrf.mxu0 }
 0x2a9   : > { %v2114_v15 = vmul.f32 %v7846_v52, %v2058_v10  ;;  %5389 = vrot.lane.b32.xlu2 %v7951_v11, %s5809_s12  ;;  %v7960_v32 = vsel %vm773_vm1, %v2593_v22, %v2594_v5  ;;  %v7963_v2 = vsel %vm773_vm1, %v2594_v5, %v2596_v60  ;;  %v4721_v60 = vunpack.i.l.bf16 %v9732_v62  ;;  %v2343_v62 = vld [vmem:[#allocation3 + $0x158] sm:$0xff] }
 0x2aa   : > { %v3481_v6 = vpack.c.bf16 %v7963_v2, %v7960_v32  ;;  %v2420_v22 = vrot.slane %v2300_v48, 7  ;;  %v7988_v44 = vsel %vm644_vm2, %v2466_v53, %v2468_v35  ;;  %v5707_v48 = vld [vmem:[#allocation3 + $0x30] sm:$0xff] }
 0x2ab   : > { %v2150_v25 = vadd.f32 %v7867_v34, %v2114_v15  ;;  %v7966_v45 = vpop.permute.xlu2 %5224 }
 0x2ac   : > { %5409 = vrot.lane.b32.xlu0 %v5358_v21, %s5811_s13  ;;  %4476 = vmatmul.msk.bf16.gmra.mxu3 %vm1880_vm4, %v3481_v6  ;;  %v5182_v21 = vunpack.i.h.bf16 %v7870_v12  ;;  %v5708_v6 = vld [vmem:[#allocation3 + $0x28] sm:$0xff] }
 0x2ad   : > { %v2182_v54 = vmax.f32 %v2150_v25, 0.0  ;;  %5384 = vrot.lane.b32.xlu1 %v7773_v16, %s5810_s24  ;;  %v5181_v16 = vunpack.i.l.bf16 %v7870_v12  ;;  %v3363_v25 = vsel %vm1880_vm4, %v5707_v48, %v5172_v0  ;;  %v3362_v26 = vsel %vm1880_vm4, %v5708_v6, %v5171_v8 }
 0x2ae   : > { %v7983_v5 = vpop.permute.xlu0 %5199  ;;  %v8001_v12 = vsel %vm644_vm2, %v2465_v30, %v2466_v53  ;;  %v5186_v8 = vunpack.i.l.bf16 %v7944_v61  ;;  %v9733_v53 = vld [vmem:[#allocation37_spill] sm:$0xff]  ;;  %v1712_v6 = vsel %vm1682_vm6, %v1679_v46, %v4722_v27  ;;  %v4882_v27 = vunpack.i.h.bf16 %v9735_v40 }
 0x2af   : > { %2287 = vst.msk [vmem:[#allocation3 + $0x150] sm:$0xff] %vm1880_vm4, %v2182_v54  ;;  %v5175_v14 = vpop.permute.xlu1 %5174  ;;  %v5187_v54 = vunpack.i.h.bf16 %v7944_v61  ;;  %v8006_v1 = vpack.i.bf16 %v7988_v44, %v8001_v12  ;;  %v1678_v48 = vsel %vm386_vm0, %v9733_v53, %v4641_v57  ;;  %v2601_v57 = vrot.slane %v2343_v62, 1 }
 0x2b0   : > { %v5177_v38 = vunpack.i.h.bf16 %v5175_v14  ;;  %v5176_v10 = vunpack.i.l.bf16 %v5175_v14  ;;  %v2061_v15 = vpop.f32.mrf.mxu0 }
 0x2b1   : > { %v2115_v35 = vmul.f32 %v7846_v52, %v2061_v15  ;;  %5404 = vrot.lane.b32.xlu2 %v7874_v29, %s5809_s12 }
 0x2b2   : > { %v3394_v23 = vsel %vm3296_vm12, %v3362_v26, %v5176_v10  ;;  %v3395_v0 = vsel %vm3296_vm12, %v3363_v25, %v5177_v38  ;;  %v2422_v38 = vsel %vm644_vm2, %v2420_v22, %v2421_v58  ;;  %v8024_v10 = vld [vmem:[#allocation3 + $0x148] sm:$0xff]  ;;  %v1711_v25 = vsel %vm1682_vm6, %v1678_v48, %v4721_v60 }
 0x2b3   : > { %v2151_v14 = vadd.f32 %v7867_v34, %v2115_v35  ;;  %v8012_v15 = vpop.permute.xlu2 %5239  ;;  %v3426_v29 = vsel %vm3329_vm13, %v3394_v23, %v5181_v16  ;;  %v3427_v30 = vsel %vm3329_vm13, %v3395_v0, %v5182_v21  ;;  %v9734_v16 = vld [vmem:[#allocation55_spill] sm:$0xff]  ;;  %v4881_v58 = vunpack.i.l.bf16 %v9735_v40 }
 0x2b4   : > { %5424 = vrot.lane.b32.xlu0 %v8006_v1, %s5811_s13  ;;  %v3459_v61 = vpack.c.bf16 %v3427_v30, %v3426_v29  ;;  %v4802_v26 = vunpack.i.h.bf16 %v9734_v16  ;;  %v4801_v46 = vunpack.i.l.bf16 %v9734_v16  ;;  %v8037_v35 = vpack.i.bf16 %v7898_v19, %v7895_v59 }
 0x2b5   : > { %v2183_v21 = vmax.f32 %v2151_v14, 0.0  ;;  %5399 = vrot.lane.b32.xlu1 %v7993_v28, %s5810_s24  ;;  %v3265_v23 = vsel %vm1880_vm4, %v7806_v42, %v5187_v54  ;;  %v3264_v0 = vsel %vm1880_vm4, %v2422_v38, %v5186_v8  ;;  %v2598_v14 = vrot.slane %v8024_v10, 1  ;;  %v2340_v8 = vld [vmem:[#allocation3 + $0x140] sm:$0xff] }
 0x2b6   : > { %3795 = vmatmul.bf16.vlgmr.msra.gmra.mxu2 %v3459_v61  ;;  %v8033_v22 = vpop.permute.xlu0 %5214  ;;  %v8039_v60 = vld [vmem:[#allocation3 + $0x150] sm:$0xff]  ;;  %v5197_v30 = vunpack.i.h.bf16 %v7906_v24  ;;  %v5196_v19 = vunpack.i.l.bf16 %v7906_v24 }
 0x2b7   : > { %2288 = vst.msk [vmem:[#allocation3 + $0x168] sm:$0xff] %vm1880_vm4, %v2183_v21  ;;  %v5190_v62 = vpop.permute.xlu1 %5189  ;;  %v2599_v29 = vrot.slane %v8039_v60, 1 }
 0x2b8   : > { %v5192_v53 = vunpack.i.h.bf16 %v5190_v62  ;;  %v5191_v48 = vunpack.i.l.bf16 %v5190_v62  ;;  %v2063_v59 = vpop.f32.mrf.mxu0 }
 0x2b9   : > { %v2116_v61 = vmul.f32 %v7846_v52, %v2063_v59  ;;  %5419 = vrot.lane.b32.xlu2 %v8037_v35, %s5809_s12  ;;  %v8053_v42 = vsel %vm773_vm1, %v2598_v14, %v2599_v29  ;;  %v8056_v54 = vsel %vm773_vm1, %v2599_v29, %v2601_v57  ;;  %v2473_v59 = vrot.slane %v8039_v60, 7 }
 0x2ba   : > { %v3484_v38 = vpack.c.bf16 %v8056_v54, %v8053_v42  ;;  %v3297_v16 = vsel %vm3296_vm12, %v3264_v0, %v5191_v48  ;;  %v3298_v21 = vsel %vm3296_vm12, %v3265_v23, %v5192_v53  ;;  %v1744_v57 = vsel %vm1715_vm5, %v1711_v25, %v4801_v46 }
 0x2bb   : > { %v2152_v24 = vadd.f32 %v7867_v34, %v2116_v61  ;;  %v8063_v40 = vpop.permute.xlu2 %5254  ;;  %v3330_v62 = vsel %vm3329_vm13, %v3297_v16, %v5196_v19  ;;  %v3331_v14 = vsel %vm3329_vm13, %v3298_v21, %v5197_v30  ;;  %v1745_v29 = vsel %vm1715_vm5, %v1712_v6, %v4802_v26 }
 0x2bc   : > { %5439 = vrot.lane.b32.xlu0 %v7951_v11, %s5811_s13  ;;  %v3458_v0 = vpack.c.bf16 %v3331_v14, %v3330_v62  ;;  %v2470_v48 = vrot.slane %v2340_v8, 7  ;;  %v5202_v23 = vunpack.i.h.bf16 %v7983_v5  ;;  %v5201_v53 = vunpack.i.l.bf16 %v7983_v5  ;;  %4477 = vmatmul.msk.bf16.gmra.mxu3 %vm1880_vm4, %v3484_v38 }
 0x2bd   : > { %v2184_v61 = vmax.f32 %v2152_v24, 0.0  ;;  %5414 = vrot.lane.b32.xlu1 %v7862_v41, %s5810_s24  ;;  %v2471_v30 = vrot.slane %v8024_v10, 7  ;;  %v1778_v25 = vsel %vm1748_vm7, %v1745_v29, %v4882_v27  ;;  %v1777_v6 = vsel %vm1748_vm7, %v1744_v57, %v4881_v58 }
 0x2be   : > { %3706 = vmatmul.bf16.vlgmr.msra.gmra.mxu1 %v3458_v0  ;;  %v8080_v11 = vpop.permute.xlu0 %5229  ;;  %v5212_v26 = vunpack.i.h.bf16 %v7932_v56  ;;  %v5211_v46 = vunpack.i.l.bf16 %v7932_v56  ;;  %v5217_v19 = vunpack.i.h.bf16 %v8033_v22  ;;  %v5216_v8 = vunpack.i.l.bf16 %v8033_v22 }
 0x2bf   : > { %2289 = vst.msk [vmem:[#allocation3 + $0x170] sm:$0xff] %vm1880_vm4, %v2184_v61  ;;  %v5205_v5 = vpop.permute.xlu1 %5204  ;;  %v8086_v41 = vsel %vm644_vm2, %v2471_v30, %v2473_v59  ;;  %v1811_v16 = vsel %vm1781_vm8, %v1778_v25, %v5202_v23  ;;  %v1810_v21 = vsel %vm1781_vm8, %v1777_v6, %v5201_v53  ;;  %v8096_v56 = vsel %vm644_vm2, %v2470_v48, %v2471_v30  ;;  %v2347_v59 = vld [vmem:[#allocation3 + $0x178] sm:$0xff]  ;;  %v8117_v61 = vld [vmem:[#allocation3 + $0x168] sm:$0xff] }
 0x2c0   : > { %v5207_v27 = vunpack.i.h.bf16 %v5205_v5  ;;  %v5206_v38 = vunpack.i.l.bf16 %v5205_v5  ;;  %v2066_v58 = vpop.f32.mrf.mxu0  ;;  %v8102_v22 = vpack.i.bf16 %v8086_v41, %v8096_v56  ;;  %v2606_v6 = vrot.slane %v2347_v59, 1 }
 0x2c1   : > { %v2117_v24 = vmul.f32 %v7846_v52, %v2066_v58  ;;  %5434 = vrot.lane.b32.xlu2 %v7936_v18, %s5809_s12  ;;  %v8111_v18 = vpack.i.bf16 %v7946_v36, %v7940_v9  ;;  %v5227_v58 = vunpack.i.h.bf16 %v7966_v45 }
 0x2c2   : > { %v1844_v62 = vsel %vm1814_vm9, %v1811_v16, %v5207_v27  ;;  %v1843_v14 = vsel %vm1814_vm9, %v1810_v21, %v5206_v38  ;;  %v2603_v27 = vrot.slane %v8117_v61, 1  ;;  %v5226_v16 = vunpack.i.l.bf16 %v7966_v45 }
 0x2c3   : > { %v1877_v57 = vsel %vm1847_vm10, %v1844_v62, %v5212_v26  ;;  %v1876_v29 = vsel %vm1847_vm10, %v1843_v14, %v5211_v46  ;;  %v2153_v0 = vadd.f32 %v7867_v34, %v2117_v24  ;;  %v8107_v23 = vpop.permute.xlu2 %5269  ;;  %v9736_v26 = vld [vmem:[#allocation50_spill] sm:$0xff]  ;;  %v5232_v14 = vunpack.i.h.bf16 %v8080_v11 }
 0x2c4   : > { %5454 = vrot.lane.b32.xlu0 %v8102_v22, %s5811_s13  ;;  %v1909_v48 = vsel %vm1880_vm4, %v1876_v29, %v5216_v8  ;;  %v1910_v53 = vsel %vm1880_vm4, %v1877_v57, %v5217_v19  ;;  %v4647_v46 = vunpack.i.h.bf16 %v9736_v26  ;;  %v4646_v9 = vunpack.i.l.bf16 %v9736_v26  ;;  %v5709_v29 = vld [vmem:[#allocation3 + $0x50] sm:$0xff] }
 0x2c5   : > { %v2185_v30 = vmax.f32 %v2153_v0, 0.0  ;;  %5429 = vrot.lane.b32.xlu1 %v8111_v18, %s5810_s24  ;;  %v1927_v25 = vpack.c.bf16 %v1910_v53, %v1909_v48  ;;  %v8131_v19 = vpack.i.bf16 %v7963_v2, %v7960_v32  ;;  %v5231_v57 = vunpack.i.l.bf16 %v8080_v11  ;;  %v5710_v0 = vld [vmem:[#allocation3 + $0x48] sm:$0xff] }
 0x2c6   : > { %v8123_v36 = vpop.permute.xlu0 %5244  ;;  %v8125_v5 = vld [vmem:[#allocation3 + $0x170] sm:$0xff] }
 0x2c7   : > { %2290 = vst.msk [vmem:[#allocation3 + $0x188] sm:$0xff] %vm1880_vm4, %v2185_v30  ;;  %v5220_v8 = vpop.permute.xlu1 %5219  ;;  %4395 = vmatmul.msk.bf16.gmra.mxu0 %vm1949_vm11, %v1927_v25  ;;  %v2604_v38 = vrot.slane %v8125_v5, 1  ;;  %v2344_v30 = vld [vmem:[#allocation3 + $0x160] sm:$0xff]  ;;  %v2478_v11 = vrot.slane %v8125_v5, 7 }
 0x2c8   : > { %v5222_v21 = vunpack.i.h.bf16 %v5220_v8  ;;  %v5221_v24 = vunpack.i.l.bf16 %v5220_v8  ;;  %v2068_v62 = vpop.f32.mrf.mxu0 }
 0x2c9   : > { %v2118_v59 = vmul.f32 %v7846_v52, %v2068_v62  ;;  %5449 = vrot.lane.b32.xlu2 %v8131_v19, %s5809_s12  ;;  %v8142_v32 = vsel %vm773_vm1, %v2603_v27, %v2604_v38  ;;  %v8145_v2 = vsel %vm773_vm1, %v2604_v38, %v2606_v6  ;;  %v2475_v62 = vrot.slane %v2344_v30, 7 }
 0x2ca   : > { %v3365_v45 = vsel %vm1880_vm4, %v5709_v29, %v5222_v21  ;;  %v3364_v48 = vsel %vm1880_vm4, %v5710_v0, %v5221_v24  ;;  %v3487_v53 = vpack.c.bf16 %v8145_v2, %v8142_v32  ;;  %v9738_v29 = vld [vmem:[#allocation40_spill] sm:$0xff] }
 0x2cb   : > { %v2154_v25 = vadd.f32 %v7867_v34, %v2118_v59  ;;  %v8153_v26 = vpop.permute.xlu2 %5284  ;;  %v3396_v8 = vsel %vm3296_vm12, %v3364_v48, %v5226_v16  ;;  %v3397_v6 = vsel %vm3296_vm12, %v3365_v45, %v5227_v58  ;;  %v2476_v16 = vrot.slane %v8117_v61, 7  ;;  %v9737_v58 = vld [vmem:[#allocation41_spill] sm:$0xff]  ;;  %v9739_v45 = vld [vmem:[#allocation51_spill] sm:$0xff] }
 0x2cc   : > { %5469 = vrot.lane.b32.xlu0 %v8037_v35, %s5811_s13  ;;  %v3428_v27 = vsel %vm3329_vm13, %v3396_v8, %v5231_v57  ;;  %v3429_v38 = vsel %vm3329_vm13, %v3397_v6, %v5232_v14  ;;  %4478 = vmatmul.msk.bf16.gmra.mxu3 %vm1880_vm4, %v3487_v53  ;;  %v1681_v59 = vsel %vm386_vm0, %v9737_v58, %v4647_v46  ;;  %v4727_v57 = vunpack.i.h.bf16 %v9739_v45  ;;  %v9740_v48 = vld [vmem:[#allocation53_spill] sm:$0xff] }
 0x2cd   : > { %v2186_v21 = vmax.f32 %v2154_v25, 0.0  ;;  %5444 = vrot.lane.b32.xlu1 %v7929_v7, %s5810_s24  ;;  %v3462_v24 = vpack.c.bf16 %v3429_v38, %v3428_v27  ;;  %v1680_v35 = vsel %vm386_vm0, %v9738_v29, %v4646_v9  ;;  %v4726_v14 = vunpack.i.l.bf16 %v9739_v45  ;;  %v2351_v45 = vld [vmem:[#allocation3 + $0x198] sm:$0xff] }
 0x2ce   : > { %v8171_v0 = vpop.permute.xlu0 %5259  ;;  %v4807_v7 = vunpack.i.h.bf16 %v9740_v48  ;;  %v8177_v30 = vsel %vm644_vm2, %v2476_v16, %v2478_v11  ;;  %v4806_v46 = vunpack.i.l.bf16 %v9740_v48  ;;  %v5242_v25 = vunpack.i.h.bf16 %v8012_v15 }
 0x2cf   : > { %2291 = vst.msk [vmem:[#allocation3 + $0x190] sm:$0xff] %vm1880_vm4, %v2186_v21  ;;  %v5235_v53 = vpop.permute.xlu1 %5234  ;;  %3800 = vmatmul.bf16.gmra.mxu2 %v3462_v24  ;;  %v5241_v27 = vunpack.i.l.bf16 %v8012_v15  ;;  %v5247_v38 = vunpack.i.h.bf16 %v8123_v36  ;;  %v8187_v21 = vsel %vm644_vm2, %v2475_v62, %v2476_v16  ;;  %v5246_v11 = vunpack.i.l.bf16 %v8123_v36  ;;  %v9741_v62 = vld [vmem:[#allocation61_spill] sm:$0xff] }
 0x2d0   : > { %v5237_v9 = vunpack.i.h.bf16 %v5235_v53  ;;  %v5236_v8 = vunpack.i.l.bf16 %v5235_v53  ;;  %v2071_v6 = vpop.f32.mrf.mxu0  ;;  %v8196_v15 = vpack.i.bf16 %v8177_v30, %v8187_v21  ;;  %v4887_v16 = vunpack.i.h.bf16 %v9741_v62 }
 0x2d1   : > { %v2119_v58 = vmul.f32 %v7846_v52, %v2071_v6  ;;  %5464 = vrot.lane.b32.xlu2 %v7993_v28, %s5809_s12  ;;  %v8203_v28 = vpack.i.bf16 %v8039_v60, %v8024_v10  ;;  %v8213_v6 = vld [vmem:[#allocation3 + $0x188] sm:$0xff]  ;;  %v1714_v10 = vsel %vm1682_vm6, %v1681_v59, %v4727_v57  ;;  %v8228_v59 = vpack.i.bf16 %v8056_v54, %v8053_v42  ;;  %v2348_v54 = vld [vmem:[#allocation3 + $0x180] sm:$0xff] }
 0x2d2   : > { %v3267_v24 = vsel %vm1880_vm4, %v7501_v51, %v5237_v9  ;;  %v3266_v29 = vsel %vm1880_vm4, %v7509_v17, %v5236_v8  ;;  %v4886_v17 = vunpack.i.l.bf16 %v9741_v62  ;;  %v2608_v57 = vrot.slane %v8213_v6, 1 }
 0x2d3   : > { %v2155_v48 = vadd.f32 %v7867_v34, %v2119_v58  ;;  %v8199_v53 = vpop.permute.xlu2 %5299  ;;  %v3299_v36 = vsel %vm3296_vm12, %v3266_v29, %v5241_v27  ;;  %v3300_v51 = vsel %vm3296_vm12, %v3267_v24, %v5242_v25  ;;  %v2611_v27 = vrot.slane %v2351_v45, 1 }
 0x2d4   : > { %5484 = vrot.lane.b32.xlu0 %v8196_v15, %s5811_s13  ;;  %v3332_v9 = vsel %vm3329_vm13, %v3299_v36, %v5246_v11  ;;  %v3333_v8 = vsel %vm3329_vm13, %v3300_v51, %v5247_v38  ;;  %v1713_v58 = vsel %vm1682_vm6, %v1680_v35, %v4726_v14  ;;  %v1747_v24 = vsel %vm1715_vm5, %v1714_v10, %v4807_v7 }
 0x2d5   : > { %v2187_v60 = vmax.f32 %v2155_v48, 0.0  ;;  %5459 = vrot.lane.b32.xlu1 %v8203_v28, %s5810_s24  ;;  %v3461_v25 = vpack.c.bf16 %v3333_v8, %v3332_v9  ;;  %v1746_v38 = vsel %vm1715_vm5, %v1713_v58, %v4806_v46  ;;  %v1780_v7 = vsel %vm1748_vm7, %v1747_v24, %v4887_v16 }
 0x2d6   : > { %v8220_v29 = vpop.permute.xlu0 %5274  ;;  %v8222_v62 = vld [vmem:[#allocation3 + $0x190] sm:$0xff]  ;;  %v1779_v14 = vsel %vm1748_vm7, %v1746_v38, %v4886_v17  ;;  %v5257_v9 = vunpack.i.h.bf16 %v8063_v40  ;;  %v5256_v17 = vunpack.i.l.bf16 %v8063_v40  ;;  %v5262_v24 = vunpack.i.h.bf16 %v8171_v0 }
 0x2d7   : > { %2292 = vst.msk [vmem:[#allocation3 + $0x1a8] sm:$0xff] %vm1880_vm4, %v2187_v60  ;;  %v5250_v11 = vpop.permute.xlu1 %5249  ;;  %3711 = vmatmul.bf16.gmra.mxu1 %v3461_v25  ;;  %v2609_v35 = vrot.slane %v8222_v62, 1  ;;  %v2483_v58 = vrot.slane %v8222_v62, 7  ;;  %v5261_v40 = vunpack.i.l.bf16 %v8171_v0 }
 0x2d8   : > { %v5252_v45 = vunpack.i.h.bf16 %v5250_v11  ;;  %v5251_v48 = vunpack.i.l.bf16 %v5250_v11  ;;  %v2073_v36 = vpop.f32.mrf.mxu0  ;;  %v2481_v11 = vrot.slane %v8213_v6, 7 }
 0x2d9   : > { %v2120_v46 = vmul.f32 %v7846_v52, %v2073_v36  ;;  %5479 = vrot.lane.b32.xlu2 %v8228_v59, %s5809_s12  ;;  %v8238_v51 = vsel %vm773_vm1, %v2608_v57, %v2609_v35  ;;  %v8241_v42 = vsel %vm773_vm1, %v2609_v35, %v2611_v27  ;;  %v2480_v27 = vrot.slane %v2348_v54, 7 }
 0x2da   : > { %v3490_v16 = vpack.c.bf16 %v8241_v42, %v8238_v51  ;;  %v1813_v8 = vsel %vm1781_vm8, %v1780_v7, %v5252_v45  ;;  %v1812_v10 = vsel %vm1781_vm8, %v1779_v14, %v5251_v48  ;;  %v8267_v7 = vsel %vm644_vm2, %v2481_v11, %v2483_v58 }
 0x2db   : > { %v2156_v60 = vadd.f32 %v7867_v34, %v2120_v46  ;;  %v8250_v25 = vpop.permute.xlu2 %5314  ;;  %v1845_v57 = vsel %vm1814_vm9, %v1812_v10, %v5256_v17  ;;  %v1846_v35 = vsel %vm1814_vm9, %v1813_v8, %v5257_v9  ;;  %v8275_v54 = vsel %vm644_vm2, %v2480_v27, %v2481_v11  ;;  %v2355_v8 = vld [vmem:[#allocation3 + $0x1b8] sm:$0xff] }
 0x2dc   : > { %5499 = vrot.lane.b32.xlu0 %v8131_v19, %s5811_s13  ;;  %4479 = vmatmul.msk.bf16.gmra.mxu3 %vm1880_vm4, %v3490_v16  ;;  %v1879_v36 = vsel %vm1847_vm10, %v1846_v35, %v5262_v24  ;;  %v8281_v16 = vpack.i.bf16 %v8267_v7, %v8275_v54  ;;  %v5271_v10 = vunpack.i.l.bf16 %v8107_v23  ;;  %v5272_v27 = vunpack.i.h.bf16 %v8107_v23  ;;  %v5711_v23 = vld [vmem:[#allocation3 + $0x68] sm:$0xff] }
 0x2dd   : > { %v2188_v38 = vmax.f32 %v2156_v60, 0.0  ;;  %5474 = vrot.lane.b32.xlu1 %v8006_v1, %s5810_s24  ;;  %v1878_v1 = vsel %vm1847_vm10, %v1845_v57, %v5261_v40  ;;  %v5276_v40 = vunpack.i.l.bf16 %v8220_v29  ;;  %v5277_v11 = vunpack.i.h.bf16 %v8220_v29 }
 0x2de   : > { %v8263_v14 = vpop.permute.xlu0 %5289  ;;  %v2616_v35 = vrot.slane %v2355_v8, 1  ;;  %v8309_v29 = vpack.i.bf16 %v8145_v2, %v8142_v32 }
 0x2df   : > { %2293 = vst.msk [vmem:[#allocation3 + $0x1b0] sm:$0xff] %vm1880_vm4, %v2188_v38  ;;  %v5265_v19 = vpop.permute.xlu1 %5264  ;;  %v8295_v38 = vld [vmem:[#allocation3 + $0x1a8] sm:$0xff] }
 0x2e0   : > { %v5267_v0 = vunpack.i.h.bf16 %v5265_v19  ;;  %v5266_v45 = vunpack.i.l.bf16 %v5265_v19  ;;  %v2076_v48 = vpop.f32.mrf.mxu0  ;;  %v3366_v19 = vsel %vm1880_vm4, %v5711_v23, %v5271_v10 }
 0x2e1   : > { %v2121_v46 = vmul.f32 %v7846_v52, %v2076_v48  ;;  %5494 = vrot.lane.b32.xlu2 %v8111_v18, %s5809_s12  ;;  %v8289_v18 = vpack.i.bf16 %v8125_v5, %v8117_v61  ;;  %v3398_v8 = vsel %vm3296_vm12, %v3366_v19, %v5276_v40 }
 0x2e2   : > { %v1911_v9 = vsel %vm1880_vm4, %v1878_v1, %v5266_v45  ;;  %v1912_v17 = vsel %vm1880_vm4, %v1879_v36, %v5267_v0  ;;  %v2613_v45 = vrot.slane %v8295_v38, 1  ;;  %v5712_v1 = vld [vmem:[#allocation3 + $0x70] sm:$0xff] }
 0x2e3   : > { %v1928_v60 = vpack.c.bf16 %v1912_v17, %v1911_v9  ;;  %v2157_v58 = vadd.f32 %v7867_v34, %v2121_v46  ;;  %v8285_v24 = vpop.permute.xlu2 %5329  ;;  %v3367_v36 = vsel %vm1880_vm4, %v5712_v1, %v5272_v27  ;;  %v5287_v1 = vunpack.i.h.bf16 %v8153_v26 }
 0x2e4   : > { %5514 = vrot.lane.b32.xlu0 %v8281_v16, %s5811_s13  ;;  %v3399_v32 = vsel %vm3296_vm12, %v3367_v36, %v5277_v11  ;;  %v5286_v11 = vunpack.i.l.bf16 %v8153_v26 }
 0x2e5   : > { %v2189_v57 = vmax.f32 %v2157_v58, 0.0  ;;  %4396 = vmatmul.msk.bf16.gmra.mxu0 %vm1949_vm11, %v1928_v60  ;;  %5489 = vrot.lane.b32.xlu1 %v8289_v18, %s5810_s24  ;;  %v2352_v58 = vld [vmem:[#allocation3 + $0x1a0] sm:$0xff] }
 0x2e6   : > { %v8301_v61 = vpop.permute.xlu0 %5304  ;;  %v8303_v5 = vld [vmem:[#allocation3 + $0x1b0] sm:$0xff] }
 0x2e7   : > { %2294 = vst.msk [vmem:[#allocation3 + $0x1c8] sm:$0xff] %vm1880_vm4, %v2189_v57  ;;  %v5280_v0 = vpop.permute.xlu1 %5279  ;;  %v2614_v48 = vrot.slane %v8303_v5, 1  ;;  %v2488_v19 = vrot.slane %v8303_v5, 7 }
 0x2e8   : > { %v5282_v46 = vunpack.i.h.bf16 %v5280_v0  ;;  %v5281_v9 = vunpack.i.l.bf16 %v5280_v0  ;;  %v2078_v17 = vpop.f32.mrf.mxu0 }
 0x2e9   : > { %v2122_v10 = vmul.f32 %v7846_v52, %v2078_v17  ;;  %5509 = vrot.lane.b32.xlu2 %v8309_v29, %s5809_s12  ;;  %v2615_v2 = vsel %vm773_vm1, %v2613_v45, %v2614_v48  ;;  %v2617_v60 = vsel %vm773_vm1, %v2614_v48, %v2616_v35  ;;  %v5292_v45 = vunpack.i.h.bf16 %v8263_v14 }
 0x2ea   : > { %v3430_v57 = vsel %vm3329_vm13, %v3398_v8, %v5281_v9  ;;  %v3431_v27 = vsel %vm3329_vm13, %v3399_v32, %v5282_v46  ;;  %v3493_v23 = vpack.c.bf16 %v2617_v60, %v2615_v2  ;;  %v2485_v35 = vrot.slane %v2352_v58, 7 }
 0x2eb   : > { %v2158_v0 = vadd.f32 %v7867_v34, %v2122_v10  ;;  %v8324_v40 = vpop.permute.xlu2 %5344  ;;  %v3465_v52 = vpack.c.bf16 %v3431_v27, %v3430_v57  ;;  %v5291_v48 = vunpack.i.l.bf16 %v8263_v14  ;;  %v2486_v34 = vrot.slane %v8295_v38, 7 }
 0x2ec   : > { %5529 = vrot.lane.b32.xlu0 %v8228_v59, %s5811_s13  ;;  %v8336_v46 = vpack.i.bf16 %v2617_v60, %v2615_v2  ;;  %4480 = vmatmul.msk.bf16.gmra.mxu3 %vm1880_vm4, %v3493_v23  ;;  %v3269_v14 = vsel %vm1880_vm4, %v7480_v47, %v5287_v1  ;;  %v8368_v23 = vpop.f32.mrf.mxu3  ;;  %v5307_v1 = vunpack.i.h.bf16 %v8301_v61 }
 0x2ed   : > { %v2190_v36 = vmax.f32 %v2158_v0, 0.0  ;;  %3805 = vmatmul.bf16.gmra.mxu2 %v3465_v52  ;;  %5504 = vrot.lane.b32.xlu1 %v8102_v22, %s5810_s24  ;;  %v8343_v59 = vsel %vm644_vm2, %v2486_v34, %v2488_v19  ;;  %v3268_v22 = vsel %vm1880_vm4, %v7464_v43, %v5286_v11  ;;  %v3302_v32 = vsel %vm3296_vm12, %v3269_v14, %v5292_v45  ;;  %v2359_v43 = vld [vmem:[#allocation3 + $0x1d8] sm:$0xff] }
 0x2ee   : > { %v8339_v26 = vpop.permute.xlu0 %5319  ;;  %v3301_v10 = vsel %vm3296_vm12, %v3268_v22, %v5291_v48  ;;  %v8354_v2 = vsel %vm644_vm2, %v2485_v35, %v2486_v34  ;;  %v5302_v0 = vunpack.i.h.bf16 %v8199_v53  ;;  %v5301_v52 = vunpack.i.l.bf16 %v8199_v53  ;;  %v8374_v19 = vld [vmem:[#allocation3 + $0x1c8] sm:$0xff]  ;;  %v5713_v34 = vld [vmem:[#allocation3 + $0x90] sm:$0xff] }
 0x2ef   : > { %2295 = vst.msk [vmem:[#allocation3 + $0x1d0] sm:$0xff] %vm1880_vm4, %v2190_v36  ;;  %v5295_v9 = vpop.permute.xlu1 %5294  ;;  %v8360_v47 = vpack.i.bf16 %v8343_v59, %v8354_v2  ;;  %v5306_v11 = vunpack.i.l.bf16 %v8301_v61  ;;  %v8386_v53 = vpack.i.bf16 %v8241_v42, %v8238_v51  ;;  %v2618_v48 = vrot.slane %v8374_v19, 1 }
 0x2f0   : > { %v5297_v17 = vunpack.i.h.bf16 %v5295_v9  ;;  %v5296_v8 = vunpack.i.l.bf16 %v5295_v9  ;;  %v3369_v61 = vsel %vm1880_vm4, %v5713_v34, %v5302_v0  ;;  %v5714_v9 = vld [vmem:[#allocation3 + $0x88] sm:$0xff]  ;;  %v2491_v34 = vrot.slane %v8374_v19, 7 }
 0x2f1   : > { %5524 = vrot.lane.b32.xlu2 %v8203_v28, %s5809_s12  ;;  %v8366_v28 = vpack.i.bf16 %v8222_v62, %v8213_v6  ;;  %v2621_v6 = vrot.slane %v2359_v43, 1  ;;  %v3368_v14 = vsel %vm1880_vm4, %v5714_v9, %v5301_v52  ;;  %v3401_v51 = vsel %vm3296_vm12, %v3369_v61, %v5307_v1  ;;  %v2356_v43 = vld [vmem:[#allocation3 + $0x1c0] sm:$0xff] }
 0x2f2   : > { %v3334_v60 = vsel %vm3329_vm13, %v3301_v10, %v5296_v8  ;;  %v3335_v58 = vsel %vm3329_vm13, %v3302_v32, %v5297_v17  ;;  %v3400_v8 = vsel %vm3296_vm12, %v3368_v14, %v5306_v11  ;;  %v5317_v52 = vunpack.i.h.bf16 %v8250_v25 }
 0x2f3   : > { %v8362_v57 = vpop.permute.xlu2 %5359  ;;  %v3464_v27 = vpack.c.bf16 %v3335_v58, %v3334_v60  ;;  %v5322_v11 = vunpack.i.h.bf16 %v8339_v26 }
 0x2f4   : > { %5544 = vrot.lane.b32.xlu0 %v8360_v47, %s5811_s13  ;;  %v8414_v61 = vpop.f32.mrf.mxu3 }
 0x2f5   : > { %3716 = vmatmul.bf16.gmra.mxu1 %v3464_v27  ;;  %5519 = vrot.lane.b32.xlu1 %v8366_v28, %s5810_s24 }
 0x2f6   : > { %v8380_v62 = vpop.permute.xlu0 %5334  ;;  %v8382_v45 = vld [vmem:[#allocation3 + $0x1d0] sm:$0xff] }
 0x2f7   : > { %v5310_v35 = vpop.permute.xlu1 %5309  ;;  %v2619_v36 = vrot.slane %v8382_v45, 1  ;;  %v2493_v0 = vrot.slane %v8382_v45, 7 }
 0x2f8   : > { %v5312_v22 = vunpack.i.h.bf16 %v5310_v35  ;;  %v5311_v17 = vunpack.i.l.bf16 %v5310_v35  ;;  %v5316_v35 = vunpack.i.l.bf16 %v8250_v25 }
 0x2f9   : > { %5539 = vrot.lane.b32.xlu2 %v8386_v53, %s5809_s12  ;;  %v2620_v42 = vsel %vm773_vm1, %v2618_v48, %v2619_v36  ;;  %v2622_v10 = vsel %vm773_vm1, %v2619_v36, %v2621_v6  ;;  %v5321_v6 = vunpack.i.l.bf16 %v8339_v26  ;;  %v2490_v36 = vrot.slane %v2356_v43, 7 }
 0x2fa   : > { %v3432_v32 = vsel %vm3329_vm13, %v3400_v8, %v5311_v17  ;;  %v3433_v60 = vsel %vm3329_vm13, %v3401_v51, %v5312_v22  ;;  %v3496_v58 = vpack.c.bf16 %v2622_v10, %v2620_v42  ;;  %v8405_v1 = vpack.i.bf16 %v2622_v10, %v2620_v42 }
 0x2fb   : > { %v3468_v27 = vpack.c.bf16 %v3433_v60, %v3432_v32  ;;  %v8409_v48 = vpop.permute.xlu2 %5374  ;;  %v8418_v9 = vsel %vm644_vm2, %v2491_v34, %v2493_v0  ;;  %v3271_v26 = vsel %vm1880_vm4, %v7564_v49, %v5317_v52  ;;  %v3270_v14 = vsel %vm1880_vm4, %v7575_v31, %v5316_v35  ;;  %v5716_v35 = vld [vmem:[#allocation3 + $0xa8] sm:$0xff] }
 0x2fc   : > { %5559 = vrot.lane.b32.xlu0 %v8309_v29, %s5811_s13  ;;  %4481 = vmatmul.msk.bf16.gmra.mxu3 %vm1880_vm4, %v3496_v58  ;;  %v3303_v17 = vsel %vm3296_vm12, %v3270_v14, %v5321_v6  ;;  %v3304_v8 = vsel %vm3296_vm12, %v3271_v26, %v5322_v11  ;;  %v8429_v51 = vsel %vm644_vm2, %v2490_v36, %v2491_v34  ;;  %v5331_v60 = vunpack.i.l.bf16 %v8285_v24 }
 0x2fd   : > { %3810 = vmatmul.bf16.gmra.mxu2 %v3468_v27  ;;  %5534 = vrot.lane.b32.xlu1 %v8196_v15, %s5810_s24  ;;  %v8435_v49 = vpack.i.bf16 %v8418_v9, %v8429_v51  ;;  %v8439_v32 = vpack.i.bf16 %v8303_v5, %v8295_v38  ;;  %v5337_v58 = vunpack.i.h.bf16 %v8380_v62  ;;  %v5336_v43 = vunpack.i.l.bf16 %v8380_v62  ;;  %v5715_v5 = vld [vmem:[#allocation3 + $0xb0] sm:$0xff] }
 0x2fe   : > { %v5350_v25 = vpop.permute.xlu0 %5349  ;;  %v5347_v14 = vunpack.i.h.bf16 %v8324_v40 }
 0x2ff   : > { %v5325_v29 = vpop.permute.xlu1 %5324 }
 0x300   : > { %v5327_v22 = vunpack.i.h.bf16 %v5325_v29  ;;  %v5326_v15 = vunpack.i.l.bf16 %v5325_v29 }
 0x301   : > { %5554 = vrot.lane.b32.xlu2 %v8289_v18, %s5809_s12  ;;  %v5332_v18 = vunpack.i.h.bf16 %v8285_v24  ;;  %v3370_v24 = vsel %vm1880_vm4, %v5716_v35, %v5331_v60 }
 0x302   : > { %v3336_v42 = vsel %vm3329_vm13, %v3303_v17, %v5326_v15  ;;  %v3337_v10 = vsel %vm3329_vm13, %v3304_v8, %v5327_v22  ;;  %v3402_v62 = vsel %vm3296_vm12, %v3370_v24, %v5336_v43  ;;  %v5346_v22 = vunpack.i.l.bf16 %v8324_v40  ;;  %v5717_v24 = vld [vmem:[#allocation3 + $0xd0] sm:$0xff] }
 0x303   : > { %v3467_v31 = vpack.c.bf16 %v3337_v10, %v3336_v42  ;;  %v8449_v0 = vpop.permute.xlu2 %5389  ;;  %v3371_v52 = vsel %vm1880_vm4, %v5715_v5, %v5332_v18  ;;  %v5352_v15 = vunpack.i.h.bf16 %v5350_v25  ;;  %v5351_v17 = vunpack.i.l.bf16 %v5350_v25 }
 0x304   : > { %5574 = vrot.lane.b32.xlu0 %v8435_v49, %s5811_s13  ;;  %v3403_v36 = vsel %vm3296_vm12, %v3371_v52, %v5337_v58  ;;  %v3273_v10 = vsel %vm1880_vm4, %v7646_v33, %v5347_v14  ;;  %v8479_v33 = vpack.i.bf16 %v8382_v45, %v8374_v19  ;;  %v5377_v14 = vunpack.i.h.bf16 %v8409_v48 }
 0x305   : > { %3721 = vmatmul.bf16.gmra.mxu1 %v3467_v31  ;;  %5549 = vrot.lane.b32.xlu1 %v8439_v32, %s5810_s24  ;;  %v3272_v31 = vsel %vm1880_vm4, %v7651_v63, %v5346_v22  ;;  %v3306_v25 = vsel %vm3296_vm12, %v3273_v10, %v5352_v15  ;;  %v5362_v63 = vunpack.i.h.bf16 %v8362_v57  ;;  %v5376_v22 = vunpack.i.l.bf16 %v8409_v48 }
 0x306   : > { %v5365_v27 = vpop.permute.xlu0 %5364 }
 0x307   : > { %v5340_v38 = vpop.permute.xlu1 %5339  ;;  %v5367_v5 = vunpack.i.h.bf16 %v5365_v27  ;;  %v5366_v52 = vunpack.i.l.bf16 %v5365_v27 }
 0x308   : > { %v5342_v11 = vunpack.i.h.bf16 %v5340_v38  ;;  %v5341_v6 = vunpack.i.l.bf16 %v5340_v38  ;;  %v5361_v38 = vunpack.i.l.bf16 %v8362_v57 }
 0x309   : > { %5569 = vrot.lane.b32.xlu2 %v8336_v46, %s5809_s12 }
 0x30a   : > { %v3434_v34 = vsel %vm3329_vm13, %v3402_v62, %v5341_v6  ;;  %v3435_v29 = vsel %vm3329_vm13, %v3403_v36, %v5342_v11  ;;  %v3373_v11 = vsel %vm1880_vm4, %v5717_v24, %v5362_v63  ;;  %v5718_v6 = vld [vmem:[#allocation3 + $0xc8] sm:$0xff] }
 0x30b   : > { %v3471_v26 = vpack.c.bf16 %v3435_v29, %v3434_v34  ;;  %v8469_v40 = vpop.permute.xlu2 %5404  ;;  %v3372_v62 = vsel %vm1880_vm4, %v5718_v6, %v5361_v38  ;;  %v3405_v27 = vsel %vm3296_vm12, %v3373_v11, %v5367_v5  ;;  %v5719_v5 = vld [vmem:[#allocation3 + $0xf0] sm:$0xff] }
 0x30c   : > { %5589 = vrot.lane.b32.xlu0 %v8386_v53, %s5811_s13  ;;  %v3305_v53 = vsel %vm3296_vm12, %v3272_v31, %v5351_v17  ;;  %v3404_v57 = vsel %vm3296_vm12, %v3372_v62, %v5366_v52  ;;  %v3275_v31 = vsel %vm1880_vm4, %v7693_v37, %v5377_v14  ;;  %v5391_v37 = vunpack.i.l.bf16 %v8449_v0 }
 0x30d   : > { %3815 = vmatmul.bf16.gmra.mxu2 %v3471_v26  ;;  %5564 = vrot.lane.b32.xlu1 %v8281_v16, %s5810_s24 }
 0x30e   : > { %v5380_v8 = vpop.permute.xlu0 %5379 }
 0x30f   : > { %v5355_v42 = vpop.permute.xlu1 %5354  ;;  %v5382_v15 = vunpack.i.h.bf16 %v5380_v8  ;;  %v5381_v17 = vunpack.i.l.bf16 %v5380_v8 }
 0x310   : > { %v5357_v18 = vunpack.i.h.bf16 %v5355_v42  ;;  %v5356_v60 = vunpack.i.l.bf16 %v5355_v42 }
 0x311   : > { %5584 = vrot.lane.b32.xlu2 %v8366_v28, %s5809_s12  ;;  %v3308_v8 = vsel %vm3296_vm12, %v3275_v31, %v5382_v15 }
 0x312   : > { %v3338_v16 = vsel %vm3329_vm13, %v3305_v53, %v5356_v60  ;;  %v3339_v58 = vsel %vm3329_vm13, %v3306_v25, %v5357_v18  ;;  %v3274_v18 = vsel %vm1880_vm4, %v7699_v3, %v5376_v22 }
 0x313   : > { %v3470_v43 = vpack.c.bf16 %v3339_v58, %v3338_v16  ;;  %v8493_v29 = vpop.permute.xlu2 %5419  ;;  %v3307_v48 = vsel %vm3296_vm12, %v3274_v18, %v5381_v17  ;;  %v5392_v58 = vunpack.i.h.bf16 %v8449_v0 }
 0x315   : > { %3726 = vmatmul.bf16.gmra.mxu1 %v3470_v43  ;;  %5579 = vrot.lane.b32.xlu1 %v8479_v33, %s5810_s24  ;;  %v3375_v52 = vsel %vm1880_vm4, %v5719_v5, %v5392_v58 }
 0x316   : > { %v5395_v28 = vpop.permute.xlu0 %5394 }
 0x317   : > { %v5370_v35 = vpop.permute.xlu1 %5369  ;;  %v5397_v43 = vunpack.i.h.bf16 %v5395_v28  ;;  %v5396_v3 = vunpack.i.l.bf16 %v5395_v28 }
 0x318   : > { %v5372_v19 = vunpack.i.h.bf16 %v5370_v35  ;;  %v5371_v45 = vunpack.i.l.bf16 %v5370_v35  ;;  %v5720_v35 = vld [vmem:[#allocation3 + $0xe8] sm:$0xff] }
 0x319   : > { %5599 = vrot.lane.b32.xlu2 %v8405_v1, %s5809_s12  ;;  %v3374_v24 = vsel %vm1880_vm4, %v5720_v35, %v5391_v37  ;;  %v5722_v37 = vld [vmem:[#allocation3 + $0x108] sm:$0xff] }
 0x31a   : > { %v3436_v36 = vsel %vm3329_vm13, %v3404_v57, %v5371_v45  ;;  %v3437_v34 = vsel %vm3329_vm13, %v3405_v27, %v5372_v19  ;;  %v3406_v62 = vsel %vm3296_vm12, %v3374_v24, %v5396_v3  ;;  %v3407_v19 = vsel %vm3296_vm12, %v3375_v52, %v5397_v43 }
 0x31b   : > { %v3474_v26 = vpack.c.bf16 %v3437_v34, %v3436_v36  ;;  %v8511_v63 = vpop.permute.xlu2 %5434  ;;  %v5407_v57 = vunpack.i.h.bf16 %v8469_v40  ;;  %v5406_v27 = vunpack.i.l.bf16 %v8469_v40 }
 0x31d   : > { %3820 = vmatmul.bf16.gmra.mxu2 %v3474_v26  ;;  %5594 = vrot.lane.b32.xlu1 %v8360_v47, %s5810_s24  ;;  %v3277_v15 = vsel %vm1880_vm4, %v7757_v4, %v5407_v57  ;;  %v3276_v17 = vsel %vm1880_vm4, %v7763_v13, %v5406_v27  ;;  %v8545_v27 = vpop.f32.mrf.mxu3 }
 0x31e   : > { %v5410_v42 = vpop.permute.xlu0 %5409 }
 0x31f   : > { %v5385_v10 = vpop.permute.xlu1 %5384  ;;  %v5412_v36 = vunpack.i.h.bf16 %v5410_v42  ;;  %v5411_v34 = vunpack.i.l.bf16 %v5410_v42 }
 0x320   : > { %v5387_v60 = vunpack.i.h.bf16 %v5385_v10  ;;  %v5386_v53 = vunpack.i.l.bf16 %v5385_v10 }
 0x321   : > { %5614 = vrot.lane.b32.xlu2 %v8439_v32, %s5809_s12  ;;  %v3309_v18 = vsel %vm3296_vm12, %v3276_v17, %v5411_v34 }
 0x322   : > { %v3340_v25 = vsel %vm3329_vm13, %v3307_v48, %v5386_v53  ;;  %v3341_v47 = vsel %vm3329_vm13, %v3308_v8, %v5387_v60  ;;  %v3310_v60 = vsel %vm3296_vm12, %v3277_v15, %v5412_v36  ;;  %v5422_v48 = vunpack.i.h.bf16 %v8493_v29 }
 0x323   : > { %v3473_v16 = vpack.c.bf16 %v3341_v47, %v3340_v25  ;;  %v8521_v14 = vpop.permute.xlu2 %5449  ;;  %v5421_v8 = vunpack.i.l.bf16 %v8493_v29 }
 0x325   : > { %3731 = vmatmul.bf16.gmra.mxu1 %v3473_v16  ;;  %v5721_v16 = vld [vmem:[#allocation3 + $0x110] sm:$0xff]  ;;  %v3376_v43 = vsel %vm1880_vm4, %v5722_v37, %v5421_v8 }
 0x326   : > { %v5425_v38 = vpop.permute.xlu0 %5424  ;;  %v3377_v58 = vsel %vm1880_vm4, %v5721_v16, %v5422_v48  ;;  %v8562_v48 = vld [vmem:[%s9485_s2] ss:$0 sm:$0xff]  ;;  %v5725_v16 = vld [vmem:[#allocation3 + $0x130] sm:$0xff] }
 0x327   : > { %v5400_v32 = vpop.permute.xlu1 %5399  ;;  %v5427_v25 = vunpack.i.h.bf16 %v5425_v38  ;;  %v5426_v4 = vunpack.i.l.bf16 %v5425_v38 }
 0x328   : > { %v5402_v11 = vunpack.i.h.bf16 %v5400_v32  ;;  %v5401_v6 = vunpack.i.l.bf16 %v5400_v32 }
 0x329   : > { %v3408_v52 = vsel %vm3296_vm12, %v3376_v43, %v5426_v4  ;;  %v3409_v35 = vsel %vm3296_vm12, %v3377_v58, %v5427_v25  ;;  %v8570_v4 = vld [vmem:[%s9486_s3] ss:$0 sm:$0xff]  ;;  %v5726_v58 = vld [vmem:[#allocation3 + $0x128] sm:$0xff] }
 0x32a   : > { %v3438_v0 = vsel %vm3329_vm13, %v3406_v62, %v5401_v6  ;;  %v3439_v28 = vsel %vm3329_vm13, %v3407_v19, %v5402_v11  ;;  %v5437_v62 = vunpack.i.h.bf16 %v8511_v63  ;;  %v5436_v19 = vunpack.i.l.bf16 %v8511_v63 }
 0x32b   : > { %v3477_v45 = vpack.c.bf16 %v3439_v28, %v3438_v0  ;;  %v8535_v5 = vpop.permute.xlu2 %5464 }
 0x32c   : > { %v3279_v34 = vsel %vm1880_vm4, %v7841_v39, %v5437_v62  ;;  %v5451_v39 = vunpack.i.l.bf16 %v8521_v14  ;;  %v5467_v62 = vunpack.i.h.bf16 %v8535_v5 }
 0x32d   : > { %3825 = vmatmul.bf16.gmra.mxu2 %v3477_v45 }
 0x32e   : > { %v5440_v26 = vpop.permute.xlu0 %5439  ;;  %v3378_v37 = vsel %vm1880_vm4, %v5726_v58, %v5451_v39 }
 0x32f   : > { %v5415_v22 = vpop.permute.xlu1 %5414  ;;  %v5442_v28 = vunpack.i.h.bf16 %v5440_v26  ;;  %v5441_v45 = vunpack.i.l.bf16 %v5440_v26 }
 0x330   : > { %v5417_v10 = vunpack.i.h.bf16 %v5415_v22  ;;  %v5416_v31 = vunpack.i.l.bf16 %v5415_v22  ;;  %v3278_v22 = vsel %vm1880_vm4, %v7852_v55, %v5436_v19  ;;  %v5466_v19 = vunpack.i.l.bf16 %v8535_v5 }
 0x331   : > { %v3312_v63 = vsel %vm3296_vm12, %v3279_v34, %v5442_v28 }
 0x332   : > { %v3342_v40 = vsel %vm3329_vm13, %v3309_v18, %v5416_v31  ;;  %v3343_v42 = vsel %vm3329_vm13, %v3310_v60, %v5417_v10  ;;  %v3311_v10 = vsel %vm3296_vm12, %v3278_v22, %v5441_v45  ;;  %v3280_v5 = vsel %vm1880_vm4, %v7925_v50, %v5466_v19 }
 0x333   : > { %v3476_v53 = vpack.c.bf16 %v3343_v42, %v3342_v40  ;;  %v8555_v18 = vpop.permute.xlu2 %5479  ;;  %v5452_v40 = vunpack.i.h.bf16 %v8521_v14 }
 0x334   : > { %v5481_v50 = vunpack.i.l.bf16 %v8555_v18 }
 0x335   : > { %3736 = vmatmul.bf16.gmra.mxu1 %v3476_v53 }
 0x336   : > { %v5455_v47 = vpop.permute.xlu0 %5454 }
 0x337   : > { %v5430_v13 = vpop.permute.xlu1 %5429  ;;  %v5457_v53 = vunpack.i.h.bf16 %v5455_v47  ;;  %v5456_v55 = vunpack.i.l.bf16 %v5455_v47  ;;  %v3379_v47 = vsel %vm1880_vm4, %v5725_v16, %v5452_v40 }
 0x338   : > { %v5432_v3 = vunpack.i.h.bf16 %v5430_v13  ;;  %v5431_v32 = vunpack.i.l.bf16 %v5430_v13 }
 0x339   : > { %v3796_v24 = vpop.f32.mrf.mxu2 }
 0x33a   : > { %v3440_v29 = vsel %vm3329_vm13, %v3408_v52, %v5431_v32  ;;  %v3441_v38 = vsel %vm3329_vm13, %v3409_v35, %v5432_v3  ;;  %v8575_v32 = vpop.f32.mrf.mxu3  ;;  %v3410_v35 = vsel %vm3296_vm12, %v3378_v37, %v5456_v55  ;;  %v2363_v37 = vld [vmem:[#allocation3 + $0x1f8] sm:$0xff] }
 0x33b   : > { %v3707_v11 = vpop.f32.mrf.mxu1  ;;  %v3480_v6 = vpack.c.bf16 %v3441_v38, %v3440_v29  ;;  %v3411_v29 = vsel %vm3296_vm12, %v3379_v47, %v5457_v53 }
 0x33c   : > { %v8543_v0 = vadd.f32 %v3796_v24, %v3707_v11 }
 0x33d   : > { %3830 = vmatmul.bf16.gmra.mxu2 %v3480_v6 }
 0x33e   : > { %v5470_v57 = vpop.permute.xlu0 %5469 }
 0x33f   : > { %v5445_v36 = vpop.permute.xlu1 %5444  ;;  %v5472_v34 = vunpack.i.h.bf16 %v5470_v57  ;;  %v5471_v22 = vunpack.i.l.bf16 %v5470_v57 }
 0x340   : > { %v5447_v15 = vunpack.i.h.bf16 %v5445_v36  ;;  %v5446_v17 = vunpack.i.l.bf16 %v5445_v36  ;;  %v8588_v36 = vpop.permute.xlu2 %5494 }
 0x341   : > { %v8581_v11 = vpop.f32.mrf.mxu2  ;;  %v3313_v39 = vsel %vm3296_vm12, %v3280_v5, %v5471_v22  ;;  %v5497_v22 = vunpack.i.h.bf16 %v8588_v36 }
 0x342   : > { %v3344_v31 = vsel %vm3329_vm13, %v3311_v10, %v5446_v17  ;;  %v3345_v26 = vsel %vm3329_vm13, %v3312_v63, %v5447_v15  ;;  %v8602_v55 = vpop.f32.mrf.mxu3 }
 0x343   : > { %v3479_v60 = vpack.c.bf16 %v3345_v26, %v3344_v31  ;;  %v8586_v28 = vpop.f32.mrf.mxu1  ;;  %v3281_v31 = vsel %vm1880_vm4, %v7919_v20, %v5467_v62  ;;  %v5482_v20 = vunpack.i.h.bf16 %v8555_v18 }
 0x344   : > { %v2081_v42 = vpop.f32.mrf.mxu0  ;;  %v3314_v57 = vsel %vm3296_vm12, %v3281_v31, %v5472_v34  ;;  %v2360_v34 = vld [vmem:[#allocation3 + $0x1e0] sm:$0xff] }
 0x345   : > { %v2123_v8 = vmul.f32 %v8562_v48, %v2081_v42  ;;  %3741 = vmatmul.bf16.gmra.mxu1 %v3479_v60 }
 0x346   : > { %v8565_v25 = vpop.permute.xlu0 %5484 }
 0x347   : > { %v2159_v14 = vadd.f32 %v8570_v4, %v2123_v8  ;;  %v5460_v13 = vpop.permute.xlu1 %5459  ;;  %v5487_v16 = vunpack.i.h.bf16 %v8565_v25  ;;  %v5486_v47 = vunpack.i.l.bf16 %v8565_v25 }
 0x348   : > { %v5462_v43 = vunpack.i.h.bf16 %v5460_v13  ;;  %v5461_v3 = vunpack.i.l.bf16 %v5460_v13 }
 0x349   : > { %v2191_v52 = vmax.f32 %v2159_v14, 0.0 }
 0x34a   : > { %v3442_v38 = vsel %vm3329_vm13, %v3410_v35, %v5461_v3  ;;  %v3443_v24 = vsel %vm3329_vm13, %v3411_v29, %v5462_v43  ;;  %v8611_v43 = vpop.permute.xlu2 %5509  ;;  %v5728_v29 = vld [vmem:[#allocation3 + $0x148] sm:$0xff] }
 0x34b   : > { %2296 = vst.msk [vmem:[#allocation3 + $0x1e8] sm:$0xff] %vm1880_vm4, %v2191_v52  ;;  %v3483_v6 = vpack.c.bf16 %v3443_v24, %v3442_v38  ;;  %v5727_v52 = vld [vmem:[#allocation3 + $0x150] sm:$0xff]  ;;  %v3380_v38 = vsel %vm1880_vm4, %v5728_v29, %v5481_v50 }
 0x34c   : > { %v2083_v45 = vpop.f32.mrf.mxu0  ;;  %v3381_v35 = vsel %vm1880_vm4, %v5727_v52, %v5482_v20  ;;  %v3412_v25 = vsel %vm3296_vm12, %v3380_v38, %v5486_v47 }
 0x34d   : > { %v2124_v15 = vmul.f32 %v8562_v48, %v2083_v45  ;;  %3835 = vmatmul.bf16.gmra.mxu2 %v3483_v6  ;;  %v3413_v19 = vsel %vm3296_vm12, %v3381_v35, %v5487_v16  ;;  %v2626_v45 = vrot.slane %v2363_v37, 1  ;;  %v3283_v16 = vsel %vm1880_vm4, %v7988_v44, %v5497_v22 }
 0x34e   : > { %v8591_v17 = vpop.permute.xlu0 %5499  ;;  %v5512_v22 = vunpack.i.h.bf16 %v8611_v43 }
 0x34f   : > { %v2160_v10 = vadd.f32 %v8570_v4, %v2124_v15  ;;  %v5475_v63 = vpop.permute.xlu1 %5474  ;;  %v5496_v15 = vunpack.i.l.bf16 %v8588_v36 }
 0x350   : > { %v5477_v26 = vunpack.i.h.bf16 %v5475_v63  ;;  %v5476_v60 = vunpack.i.l.bf16 %v5475_v63 }
 0x351   : > { %v2192_v40 = vmax.f32 %v2160_v10, 0.0  ;;  %v3282_v47 = vsel %vm1880_vm4, %v8001_v12, %v5496_v15  ;;  %v5511_v15 = vunpack.i.l.bf16 %v8611_v43 }
 0x352   : > { %v3346_v42 = vsel %vm3329_vm13, %v3313_v39, %v5476_v60  ;;  %v3347_v53 = vsel %vm3329_vm13, %v3314_v57, %v5477_v26  ;;  %v3801_v14 = vpop.f32.mrf.mxu2  ;;  %v8617_v62 = vld [vmem:[#allocation3 + $0x1e8] sm:$0xff]  ;;  %v2495_v39 = vrot.slane %v2360_v34, 7  ;;  %v5525_v29 = vpop.permute.xlu2 %5524 }
 0x353   : > { %2297 = vst.msk [vmem:[#allocation3 + $0x1f0] sm:$0xff] %vm1880_vm4, %v2192_v40  ;;  %v3482_v8 = vpack.c.bf16 %v3347_v53, %v3346_v42  ;;  %v2623_v60 = vrot.slane %v8617_v62, 1  ;;  %v2496_v57 = vrot.slane %v8617_v62, 7  ;;  %v8635_v42 = vpop.f32.mrf.mxu3  ;;  %v5502_v53 = vunpack.i.h.bf16 %v8591_v17 }
 0x354   : > { %v3712_v13 = vpop.f32.mrf.mxu1 }
 0x355   : > { %v8609_v58 = vadd.f32 %v3801_v14, %v3712_v13  ;;  %3746 = vmatmul.bf16.gmra.mxu1 %v3482_v8  ;;  %v5501_v8 = vunpack.i.l.bf16 %v8591_v17  ;;  %v8653_v52 = vsel %vm644_vm2, %v2495_v39, %v2496_v57  ;;  %v3316_v38 = vsel %vm3296_vm12, %v3283_v16, %v5502_v53  ;;  %v5730_v53 = vld [vmem:[#allocation3 + $0x168] sm:$0xff] }
 0x356   : > { %v8615_v6 = vpop.permute.xlu0 %5514  ;;  %v3382_v43 = vsel %vm1880_vm4, %v5730_v53, %v5511_v15 }
 0x357   : > { %v5490_v3 = vpop.permute.xlu1 %5489  ;;  %v3315_v12 = vsel %vm3296_vm12, %v3282_v47, %v5501_v8 }
 0x358   : > { %v5492_v18 = vunpack.i.h.bf16 %v5490_v3  ;;  %v5491_v24 = vunpack.i.l.bf16 %v5490_v3 }
 0x35a   : > { %v3444_v10 = vsel %vm3329_vm13, %v3412_v25, %v5491_v24  ;;  %v3445_v63 = vsel %vm3329_vm13, %v3413_v19, %v5492_v18  ;;  %v8625_v31 = vld [vmem:[#allocation3 + $0x1f0] sm:$0xff]  ;;  %v8680_v8 = vpop.f32.mrf.mxu2 }
 0x35b   : > { %v3486_v5 = vpack.c.bf16 %v3445_v63, %v3444_v10  ;;  %v8629_v26 = vpack.i.bf16 %v8625_v31, %v8617_v62  ;;  %v2624_v40 = vrot.slane %v8625_v31, 1  ;;  %v2498_v36 = vrot.slane %v8625_v31, 7 }
 0x35c   : > { %v5517_v10 = vunpack.i.h.bf16 %v8615_v6  ;;  %v5516_v63 = vunpack.i.l.bf16 %v8615_v6 }
 0x35d   : > { %3840 = vmatmul.bf16.gmra.mxu2 %v3486_v5  ;;  %5609 = vrot.lane.b32.xlu1 %v8629_v26, %s5810_s24  ;;  %v2625_v20 = vsel %vm773_vm1, %v2623_v60, %v2624_v40  ;;  %v2627_v50 = vsel %vm773_vm1, %v2624_v40, %v2626_v45  ;;  %v8656_v35 = vsel %vm644_vm2, %v2496_v57, %v2498_v36  ;;  %v8676_v60 = vpop.f32.mrf.mxu3  ;;  %v5729_v57 = vld [vmem:[#allocation3 + $0x170] sm:$0xff] }
 0x35e   : > { %v8643_v14 = vpack.i.bf16 %v2627_v50, %v2625_v20  ;;  %v3499_v13 = vpack.c.bf16 %v2627_v50, %v2625_v20  ;;  %v8660_v44 = vpack.i.bf16 %v8656_v35, %v8653_v52  ;;  %v5530_v18 = vpop.permute.xlu0 %5529  ;;  %v3383_v36 = vsel %vm1880_vm4, %v5729_v57, %v5512_v22 }
 0x35f   : > { %v5505_v37 = vpop.permute.xlu1 %5504  ;;  %v3415_v50 = vsel %vm3296_vm12, %v3383_v36, %v5517_v10 }
 0x360   : > { %v5507_v3 = vunpack.i.h.bf16 %v5505_v37  ;;  %v5506_v17 = vunpack.i.l.bf16 %v5505_v37  ;;  %5629 = vrot.lane.b32.xlu2 %v8643_v14, %s5809_s12  ;;  %4482 = vmatmul.msk.bf16.gmra.mxu3 %vm1880_vm4, %v3499_v13  ;;  %v8687_v13 = vpop.f32.mrf.mxu1 }
 0x361   : > { %5604 = vrot.lane.b32.xlu0 %v8660_v44, %s5811_s13 }
 0x362   : > { %v2086_v24 = vpop.f32.mrf.mxu0  ;;  %v3348_v25 = vsel %vm3329_vm13, %v3315_v12, %v5506_v17  ;;  %v3349_v19 = vsel %vm3329_vm13, %v3316_v38, %v5507_v3  ;;  %v5540_v3 = vpop.permute.xlu2 %5539  ;;  %v5527_v12 = vunpack.i.h.bf16 %v5525_v29  ;;  %v5526_v38 = vunpack.i.l.bf16 %v5525_v29 }
 0x363   : > { %v2125_v45 = vmul.f32 %v8562_v48, %v2086_v24  ;;  %v3485_v34 = vpack.c.bf16 %v3349_v19, %v3348_v25  ;;  %v5532_v25 = vunpack.i.h.bf16 %v5530_v18  ;;  %v5531_v19 = vunpack.i.l.bf16 %v5530_v18 }
 0x364   : > { %v3285_v15 = vsel %vm1880_vm4, %v8086_v41, %v5527_v12  ;;  %v3284_v10 = vsel %vm1880_vm4, %v8096_v56, %v5526_v38  ;;  %v5542_v41 = vunpack.i.h.bf16 %v5540_v3  ;;  %v5541_v57 = vunpack.i.l.bf16 %v5540_v3 }
 0x365   : > { %v2161_v5 = vadd.f32 %v8570_v4, %v2125_v45  ;;  %3751 = vmatmul.bf16.gmra.mxu1 %v3485_v34  ;;  %5624 = vrot.lane.b32.xlu1 %v8435_v49, %s5810_s24  ;;  %v3414_v49 = vsel %vm3296_vm12, %v3382_v43, %v5516_v63  ;;  %v3317_v29 = vsel %vm3296_vm12, %v3284_v10, %v5531_v19  ;;  %v2364_v43 = vld [vmem:[#allocation3 + $0x200] sm:$0xff] }
 0x366   : > { %v5545_v24 = vpop.permute.xlu0 %5544  ;;  %v2631_v3 = vrot.slane %v2364_v43, 7 }
 0x367   : > { %v2193_v40 = vmax.f32 %v2161_v5, 0.0  ;;  %v5520_v39 = vpop.permute.xlu1 %5519  ;;  %v8699_v5 = vpop.f32.mrf.mxu3  ;;  %v5546_v53 = vunpack.i.l.bf16 %v5545_v24 }
 0x368   : > { %v5522_v20 = vunpack.i.h.bf16 %v5520_v39  ;;  %v5521_v6 = vunpack.i.l.bf16 %v5520_v39  ;;  %5644 = vrot.lane.b32.xlu2 %v8479_v33, %s5809_s12 }
 0x369   : > { %2298 = vst.msk [vmem:[#allocation3 + $0x208] sm:$0xff] %vm1880_vm4, %v2193_v40  ;;  %5619 = vrot.lane.b32.xlu0 %v8336_v46, %s5811_s13 }
 0x36a   : > { %v2088_v16 = vpop.f32.mrf.mxu0  ;;  %v3446_v47 = vsel %vm3329_vm13, %v3414_v49, %v5521_v6  ;;  %v3447_v37 = vsel %vm3329_vm13, %v3415_v50, %v5522_v20  ;;  %v5555_v20 = vpop.permute.xlu2 %5554  ;;  %v5547_v6 = vunpack.i.h.bf16 %v5545_v24  ;;  %v2367_v49 = vld [vmem:[#allocation3 + $0x218] sm:$0xff] }
 0x36b   : > { %v2126_v17 = vmul.f32 %v8562_v48, %v2088_v16  ;;  %v3489_v33 = vpack.c.bf16 %v3447_v37, %v3446_v47  ;;  %v5731_v47 = vld [vmem:[#allocation3 + $0x190] sm:$0xff] }
 0x36c   : > { %v3385_v37 = vsel %vm1880_vm4, %v5731_v47, %v5542_v41  ;;  %v5557_v41 = vunpack.i.h.bf16 %v5555_v20 }
 0x36d   : > { %v2162_v45 = vadd.f32 %v8570_v4, %v2126_v17  ;;  %3845 = vmatmul.bf16.gmra.mxu2 %v3489_v33  ;;  %v3318_v4 = vsel %vm3296_vm12, %v3285_v15, %v5532_v25  ;;  %v5732_v17 = vld [vmem:[#allocation3 + $0x188] sm:$0xff]  ;;  %v3417_v15 = vsel %vm3296_vm12, %v3385_v37, %v5547_v6 }
 0x36e   : > { %v5560_v50 = vpop.permute.xlu0 %5559  ;;  %v3384_v33 = vsel %vm1880_vm4, %v5732_v17, %v5541_v57  ;;  %v5556_v57 = vunpack.i.l.bf16 %v5555_v20 }
 0x36f   : > { %v2194_v34 = vmax.f32 %v2162_v45, 0.0  ;;  %v5535_v22 = vpop.permute.xlu1 %5534  ;;  %v3416_v24 = vsel %vm3296_vm12, %v3384_v33, %v5546_v53  ;;  %v5562_v43 = vunpack.i.h.bf16 %v5560_v50  ;;  %v5561_v6 = vunpack.i.l.bf16 %v5560_v50 }
 0x370   : > { %v5537_v46 = vunpack.i.h.bf16 %v5535_v22  ;;  %v5536_v63 = vunpack.i.l.bf16 %v5535_v22  ;;  %v3806_v48 = vpop.f32.mrf.mxu2  ;;  %v8708_v16 = vld [vmem:[#allocation3 + $0x208] sm:$0xff]  ;;  %v3286_v50 = vsel %vm1880_vm4, %v8187_v21, %v5556_v57 }
 0x371   : > { %2299 = vst.msk [vmem:[#allocation3 + $0x210] sm:$0xff] %vm1880_vm4, %v2194_v34  ;;  %v2640_v34 = vrot.slane %v2367_v49, 1  ;;  %v2637_v10 = vrot.slane %v8708_v16, 1 }
 0x372   : > { %v3717_v18 = vpop.f32.mrf.mxu1  ;;  %v3350_v40 = vsel %vm3329_vm13, %v3317_v29, %v5536_v63  ;;  %v3351_v39 = vsel %vm3329_vm13, %v3318_v4, %v5537_v46  ;;  %v2632_v46 = vrot.slane %v8708_v16, 7  ;;  %v5570_v33 = vpop.permute.xlu2 %5569 }
 0x373   : > { %v8706_v36 = vadd.f32 %v3806_v48, %v3717_v18  ;;  %v3488_v56 = vpack.c.bf16 %v3351_v39, %v3350_v40  ;;  %v8728_v40 = vpop.f32.mrf.mxu3 }
 0x374   : > { %v2633_v37 = vsel %vm644_vm2, %v2631_v3, %v2632_v46 }
 0x375   : > { %3756 = vmatmul.bf16.gmra.mxu1 %v3488_v56 }
 0x377   : > { %v5550_v12 = vpop.permute.xlu1 %5549 }
 0x378   : > { %v5552_v38 = vunpack.i.h.bf16 %v5550_v12  ;;  %v5551_v25 = vunpack.i.l.bf16 %v5550_v12  ;;  %v8712_v19 = vpop.f32.mrf.mxu2  ;;  %v8714_v45 = vld [vmem:[#allocation3 + $0x210] sm:$0xff] }
 0x379   : > { %v5638_v22 = vpack.i.bf16 %v8714_v45, %v8708_v16  ;;  %v2638_v4 = vrot.slane %v8714_v45, 1  ;;  %v2634_v18 = vrot.slane %v8714_v45, 7 }
 0x37a   : > { %v8722_v63 = vpop.f32.mrf.mxu1  ;;  %v3448_v48 = vsel %vm3329_vm13, %v3416_v24, %v5551_v25  ;;  %v3449_v29 = vsel %vm3329_vm13, %v3417_v15, %v5552_v38  ;;  %v3287_v38 = vsel %vm1880_vm4, %v8177_v30, %v5557_v41  ;;  %v5575_v25 = vpop.permute.xlu0 %5574  ;;  %v5571_v41 = vunpack.i.l.bf16 %v5570_v33 }
 0x37b   : > { %5639 = vrot.lane.b32.xlu1 %v5638_v22, %s5810_s24  ;;  %v3492_v39 = vpack.c.bf16 %v3449_v29, %v3448_v48  ;;  %v2639_v56 = vsel %vm773_vm1, %v2637_v10, %v2638_v4  ;;  %v2641_v53 = vsel %vm773_vm1, %v2638_v4, %v2640_v34  ;;  %v2635_v17 = vsel %vm644_vm2, %v2632_v46, %v2634_v18  ;;  %v8753_v29 = vld [vmem:[#allocation3 + $0x228] sm:$0xff]  ;;  %v8755_v4 = vld [vmem:[#allocation3 + $0x230] sm:$0xff]  ;;  %v2368_v18 = vld [vmem:[#allocation3 + $0x220] sm:$0xff]  ;;  %v8757_v57 = vpop.f32.mrf.mxu3 }
 0x37c   : > { %v5658_v49 = vpack.i.bf16 %v2641_v53, %v2639_v56  ;;  %v3502_v47 = vpack.c.bf16 %v2641_v53, %v2639_v56  ;;  %v8737_v12 = vpack.i.bf16 %v2635_v17, %v2633_v37  ;;  %v3319_v22 = vsel %vm3296_vm12, %v3286_v50, %v5561_v6  ;;  %v5733_v37 = vld [vmem:[#allocation3 + $0x1b0] sm:$0xff] }
 0x37d   : > { %3850 = vmatmul.bf16.gmra.mxu2 %v3492_v39  ;;  %v3320_v15 = vsel %vm3296_vm12, %v3287_v38, %v5562_v43  ;;  %v5572_v39 = vunpack.i.h.bf16 %v5570_v33  ;;  %v5577_v56 = vunpack.i.h.bf16 %v5575_v25  ;;  %v5576_v53 = vunpack.i.l.bf16 %v5575_v25  ;;  %v5734_v33 = vld [vmem:[#allocation3 + $0x1a8] sm:$0xff] }
 0x37e   : > { %5659 = vrot.lane.b32.xlu2 %v5658_v49, %s5809_s12  ;;  %4483 = vmatmul.msk.bf16.gmra.mxu3 %vm1880_vm4, %v3502_v47  ;;  %v2648_v43 = vrot.slane %v8755_v4, 7  ;;  %v2646_v6 = vrot.slane %v8753_v29, 7  ;;  %v2645_v49 = vrot.slane %v2368_v18, 7  ;;  %v5668_v47 = vpack.i.bf16 %v8755_v4, %v8753_v29 }
 0x37f   : > { %v5565_v20 = vpop.permute.xlu1 %5564  ;;  %5634 = vrot.lane.b32.xlu0 %v8737_v12, %s5811_s13  ;;  %v3387_v17 = vsel %vm1880_vm4, %v5733_v37, %v5572_v39 }
 0x380   : > { %v5567_v24 = vunpack.i.h.bf16 %v5565_v20  ;;  %v5566_v34 = vunpack.i.l.bf16 %v5565_v20  ;;  %v3811_v3 = vpop.f32.mrf.mxu2  ;;  %v3386_v20 = vsel %vm1880_vm4, %v5734_v33, %v5571_v41 }
 0x382   : > { %v3722_v10 = vpop.f32.mrf.mxu1  ;;  %v3352_v46 = vsel %vm3329_vm13, %v3319_v22, %v5566_v34  ;;  %v3353_v48 = vsel %vm3329_vm13, %v3320_v15, %v5567_v24  ;;  %v5585_v24 = vpop.permute.xlu2 %5584  ;;  %v3419_v34 = vsel %vm3296_vm12, %v3387_v17, %v5577_v56 }
 0x383   : > { %v8749_v30 = vadd.f32 %v3811_v3, %v3722_v10  ;;  %5654 = vrot.lane.b32.xlu1 %v8660_v44, %s5810_s24  ;;  %v3491_v21 = vpack.c.bf16 %v3353_v48, %v3352_v46  ;;  %v3418_v3 = vsel %vm3296_vm12, %v3386_v20, %v5576_v53  ;;  %v2647_v46 = vsel %vm644_vm2, %v2645_v49, %v2646_v6  ;;  %v8780_v53 = vpop.f32.mrf.mxu3 }
 0x384   : > { %v2649_v48 = vsel %vm644_vm2, %v2646_v6, %v2648_v43  ;;  %v5587_v18 = vunpack.i.h.bf16 %v5585_v24  ;;  %v5586_v39 = vunpack.i.l.bf16 %v5585_v24 }
 0x385   : > { %3761 = vmatmul.bf16.gmra.mxu1 %v3491_v21 }
 0x386   : > { %5674 = vrot.lane.b32.xlu2 %v8629_v26, %s5809_s12  ;;  %v5590_v26 = vpop.permute.xlu0 %5589  ;;  %v3289_v37 = vsel %vm1880_vm4, %v8267_v7, %v5587_v18  ;;  %v3288_v49 = vsel %vm1880_vm4, %v8275_v54, %v5586_v39  ;;  %v4149_v54 = vld [vmem:[%s9490_s7 + $0x18] sm:$0xff]  ;;  %s377_s12 = sand.u32 1, %s5791_s18  }
 0x387   : > { %v5580_v44 = vpop.permute.xlu1 %5579  ;;  %5649 = vrot.lane.b32.xlu0 %v8405_v1, %s5811_s13  ;;  %v5592_v41 = vunpack.i.h.bf16 %v5590_v26  ;;  %v5591_v56 = vunpack.i.l.bf16 %v5590_v26  ;;  %v5663_v1 = vpack.i.bf16 %v2649_v48, %v2647_v46  ;;  %4166 = vmatpush.msrb.mxu3 %v4149_v54  ;;  %s4370_s15 = sshll.u32 %s377_s12, 8  ;;  %s4289_s14 = scalar_lea.sflag [#allocation5], %s377_s12 }
 0x388   : > { %v5582_v38 = vunpack.i.h.bf16 %v5580_v44  ;;  %v5581_v50 = vunpack.i.l.bf16 %v5580_v44  ;;  %v8767_v25 = vpop.f32.mrf.mxu2 }
 0x389   : > { %v3321_v33 = vsel %vm3296_vm12, %v3288_v49, %v5591_v56 }
 0x38a   : > { %v8773_v22 = vpop.f32.mrf.mxu1  ;;  %v3450_v15 = vsel %vm3329_vm13, %v3418_v3, %v5581_v50  ;;  %v3451_v10 = vsel %vm3329_vm13, %v3419_v34, %v5582_v38  ;;  %v5600_v54 = vpop.permute.xlu2 %5599 }
 0x38b   : > { %5669 = vrot.lane.b32.xlu1 %v5668_v47, %s5810_s24  ;;  %v3495_v21 = vpack.c.bf16 %v3451_v10, %v3450_v15  ;;  %v3322_v47 = vsel %vm3296_vm12, %v3289_v37, %v5592_v41  ;;  %v8798_v3 = vpop.f32.mrf.mxu3 }
 0x38d   : > { %3855 = vmatmul.bf16.gmra.mxu2 %v3495_v21 }
 0x38f   : > { %v5595_v44 = vpop.permute.xlu1 %5594  ;;  %5664 = vrot.lane.b32.xlu0 %v5663_v1, %s5811_s13 }
 0x390   : > { %v5597_v17 = vunpack.i.h.bf16 %v5595_v44  ;;  %v5596_v43 = vunpack.i.l.bf16 %v5595_v44  ;;  %v3816_v6 = vpop.f32.mrf.mxu2 }
 0x392   : > { %v3727_v20 = vpop.f32.mrf.mxu1  ;;  %v3354_v38 = vsel %vm3329_vm13, %v3321_v33, %v5596_v43  ;;  %v3355_v50 = vsel %vm3329_vm13, %v3322_v47, %v5597_v17 }
 0x393   : > { %v8791_v24 = vadd.f32 %v3816_v6, %v3727_v20  ;;  %5684 = vrot.lane.b32.xlu1 %v8737_v12, %s5810_s24  ;;  %v3494_v7 = vpack.c.bf16 %v3355_v50, %v3354_v38  ;;  %v8804_v48 = vpop.f32.mrf.mxu3  ;;  %s9301_s24 = scalar_lea.vmem [#allocation4], %s4370_s15 }
 0x394   : > { %s4301_s29 = sshll.u32 %s9301_s24, 4  ;;  %s4302_s29 = int_to_ptr.vmem [resolvable:$true] %s4301_s29 }
 0x395   : > { %3766 = vmatmul.bf16.gmra.mxu1 %v3494_v7 }
 0x397   : > { %5679 = vrot.lane.b32.xlu0 %v8643_v14, %s5811_s13  ;;  %s4515_s13 = sshll.u32 %s5895_s21, 8 }
 0x398   : > { %v3818_v34 = vpop.f32.mrf.mxu2  ;;  %s4300_s25 = scalar_lea.hbm %s9494_s11, %s4515_s13 }
 0x399   : > { %s4303_s30 = sshll.u32 %s4300_s25, 4  ;;  %s5757_s25 = scalar_lea.hbm %s9494_s11, 512  ;;  %s4304_s30 = int_to_ptr.hbm [resolvable:$true] %s4303_s30 }
 0x39a   : > { %v3729_v26 = vpop.f32.mrf.mxu1  ;;  %s5751_s15 = sshra.s32 %s4304_s30, 4  ;;  %s5752_s15 = int_to_ptr.hbm [resolvable:$true] %s5751_s15 }
 0x39b   : > { %v8802_v15 = vadd.f32 %v3818_v34, %v3729_v26  ;;  %v8810_v41 = vpop.f32.mrf.mxu3  ;;  %s5753_s13 = scalar_lea.hbm %s5752_s15, 256  ;;  %p5758_p0 = scmp.lt.s32.totalorder %s5752_s15, %s9494_s11 }
 0x39c   : > { %9742 = vst [vmem:[#allocation21_spill] sm:$0xff] %v8810_v41  ;;  %p5754_p11 = scmp.ne.s32.totalorder %s5752_s15, %s5753_s13  ;;  %p5759_p1 = scmp.lt.s32.totalorder %s5757_s25, %s5753_s13 }
 0x39e   : > { %p5755_p12 = pnand %p5754_p11, %p5912_p5  ;;  %p5760_p2 = por %p5759_p1, %p5758_p0 }
 0x3a0   : > { %v3821_v10 = vpop.f32.mrf.mxu2  ;;  %p5756_p13 = pneg %p5755_p12 }
 0x3a2   : > { %v3732_v46 = vpop.f32.mrf.mxu1  ;;  %p5761_p3 = pnand %p5760_p2, %p5756_p13 }
 0x3a3   : > { %v8806_v12 = vadd.f32 %v3821_v10, %v3732_v46  ;;  %v8814_v14 = vpop.f32.mrf.mxu3  ;;  %v5602_v46 = vunpack.i.h.bf16 %v5600_v54 }
 0x3a4   : > { %9743 = vst [vmem:[#allocation44_spill] sm:$0xff] %v8814_v14 }
 0x3a8   : > { %v3823_v21 = vpop.f32.mrf.mxu2 }
 0x3aa   : > { %v3734_v18 = vpop.f32.mrf.mxu1 }
 0x3ab   : > { %v8808_v39 = vadd.f32 %v3823_v21, %v3734_v18  ;;  %v8818_v6 = vpop.f32.mrf.mxu3  ;;  %v5601_v21 = vunpack.i.l.bf16 %v5600_v54  ;;  %v5615_v54 = vpop.permute.xlu2 %5614 }
 0x3ac   : > { %9745 = vst [vmem:[#allocation20_spill] sm:$0xff] %v8818_v6  ;;  %v5617_v41 = vunpack.i.h.bf16 %v5615_v54 }
 0x3b0   : > { %v3826_v56 = vpop.f32.mrf.mxu2 }
 0x3b2   : > { %v3737_v1 = vpop.f32.mrf.mxu1 }
 0x3b3   : > { %v8812_v44 = vadd.f32 %v3826_v56, %v3737_v1  ;;  %v8822_v50 = vpop.f32.mrf.mxu3 }
 0x3b4   : > { %9747 = vst [vmem:[#allocation22_spill] sm:$0xff] %v8822_v50 }
 0x3b8   : > { %v3828_v37 = vpop.f32.mrf.mxu2 }
 0x3ba   : > { %v3739_v49 = vpop.f32.mrf.mxu1 }
 0x3bb   : > { %v8816_v17 = vadd.f32 %v3828_v37, %v3739_v49  ;;  %v8828_v56 = vpop.f32.mrf.mxu3 }
 0x3bc   : > { %9750 = vst [vmem:[#allocation17_spill] sm:$0xff] %v8828_v56 }
 0x3bd   : > { %9744 = vst [vmem:[#allocation48_spill] sm:$0xff] %v8816_v17 }
 0x3c0   : > { %v3831_v43 = vpop.f32.mrf.mxu2 }
 0x3c2   : > { %v3742_v47 = vpop.f32.mrf.mxu1 }
 0x3c3   : > { %v8820_v33 = vadd.f32 %v3831_v43, %v3742_v47  ;;  %v4148_v43 = vld [vmem:[%s9490_s7 + $0x10] sm:$0xff]  ;;  %v8841_v17 = vpop.f32.mrf.mxu3 }
 0x3c4   : > { %v5735_v47 = vld [vmem:[#allocation3 + $0x1d0] sm:$0xff]  ;;  %4167 = vmatpush.msrb.mxu3 %v4148_v43 }
 0x3c5   : > { %9746 = vst [vmem:[#allocation23_spill] sm:$0xff] %v8820_v33 }
 0x3c8   : > { %v3833_v20 = vpop.f32.mrf.mxu2 }
 0x3ca   : > { %v3744_v38 = vpop.f32.mrf.mxu1 }
 0x3cb   : > { %v8824_v7 = vadd.f32 %v3833_v20, %v3744_v38  ;;  %v3389_v20 = vsel %vm1880_vm4, %v5735_v47, %v5602_v46  ;;  %v5736_v38 = vld [vmem:[#allocation3 + $0x1c8] sm:$0xff]  ;;  %v5616_v46 = vunpack.i.l.bf16 %v5615_v54 }
 0x3cc   : > { %v3388_v50 = vsel %vm1880_vm4, %v5736_v38, %v5601_v21 }
 0x3cd   : > { %9748 = vst [vmem:[#allocation34_spill] sm:$0xff] %v8824_v7 }
 0x3cf   : > { %v5610_v26 = vpop.permute.xlu1 %5609 }
 0x3d0   : > { %v3836_v34 = vpop.f32.mrf.mxu2  ;;  %v5612_v6 = vunpack.i.h.bf16 %v5610_v26  ;;  %v5611_v7 = vunpack.i.l.bf16 %v5610_v26 }
 0x3d2   : > { %v3747_v10 = vpop.f32.mrf.mxu1 }
 0x3d3   : > { %v8826_v18 = vadd.f32 %v3836_v34, %v3747_v10  ;;  %v5605_v1 = vpop.permute.xlu0 %5604 }
 0x3d4   : > { %v5607_v37 = vunpack.i.h.bf16 %v5605_v1  ;;  %v5606_v49 = vunpack.i.l.bf16 %v5605_v1 }
 0x3d5   : > { %9749 = vst [vmem:[#allocation10_spill] sm:$0xff] %v8826_v18 }
 0x3d6   : > { %v3421_v34 = vsel %vm3296_vm12, %v3389_v20, %v5607_v37  ;;  %v3420_v10 = vsel %vm3296_vm12, %v3388_v50, %v5606_v49  ;;  %v3291_v50 = vsel %vm1880_vm4, %v8343_v59, %v5617_v41  ;;  %v2651_v59 = vrot.slane %v8753_v29, 1 }
 0x3d7   : > { %v3452_v1 = vsel %vm3329_vm13, %v3420_v10, %v5611_v7  ;;  %v3453_v18 = vsel %vm3329_vm13, %v3421_v34, %v5612_v6  ;;  %v5625_v21 = vpop.permute.xlu1 %5624  ;;  %v3290_v7 = vsel %vm1880_vm4, %v8354_v2, %v5616_v46  ;;  %v2652_v34 = vrot.slane %v8755_v4, 1  ;;  %v2371_v2 = vld [vmem:[#allocation3 + $0x238] sm:$0xff] }
 0x3d8   : > { %v3838_v56 = vpop.f32.mrf.mxu2  ;;  %v3498_v14 = vpack.c.bf16 %v3453_v18, %v3452_v1  ;;  %v5627_v6 = vunpack.i.h.bf16 %v5625_v21  ;;  %v5626_v18 = vunpack.i.l.bf16 %v5625_v21  ;;  %v2654_v10 = vrot.slane %v2371_v2, 1 }
 0x3d9   : > { %v2653_v1 = vsel %vm773_vm1, %v2651_v59, %v2652_v34 }
 0x3da   : > { %v3749_v33 = vpop.f32.mrf.mxu1  ;;  %3860 = vmatmul.bf16.gmra.mxu2 %v3498_v14  ;;  %v2655_v46 = vsel %vm773_vm1, %v2652_v34, %v2654_v10 }
 0x3db   : > { %v8839_v47 = vadd.f32 %v3838_v56, %v3749_v33  ;;  %v5620_v26 = vpop.permute.xlu0 %5619 }
 0x3dc   : > { %v5622_v43 = vunpack.i.h.bf16 %v5620_v26  ;;  %v5621_v38 = vunpack.i.l.bf16 %v5620_v26  ;;  %v3505_v26 = vpack.c.bf16 %v2655_v46, %v2653_v1 }
 0x3de   : > { %v3324_v37 = vsel %vm3296_vm12, %v3291_v50, %v5622_v43  ;;  %v3323_v33 = vsel %vm3296_vm12, %v3290_v7, %v5621_v38  ;;  %v8857_v43 = vpop.f32.mrf.mxu3  ;;  %v5630_v38 = vpop.permute.xlu2 %5629  ;;  %4484 = vmatmul.msk.bf16.gmra.mxu3 %vm1880_vm4, %v3505_v26 }
 0x3df   : > { %v3356_v14 = vsel %vm3329_vm13, %v3323_v33, %v5626_v18  ;;  %v3357_v49 = vsel %vm3329_vm13, %v3324_v37, %v5627_v6  ;;  %v5632_v7 = vunpack.i.h.bf16 %v5630_v38  ;;  %v5631_v6 = vunpack.i.l.bf16 %v5630_v38 }
 0x3e0   : > { %v3841_v56 = vpop.f32.mrf.mxu2  ;;  %v3497_v20 = vpack.c.bf16 %v3357_v49, %v3356_v14 }
 0x3e1   : > { %v3391_v49 = vsel %vm1880_vm4, %v8625_v31, %v5632_v7  ;;  %v3390_v59 = vsel %vm1880_vm4, %v8617_v62, %v5631_v6 }
 0x3e2   : > { %v3752_v54 = vpop.f32.mrf.mxu1  ;;  %3771 = vmatmul.bf16.gmra.mxu1 %v3497_v20 }
 0x3e3   : > { %v8853_v41 = vadd.f32 %v3841_v56, %v3752_v54 }
 0x3e6   : > { %v3935_v14 = vpop.f32.mrf.mxu3  ;;  %v5645_v20 = vpop.permute.xlu2 %5644 }
 0x3e7   : > { %v5647_v7 = vunpack.i.h.bf16 %v5645_v20 }
 0x3e8   : > { %v3843_v21 = vpop.f32.mrf.mxu2 }
 0x3ea   : > { %v3754_v50 = vpop.f32.mrf.mxu1 }
 0x3eb   : > { %v8860_v4 = vadd.f32 %v3843_v21, %v3754_v50 }
 0x3ed   : > { %v5640_v29 = vpop.permute.xlu1 %5639 }
 0x3ee   : > { %v5642_v2 = vunpack.i.h.bf16 %v5640_v29  ;;  %v5641_v10 = vunpack.i.l.bf16 %v5640_v29  ;;  %v3293_v29 = vsel %vm1880_vm4, %v8418_v9, %v5647_v7 }
 0x3f0   : > { %v3846_v18 = vpop.f32.mrf.mxu2 }
 0x3f1   : > { %v5635_v33 = vpop.permute.xlu0 %5634 }
 0x3f2   : > { %v3757_v37 = vpop.f32.mrf.mxu1  ;;  %v5637_v54 = vunpack.i.h.bf16 %v5635_v33  ;;  %v5636_v34 = vunpack.i.l.bf16 %v5635_v33  ;;  %v5660_v33 = vpop.permute.xlu2 %5659 }
 0x3f3   : > { %v3847_v56 = vadd.f32 %v3846_v18, %v3757_v37  ;;  %v5646_v18 = vunpack.i.l.bf16 %v5645_v20 }
 0x3f4   : > { %v3423_v46 = vsel %vm3296_vm12, %v3391_v49, %v5637_v54  ;;  %v3422_v21 = vsel %vm3296_vm12, %v3390_v59, %v5636_v34 }
 0x3f5   : > { %v8866_v1 = vadd.f32 %v3935_v14, %v3847_v56  ;;  %v5655_v26 = vpop.permute.xlu1 %5654  ;;  %v3454_v38 = vsel %vm3329_vm13, %v3422_v21, %v5641_v10  ;;  %v3455_v50 = vsel %vm3329_vm13, %v3423_v46, %v5642_v2  ;;  %v3292_v56 = vsel %vm1880_vm4, %v8429_v51, %v5646_v18 }
 0x3f6   : > { %v3501_v31 = vpack.c.bf16 %v3455_v50, %v3454_v38  ;;  %v5657_v14 = vunpack.i.h.bf16 %v5655_v26  ;;  %v5656_v49 = vunpack.i.l.bf16 %v5655_v26  ;;  %v5662_v46 = vunpack.i.h.bf16 %v5660_v33 }
 0x3f7   : > { %v5661_v21 = vunpack.i.l.bf16 %v5660_v33  ;;  %v4147_v33 = vld [vmem:[%s9490_s7 + $0x8] sm:$0xff] }
 0x3f8   : > { %3865 = vmatmul.bf16.gmra.mxu2 %v3501_v31  ;;  %v3393_v26 = vsel %vm1880_vm4, %v8714_v45, %v5662_v46  ;;  %4168 = vmatpush.msrb.mxu3 %v4147_v33 }
 0x3f9   : > { %v5650_v37 = vpop.permute.xlu0 %5649  ;;  %v3392_v7 = vsel %vm1880_vm4, %v8708_v16, %v5661_v21 }
 0x3fa   : > { %v5652_v62 = vunpack.i.h.bf16 %v5650_v37  ;;  %v5651_v6 = vunpack.i.l.bf16 %v5650_v37  ;;  %v5675_v18 = vpop.permute.xlu2 %5674 }
 0x3fc   : > { %v3326_v54 = vsel %vm3296_vm12, %v3293_v29, %v5652_v62  ;;  %v3325_v34 = vsel %vm3296_vm12, %v3292_v56, %v5651_v6  ;;  %v4175_v6 = vld [vmem:[%s9492_s9] sm:$0x3]  ;;  %v5677_v56 = vunpack.i.h.bf16 %v5675_v18 }
 0x3fd   : > { %v3358_v59 = vsel %vm3329_vm13, %v3325_v34, %v5656_v49  ;;  %v3359_v20 = vsel %vm3329_vm13, %v3326_v54, %v5657_v14  ;;  %v5670_v2 = vpop.permute.xlu1 %5669  ;;  %4486 = vmatpush.msk.msrb.mxu0 %vm1998_vm3, %v4175_v6  ;;  %v5676_v14 = vunpack.i.l.bf16 %v5675_v18 }
 0x3fe   : > { %v3500_v10 = vpack.c.bf16 %v3359_v20, %v3358_v59  ;;  %v5672_v38 = vunpack.i.h.bf16 %v5670_v2  ;;  %v5671_v9 = vunpack.i.l.bf16 %v5670_v2  ;;  %v3295_v20 = vsel %vm1880_vm4, %v8656_v35, %v5677_v56  ;;  %v8907_v35 = vpop.f32.mrf.mxu1  ;;  %v8931_v56 = vld [vmem:[%s9488_s5] ss:$0 sm:$0xff] }
 0x3ff   : > { %v3294_v2 = vsel %vm1880_vm4, %v8653_v52, %v5676_v14 }
 0x400   : > { %3776 = vmatmul.bf16.gmra.mxu1 %v3500_v10 }
 0x401   : > { %v5665_v50 = vpop.permute.xlu0 %5664 }
 0x402   : > { %v5667_v31 = vunpack.i.h.bf16 %v5665_v50  ;;  %v5666_v51 = vunpack.i.l.bf16 %v5665_v50 }
 0x404   : > { %v3425_v37 = vsel %vm3296_vm12, %v3393_v26, %v5667_v31  ;;  %v3424_v62 = vsel %vm3296_vm12, %v3392_v7, %v5666_v51  ;;  %v8903_v51 = vpop.f32.mrf.mxu3  ;;  %v8905_v26 = vpop.f32.mrf.mxu2 }
 0x405   : > { %v3456_v29 = vsel %vm3329_vm13, %v3424_v62, %v5671_v9  ;;  %v3457_v45 = vsel %vm3329_vm13, %v3425_v37, %v5672_v38  ;;  %v5685_v49 = vpop.permute.xlu1 %5684  ;;  %v3799_v37 = vadd.f32 %v8581_v11, %v8586_v28  ;;  %v4146_v11 = vld [vmem:[%s9490_s7] sm:$0xff]  ;;  %v3891_v28 = vadd.f32 %v8545_v27, %v8609_v58 }
 0x406   : > { %v3504_v16 = vpack.c.bf16 %v3457_v45, %v3456_v29  ;;  %v5687_v10 = vunpack.i.h.bf16 %v5685_v49  ;;  %v5686_v46 = vunpack.i.l.bf16 %v5685_v49  ;;  %v8913_v18 = vpop.f32.mrf.mxu1  ;;  %v3804_v45 = vadd.f32 %v8680_v8, %v8687_v13  ;;  %4169 = vmatpush.msrb.mxu3 %v4146_v11  ;;  %v8946_v13 = vld [vmem:[%s9489_s6] ss:$0 sm:$0xff] }
 0x407   : > { %v3888_v29 = vadd.f32 %v8414_v61, %v3799_v37  ;;  %v3971_v27 = vmul.f32 %v8931_v56, %v3891_v28  ;;  %v3896_v58 = vadd.f32 %v8602_v55, %v8706_v36  ;;  %v3901_v36 = vadd.f32 %v8676_v60, %v8749_v30 }
 0x408   : > { %3870 = vmatmul.bf16.gmra.mxu2 %v3504_v16  ;;  %v3886_v16 = vadd.f32 %v8368_v23, %v8543_v0  ;;  %v3893_v8 = vadd.f32 %v8575_v32, %v3804_v45  ;;  %v3809_v23 = vadd.f32 %v8712_v19, %v8722_v63 }
 0x409   : > { %v5680_v54 = vpop.permute.xlu0 %5679  ;;  %v3970_v61 = vmul.f32 %v8931_v56, %v3888_v29  ;;  %v3973_v55 = vmul.f32 %v8931_v56, %v3896_v58  ;;  %v3975_v60 = vmul.f32 %v8931_v56, %v3901_v36 }
 0x40a   : > { %v5682_v34 = vunpack.i.h.bf16 %v5680_v54  ;;  %v5681_v59 = vunpack.i.l.bf16 %v5680_v54  ;;  %v3969_v0 = vmul.f32 %v8931_v56, %v3886_v16  ;;  %v3972_v63 = vmul.f32 %v8931_v56, %v3893_v8 }
 0x40b   : > { %v8956_v32 = vadd.f32 %v8946_v13, %v3970_v61  ;;  %v3898_v54 = vadd.f32 %v8635_v42, %v3809_v23  ;;  %v9012_v28 = vadd.f32 %v8946_v13, %v3975_v60  ;;  %v3913_v61 = vadd.f32 %v8798_v3, %v8808_v39  ;;  %v9751_v60 = vld [vmem:[#allocation48_spill] sm:$0xff] }
 0x40c   : > { %v3328_v21 = vsel %vm3296_vm12, %v3295_v20, %v5682_v34  ;;  %v3327_v38 = vsel %vm3296_vm12, %v3294_v2, %v5681_v59  ;;  %v8909_v7 = vpop.f32.mrf.mxu3  ;;  %v8911_v52 = vpop.f32.mrf.mxu2  ;;  %v3814_v34 = vadd.f32 %v8767_v25, %v8773_v22  ;;  %v8965_v59 = vadd.f32 %v8946_v13, %v3969_v0 }
 0x40d   : > { %v3360_v9 = vsel %vm3329_vm13, %v3327_v38, %v5686_v46  ;;  %v3361_v50 = vsel %vm3329_vm13, %v3328_v21, %v5687_v10  ;;  %v8968_v20 = vadd.f32 %v8946_v13, %v3971_v27  ;;  %v4038_v2 = vmax.f32 %v8956_v32, 0.0 }
 0x40e   : > { %v3503_v31 = vpack.c.bf16 %v3361_v50, %v3360_v9  ;;  %v8921_v6 = vpop.f32.mrf.mxu1  ;;  %v8975_v10 = vadd.f32 %v8946_v13, %v3972_v63  ;;  %v3974_v42 = vmul.f32 %v8931_v56, %v3898_v54  ;;  %v3903_v25 = vadd.f32 %v8699_v5, %v3814_v34 }
 0x40f   : > { %v4037_v22 = vmax.f32 %v8965_v59, 0.0  ;;  %v3906_v46 = vadd.f32 %v8728_v40, %v8791_v24  ;;  %v4039_v21 = vmax.f32 %v8968_v20, 0.0  ;;  %v8984_v38 = vadd.f32 %v8946_v13, %v3973_v55 }
 0x410   : > { %3781 = vmatmul.bf16.gmra.mxu1 %v3503_v31  ;;  %v4070_v30 = vsel %vm1880_vm4, %v4038_v2, 0.0  ;;  %v4040_v5 = vmax.f32 %v8975_v10, 0.0  ;;  %v8996_v31 = vadd.f32 %v8946_v13, %v3974_v42  ;;  %v3976_v40 = vmul.f32 %v8931_v56, %v3903_v25 }
 0x411   : > { %v3908_v24 = vadd.f32 %v8757_v57, %v8802_v15  ;;  %v4069_v37 = vsel %vm1880_vm4, %v4037_v22, 0.0  ;;  %v3977_v29 = vmul.f32 %v8931_v56, %v3906_v46  ;;  %v4072_v16 = vsel %vm1880_vm4, %v4039_v21, 0.0 }
 0x412   : > { %v4041_v11 = vmax.f32 %v8984_v38, 0.0  ;;  %v3911_v57 = vadd.f32 %v8780_v53, %v8806_v12  ;;  %v4071_v15 = vadd.f32 %v4070_v30, %v4069_v37  ;;  %v4074_v8 = vsel %vm1880_vm4, %v4040_v5, 0.0  ;;  %v9752_v30 = vld [vmem:[#allocation21_spill] sm:$0xff] }
 0x413   : > { %v9579_v23 = vmax.f32 %v8996_v31, 0.0  ;;  %v9023_v0 = vadd.f32 %v8946_v13, %v3976_v40  ;;  %v3978_v27 = vmul.f32 %v8931_v56, %v3908_v24  ;;  %v9027_v63 = vadd.f32 %v8946_v13, %v3977_v29 }
 0x414   : > { %v8917_v62 = vpop.f32.mrf.mxu3  ;;  %v8919_v33 = vpop.f32.mrf.mxu2  ;;  %v4073_v58 = vadd.f32 %v4072_v16, %v4071_v15  ;;  %v4076_v53 = vsel %vm1880_vm4, %v4041_v11, 0.0  ;;  %v9577_v3 = vmax.f32 %v9012_v28, 0.0  ;;  %v3979_v12 = vmul.f32 %v8931_v56, %v3911_v57  ;;  %v9753_v57 = vld [vmem:[#allocation23_spill] sm:$0xff]  ;;  %v9754_v15 = vld [vmem:[#allocation44_spill] sm:$0xff] }
 0x415   : > { %v3916_v39 = vadd.f32 %v8804_v48, %v8812_v44  ;;  %v3980_v34 = vmul.f32 %v8931_v56, %v3913_v61  ;;  %v4078_v42 = vsel %vm1880_vm4, %v9579_v23, 0.0  ;;  %v9578_v25 = vmax.f32 %v9023_v0, 0.0 }
 0x416   : > { %v8958_v19 = vpop.f32.mrf.mxu1  ;;  %v4075_v54 = vadd.f32 %v4074_v8, %v4073_v58  ;;  %v9046_v46 = vadd.f32 %v8946_v13, %v3978_v27  ;;  %v3918_v40 = vadd.f32 %v9752_v30, %v9751_v60  ;;  %v9580_v44 = vmax.f32 %v9027_v63, 0.0  ;;  %v9755_v60 = vld [vmem:[#allocation34_spill] sm:$0xff] }
 0x417   : > { %v4080_v37 = vsel %vm1880_vm4, %v9577_v3, 0.0  ;;  %v9057_v29 = vadd.f32 %v8946_v13, %v3979_v12  ;;  %v3981_v16 = vmul.f32 %v8931_v56, %v3916_v39  ;;  %v3921_v61 = vadd.f32 %v9754_v15, %v9753_v57  ;;  %v9756_v12 = vld [vmem:[#allocation20_spill] sm:$0xff]  ;;  %v9757_v57 = vld [vmem:[#allocation10_spill] sm:$0xff] }
 0x418   : > { %v4077_v48 = vadd.f32 %v4076_v53, %v4075_v54  ;;  %v9063_v27 = vadd.f32 %v8946_v13, %v3980_v34  ;;  %v4082_v58 = vsel %vm1880_vm4, %v9578_v25, 0.0  ;;  %v9581_v53 = vmax.f32 %v9046_v46, 0.0  ;;  %v9758_v15 = vld [vmem:[#allocation22_spill] sm:$0xff] }
 0x419   : > { %v3982_v54 = vmul.f32 %v8931_v56, %v3918_v40  ;;  %v3923_v30 = vadd.f32 %v9756_v12, %v9755_v60  ;;  %v4084_v39 = vsel %vm1880_vm4, %v9580_v44, 0.0  ;;  %v9077_v34 = vadd.f32 %v8946_v13, %v3981_v16  ;;  %v9759_v16 = vld [vmem:[#allocation17_spill] sm:$0xff] }
 0x41a   : > { %v4079_v8 = vadd.f32 %v4078_v42, %v4077_v48  ;;  %v4047_v42 = vmax.f32 %v9057_v29, 0.0  ;;  %v3983_v48 = vmul.f32 %v8931_v56, %v3921_v61  ;;  %v3926_v25 = vadd.f32 %v9758_v15, %v9757_v57 }
 0x41b   : > { %v9582_v40 = vmax.f32 %v9063_v27, 0.0  ;;  %v3984_v60 = vmul.f32 %v8931_v56, %v3923_v30  ;;  %v3928_v12 = vadd.f32 %v9759_v16, %v8839_v47  ;;  %v3931_v61 = vadd.f32 %v8841_v17, %v8853_v41 }
 0x41c   : > { %v8948_v14 = vpop.f32.mrf.mxu3  ;;  %v8950_v49 = vpop.f32.mrf.mxu2  ;;  %v4081_v3 = vadd.f32 %v4080_v37, %v4079_v8  ;;  %v4086_v37 = vsel %vm1880_vm4, %v9581_v53, 0.0  ;;  %v9087_v8 = vadd.f32 %v8946_v13, %v3982_v54  ;;  %v4049_v15 = vmax.f32 %v9077_v34, 0.0 }
 0x41d   : > { %v9101_v54 = vadd.f32 %v8946_v13, %v3983_v48  ;;  %v3985_v30 = vmul.f32 %v8931_v56, %v3926_v25  ;;  %v4090_v47 = vsel %vm1880_vm4, %v9582_v40, 0.0  ;;  %v3933_v17 = vadd.f32 %v8857_v43, %v8860_v4 }
 0x41e   : > { %v9005_v45 = vpop.f32.mrf.mxu1  ;;  %v4083_v23 = vadd.f32 %v4082_v58, %v4081_v3  ;;  %v4088_v58 = vsel %vm1880_vm4, %v4047_v42, 0.0  ;;  %v3986_v16 = vmul.f32 %v8931_v56, %v3928_v12  ;;  %v3849_v48 = vadd.f32 %v8905_v26, %v8907_v35 }
 0x41f   : > { %v9583_v43 = vmax.f32 %v9101_v54, 0.0  ;;  %v9122_v4 = vadd.f32 %v8946_v13, %v3985_v30  ;;  %v3988_v12 = vmul.f32 %v8931_v56, %v3933_v17  ;;  %v3854_v26 = vadd.f32 %v8919_v33, %v8921_v6 }
 0x420   : > { %v4085_v44 = vadd.f32 %v4084_v39, %v4083_v23  ;;  %v4050_v23 = vmax.f32 %v9087_v8, 0.0  ;;  %v9111_v39 = vadd.f32 %v8946_v13, %v3984_v60  ;;  %v3852_v60 = vadd.f32 %v8911_v52, %v8913_v18 }
 0x421   : > { %v4096_v6 = vsel %vm1880_vm4, %v9583_v43, 0.0  ;;  %v4053_v17 = vmax.f32 %v9122_v4, 0.0  ;;  %v9760_v32 = vmax.f32 %v8996_v31, 0.0  ;;  %v9761_v20 = vmax.f32 %v9012_v28, 0.0 }
 0x422   : > { %v4087_v53 = vadd.f32 %v4086_v37, %v4085_v44  ;;  %v3987_v44 = vmul.f32 %v8931_v56, %v3931_v61  ;;  %v4092_v37 = vsel %vm1880_vm4, %v4049_v15, 0.0  ;;  %v4094_v35 = vsel %vm1880_vm4, %v4050_v23, 0.0 }
 0x423   : > { %v9134_v61 = vadd.f32 %v8946_v13, %v3986_v16  ;;  %v3989_v16 = vmul.f32 %v8931_v56, %v8866_v1  ;;  %v9762_v10 = vmax.f32 %v9023_v0, 0.0  ;;  %v9765_v28 = vmax.f32 %v9063_v27, 0.0 }
 0x424   : > { %v8990_v9 = vpop.f32.mrf.mxu3  ;;  %v8992_v50 = vpop.f32.mrf.mxu2  ;;  %v4089_v25 = vadd.f32 %v4088_v58, %v4087_v53  ;;  %v4052_v53 = vmax.f32 %v9111_v39, 0.0  ;;  %v3938_v58 = vadd.f32 %v8903_v51, %v3849_v48  ;;  %v9138_v52 = vadd.f32 %v8946_v13, %v3987_v44 }
 0x425   : > { %v3941_v51 = vadd.f32 %v8909_v7, %v3852_v60  ;;  %v9150_v48 = vadd.f32 %v8946_v13, %v3988_v12  ;;  %v3859_v1 = vadd.f32 %v8992_v50, %v9005_v45  ;;  %v9166_v12 = vadd.f32 %v8946_v13, %v3989_v16 }
 0x426   : > { %v4091_v40 = vadd.f32 %v4090_v47, %v4089_v25  ;;  %v3857_v47 = vadd.f32 %v8950_v49, %v8958_v19  ;;  %v3943_v25 = vadd.f32 %v8917_v62, %v3854_v26  ;;  %v4098_v49 = vsel %vm1880_vm4, %v4052_v53, 0.0 }
 0x427   : > { %v4054_v19 = vmax.f32 %v9134_v61, 0.0  ;;  %v9584_v7 = vmax.f32 %v9138_v52, 0.0  ;;  %v4100_v62 = vsel %vm1880_vm4, %v4053_v17, 0.0  ;;  %v3991_v26 = vmul.f32 %v8931_v56, %v3941_v51 }
 0x428   : > { %v4093_v30 = vadd.f32 %v4092_v37, %v4091_v40  ;;  %v3990_v37 = vmul.f32 %v8931_v56, %v3938_v58  ;;  %v3946_v60 = vadd.f32 %v8948_v14, %v3857_v47  ;;  %v4056_v50 = vmax.f32 %v9150_v48, 0.0 }
 0x429   : > { %v3992_v45 = vmul.f32 %v8931_v56, %v3943_v25  ;;  %v4102_v14 = vsel %vm1880_vm4, %v4054_v19, 0.0  ;;  %v3948_v47 = vadd.f32 %v8990_v9, %v3859_v1  ;;  %v9595_v51 = vmax.f32 %v9166_v12, 0.0 }
 0x42a   : > { %v4095_v40 = vadd.f32 %v4094_v35, %v4093_v30  ;;  %v9177_v30 = vadd.f32 %v8946_v13, %v3990_v37  ;;  %v4106_v9 = vsel %vm1880_vm4, %v4056_v50, 0.0  ;;  %v9766_v29 = vmax.f32 %v9101_v54, 0.0 }
 0x42b   : > { %v9768_v39 = vmax.f32 %v9166_v12, 0.0 }
 0x42c   : > { %v9037_v55 = vpop.f32.mrf.mxu3  ;;  %v4097_v43 = vadd.f32 %v4096_v6, %v4095_v40  ;;  %v9186_v40 = vadd.f32 %v8946_v13, %v3991_v26 }
 0x42e   : > { %v4099_v58 = vadd.f32 %v4098_v49, %v4097_v43 }
 0x430   : > { %v4101_v16 = vadd.f32 %v4100_v62, %v4099_v58  ;;  %v3994_v62 = vmul.f32 %v8931_v56, %v3948_v47 }
 0x432   : > { %v4103_v37 = vadd.f32 %v4102_v14, %v4101_v16  ;;  %v9211_v47 = vadd.f32 %v8946_v13, %v3994_v62 }
 0x434   : > { %v9094_v57 = vpop.f32.mrf.mxu3  ;;  %v9588_v62 = vmax.f32 %v9211_v47, 0.0 }
 0x43c   : > { %v3955_v18 = vpop.f32.mrf.mxu3 }
 0x45d   : > { %v9039_v36 = vpop.f32.mrf.mxu2 }
 0x45f   : > { %v9051_v24 = vpop.f32.mrf.mxu1 }
 0x460   : > { %v3862_v35 = vadd.f32 %v9039_v36, %v9051_v24  ;;  %v4104_v36 = vsel %vm1880_vm4, %v9584_v7, 0.0  ;;  %v3993_v24 = vmul.f32 %v8931_v56, %v3946_v60  ;;  %v9591_v60 = vmax.f32 %v9177_v30, 0.0 }
 0x461   : > { %v4105_v7 = vadd.f32 %v4104_v36, %v4103_v37 }
 0x462   : > { %v3951_v25 = vadd.f32 %v9037_v55, %v3862_v35  ;;  %v9199_v55 = vadd.f32 %v8946_v13, %v3993_v24 }
 0x463   : > { %v4107_v14 = vadd.f32 %v4106_v9, %v4105_v7 }
 0x464   : > { %v3995_v35 = vmul.f32 %v8931_v56, %v3951_v25  ;;  %v9772_v12 = vmax.f32 %v9199_v55, 0.0 }
 0x465   : > { %v3863_v3 = vpop.f32.mrf.mxu2 }
 0x466   : > { %v9219_v7 = vadd.f32 %v8946_v13, %v3995_v35 }
 0x467   : > { %v3774_v41 = vpop.f32.mrf.mxu1 }
 0x468   : > { %v3864_v6 = vadd.f32 %v3863_v3, %v3774_v41  ;;  %v3957_v3 = vpop.f32.mrf.mxu3  ;;  %v9193_v41 = vadd.f32 %v8946_v13, %v3992_v45 }
 0x46a   : > { %v3953_v26 = vadd.f32 %v9094_v57, %v3864_v6  ;;  %v9585_v16 = vmax.f32 %v9193_v41, 0.0  ;;  %v4110_v57 = vsel %vm1880_vm4, %v9591_v60, 0.0  ;;  %v9771_v48 = vmax.f32 %v9193_v41, 0.0 }
 0x46b   : > { %v9774_v41 = vmax.f32 %v9219_v7, 0.0 }
 0x46c   : > { %v3996_v6 = vmul.f32 %v8931_v56, %v3953_v26  ;;  %v4114_v9 = vsel %vm1880_vm4, %v9585_v16, 0.0 }
 0x46e   : > { %v9227_v26 = vadd.f32 %v8946_v13, %v3996_v6  ;;  %v4118_v6 = vsel %vm1880_vm4, %v9588_v62, 0.0 }
 0x47b   : > { %v3866_v33 = vpop.f32.mrf.mxu2 }
 0x47d   : > { %v3777_v44 = vpop.f32.mrf.mxu1 }
 0x47e   : > { %v3867_v49 = vadd.f32 %v3866_v33, %v3777_v44  ;;  %v4108_v33 = vsel %vm1880_vm4, %v9595_v51, 0.0  ;;  %v9586_v44 = vmax.f32 %v9186_v40, 0.0 }
 0x47f   : > { %v4109_v24 = vadd.f32 %v4108_v33, %v4107_v14 }
 0x480   : > { %v3956_v45 = vadd.f32 %v3955_v18, %v3867_v49  ;;  %v4112_v18 = vsel %vm1880_vm4, %v9586_v44, 0.0  ;;  %v9590_v44 = vmax.f32 %v9227_v26, 0.0 }
 0x481   : > { %v4111_v49 = vadd.f32 %v4110_v57, %v4109_v24 }
 0x482   : > { %v3997_v25 = vmul.f32 %v8931_v56, %v3956_v45  ;;  %v9587_v45 = vmax.f32 %v9219_v7, 0.0 }
 0x483   : > { %v3868_v43 = vpop.f32.mrf.mxu2  ;;  %v4113_v14 = vadd.f32 %v4112_v18, %v4111_v49  ;;  %v5812_v49 = vmov 256.0  }
 0x484   : > { %v9235_v57 = vadd.f32 %v8946_v13, %v3997_v25  ;;  %5692 = vrcp.f32 %v5812_v49  ;;  %v4120_v25 = vsel %vm1880_vm4, %v9587_v45, 0.0 }
 0x485   : > { %v3779_v1 = vpop.f32.mrf.mxu1  ;;  %v4115_v16 = vadd.f32 %v4114_v9, %v4113_v14 }
 0x486   : > { %v3869_v58 = vadd.f32 %v3868_v43, %v3779_v1  ;;  %v9589_v43 = vmax.f32 %v9199_v55, 0.0  ;;  %v3960_v1 = vpop.f32.mrf.mxu3  ;;  %v9593_v9 = vmax.f32 %v9235_v57, 0.0  ;;  %v9775_v55 = vmax.f32 %v9227_v26, 0.0 }
 0x488   : > { %v3958_v36 = vadd.f32 %v3957_v3, %v3869_v58  ;;  %v4116_v35 = vsel %vm1880_vm4, %v9589_v43, 0.0  ;;  %v4124_v45 = vsel %vm1880_vm4, %v9593_v9, 0.0 }
 0x489   : > { %v4117_v18 = vadd.f32 %v4116_v35, %v4115_v16 }
 0x48a   : > { %v3998_v58 = vmul.f32 %v8931_v56, %v3958_v36  ;;  %v5693_v43 = vpop.eup %5692 }
 0x48b   : > { %v3871_v37 = vpop.f32.mrf.mxu2  ;;  %vm4143_vm14 = vweird.f32 %v5693_v43 }
 0x48c   : > { %v9242_v36 = vadd.f32 %v8946_v13, %v3998_v58  ;;  %v4122_v58 = vsel %vm1880_vm4, %v9590_v44, 0.0 }
 0x48d   : > { %v3782_v3 = vpop.f32.mrf.mxu1 }
 0x48e   : > { %v3872_v33 = vadd.f32 %v3871_v37, %v3782_v3  ;;  %v4119_v3 = vadd.f32 %v4118_v6, %v4117_v18  ;;  %v9592_v16 = vmax.f32 %v9242_v36, 0.0  ;;  %v3962_v49 = vpop.f32.mrf.mxu3  ;;  %v9777_v26 = vmax.f32 %v9242_v36, 0.0 }
 0x490   : > { %v3961_v24 = vadd.f32 %v3960_v1, %v3872_v33  ;;  %v4126_v18 = vsel %vm1880_vm4, %v9592_v16, 0.0 }
 0x492   : > { %v3999_v37 = vmul.f32 %v8931_v56, %v3961_v24  ;;  %v4121_v24 = vadd.f32 %v4120_v25, %v4119_v3 }
 0x493   : > { %v3873_v33 = vpop.f32.mrf.mxu2 }
 0x494   : > { %v9250_v1 = vadd.f32 %v8946_v13, %v3999_v37  ;;  %v4123_v6 = vadd.f32 %v4122_v58, %v4121_v24 }
 0x495   : > { %v3784_v14 = vpop.f32.mrf.mxu1 }
 0x496   : > { %v3874_v35 = vadd.f32 %v3873_v33, %v3784_v14  ;;  %v9594_v62 = vmax.f32 %v9250_v1, 0.0  ;;  %v4125_v60 = vadd.f32 %v4124_v45, %v4123_v6  ;;  %v4139_v33 = vmul.f32 256.0, %v5693_v43 }
 0x498   : > { %v3963_v37 = vadd.f32 %v3962_v49, %v3874_v35  ;;  %v4128_v25 = vsel %vm1880_vm4, %v9594_v62, 0.0  ;;  %v4127_v14 = vadd.f32 %v4126_v18, %v4125_v60  ;;  %v4140_v24 = vsub.f32 1.0, %v4139_v33  ;;  %v4150_v18 = vld [vmem:[%s9491_s8] sm:$0x1] }
 0x49a   : > { %v4000_v44 = vmul.f32 %v8931_v56, %v3963_v37  ;;  %v4129_v49 = vadd.f32 %v4128_v25, %v4127_v14  ;;  %v4141_v45 = vmul.f32 %v5693_v43, %v4140_v24 }
 0x49c   : > { %v9268_v3 = vadd.f32 %v8946_v13, %v4000_v44  ;;  %v4142_v9 = vadd.f32 %v5693_v43, %v4141_v45 }
 0x49e   : > { %v4068_v35 = vmax.f32 %v9268_v3, 0.0  ;;  %v4144_v44 = vsel %vm4143_vm14, %v5693_v43, %v4142_v9 }
 0x4a0   : > { %v4130_v58 = vsel %vm1880_vm4, %v4068_v35, 0.0 }
 0x4a1   : > { %v4131_v16 = vadd.f32 %v4130_v58, %v4129_v49 }
 0x4a3   : > { %v4132_v56 = vrot.slane %v4131_v16, 4 }
 0x4a5   : > { %v4133_v37 = vadd.f32 %v4132_v56, %v4131_v16  ;;  %v4176_v16 = vld [vmem:[%s9493_s10] sm:$0x1] }
 0x4a7   : > { %v4134_v6 = vrot.slane %v4133_v37, 2 }
 0x4a9   : > { %v4135_v62 = vadd.f32 %v4134_v6, %v4133_v37 }
 0x4ab   : > { %v4136_v13 = vrot.slane %v4135_v62, 1 }
 0x4ad   : > { %v4137_v51 = vadd.f32 %v4136_v13, %v4135_v62 }
 0x4af   : > { %v4145_v60 = vmul.f32 %v4144_v44, %v4137_v51 }
 0x4b1   : > { %4485 = vmatmul.msk.f32.vlgmr.msrb.gmra.mxu3 %vm1880_vm4, %v4145_v60 }
 0x534   : > { %v4171_v25 = vpop.f32.mrf.mxu3 }
 0x535   : > { %v4172_v33 = vadd.f32 %v4171_v25, %v4150_v18 }
 0x537   : > { %v4174_v14 = vmax.f32 %v4172_v33, 0.0 }
 0x539   : > { %4487 = vmatmul.msk.f32.vlgmr.msrb.gmra.mxu0 %vm4177_vm15, %v4174_v14 }
 0x5b6   : > { %v4201_v49 = vpop.f32.mrf.mxu0 }
 0x5b7   : > { %v4202_v43 = vadd.f32 %v4201_v49, %v4176_v16 }
 0x5b9   : > { %v4488_v62 = vmul.f32 -1.442695, %v4202_v43 }
 0x5bb   : > { %5694 = vpow2.f32 %v4488_v62 }
 0x5c1   : > { %v5695_v51 = vpop.eup %5694 }
 0x5c2   : > { %v4207_v9 = vadd.f32 1.0, %v5695_v51 }
 0x5c4   : > { %5696 = vrcp.f32 %v4207_v9  ;;  %v4219_v45 = vand.u32 2147483648, %v4207_v9  ;;  %v4217_v6 = vand.u32 2147483647, %v4207_v9  ;;  %vm4213_vm1 = vweird.f32 %v4207_v9 }
 0x5c6   : > { %v4220_v44 = vor.u32 1.1754944e-38, %v4219_v45  ;;  %vm4218_vm3 = vcmp.eq.f32.partialorder %v4217_v6, 8.507059e+37 }
 0x5ca   : > { %v5697_v58 = vpop.eup %5696 }
 0x5cb   : > { %v4209_v24 = vmul.f32 %v5697_v58, %v4207_v9  ;;  %vm4214_vm0 = vweird.f32 %v5697_v58 }
 0x5cc   : > { %vm4215_vm2 = vmor %vm4213_vm1, %vm4214_vm0 }
 0x5cd   : > { %v4210_v56 = vsub.f32 1.0, %v4209_v24 }
 0x5cf   : > { %v4211_v37 = vmul.f32 %v5697_v58, %v4210_v56 }
 0x5d1   : > { %v4212_v13 = vadd.f32 %v5697_v58, %v4211_v37 }
 0x5d3   : > { %v4216_v60 = vsel %vm4215_vm2, %v5697_v58, %v4212_v13  ;;  %v9778_v58 = vmax.f32 %v9250_v1, 0.0 }
 0x5d4   : > { %v4221_v18 = vsel %vm4218_vm3, %v4220_v44, %v4216_v60 }
 0x5d5   : > { %v9284_v25 = vperm.slane %v4221_v18, 0 }
 0x5d7   : > { %v4224_v33 = vmul.f32 %v9284_v25, %v4037_v22  ;;  %v4225_v14 = vmul.f32 %v9284_v25, %v4038_v2  ;;  %v4226_v16 = vmul.f32 %v9284_v25, %v4039_v21  ;;  %v4227_v49 = vmul.f32 %v9284_v25, %v4040_v5 }
 0x5d8   : > { %v4228_v43 = vmul.f32 %v9284_v25, %v4041_v11  ;;  %v4229_v59 = vmul.f32 %v9284_v25, %v9760_v32  ;;  %v4230_v2 = vmul.f32 %v9284_v25, %v9761_v20  ;;  %v4231_v22 = vmul.f32 %v9284_v25, %v9762_v10 }
 0x5d9   : > { %4256 = vst.msk [vmem:[%s9301_s24] sm:$0xff] %vm1880_vm4, %v4224_v33  ;;  %v9763_v21 = vmax.f32 %v9027_v63, 0.0  ;;  %v9764_v5 = vmax.f32 %v9046_v46, 0.0  ;;  %v4234_v11 = vmul.f32 %v9284_v25, %v4047_v42  ;;  %v4235_v0 = vmul.f32 %v9284_v25, %v9765_v28 }
 0x5da   : > { %4257 = vst.msk [vmem:[%s9301_s24 + $0x8] sm:$0xff] %vm1880_vm4, %v4225_v14  ;;  %v4236_v63 = vmul.f32 %v9284_v25, %v4049_v15  ;;  %v4237_v46 = vmul.f32 %v9284_v25, %v4050_v23  ;;  %v4238_v27 = vmul.f32 %v9284_v25, %v9766_v29  ;;  %v4239_v42 = vmul.f32 %v9284_v25, %v4052_v53 }
 0x5db   : > { %4258 = vst.msk [vmem:[%s9301_s24 + $0x10] sm:$0xff] %vm1880_vm4, %v4226_v16  ;;  %v4232_v38 = vmul.f32 %v9284_v25, %v9763_v21  ;;  %v4233_v31 = vmul.f32 %v9284_v25, %v9764_v5  ;;  %v4240_v34 = vmul.f32 %v9284_v25, %v4053_v17  ;;  %v4241_v8 = vmul.f32 %v9284_v25, %v4054_v19 }
 0x5dc   : > { %4259 = vst.msk [vmem:[%s9301_s24 + $0x18] sm:$0xff] %vm1880_vm4, %v4227_v49  ;;  %v9767_v15 = vmax.f32 %v9138_v52, 0.0  ;;  %v4243_v23 = vmul.f32 %v9284_v25, %v4056_v50  ;;  %v4244_v4 = vmul.f32 %v9284_v25, %v9768_v39  ;;  %v9769_v53 = vmax.f32 %v9177_v30, 0.0 }
 0x5dd   : > { %4260 = vst.msk [vmem:[%s9301_s24 + $0x20] sm:$0xff] %vm1880_vm4, %v4228_v43  ;;  %v9770_v52 = vmax.f32 %v9186_v40, 0.0  ;;  %v4247_v19 = vmul.f32 %v9284_v25, %v9771_v48  ;;  %v4248_v50 = vmul.f32 %v9284_v25, %v9772_v12  ;;  %v9773_v30 = vmax.f32 %v9211_v47, 0.0 }
 0x5de   : > { %4261 = vst.msk [vmem:[%s9301_s24 + $0x28] sm:$0xff] %vm1880_vm4, %v4229_v59  ;;  %v4242_v54 = vmul.f32 %v9284_v25, %v9767_v15  ;;  %v4245_v61 = vmul.f32 %v9284_v25, %v9769_v53  ;;  %v4250_v62 = vmul.f32 %v9284_v25, %v9774_v41  ;;  %v4251_v51 = vmul.f32 %v9284_v25, %v9775_v55 }
 0x5df   : > { %4262 = vst.msk [vmem:[%s9301_s24 + $0x30] sm:$0xff] %vm1880_vm4, %v4230_v2  ;;  %v4246_v17 = vmul.f32 %v9284_v25, %v9770_v52  ;;  %v4249_v40 = vmul.f32 %v9284_v25, %v9773_v30  ;;  %v9776_v47 = vmax.f32 %v9235_v57, 0.0  ;;  %v4253_v9 = vmul.f32 %v9284_v25, %v9777_v26 }
 0x5e0   : > { %4263 = vst.msk [vmem:[%s9301_s24 + $0x38] sm:$0xff] %vm1880_vm4, %v4231_v22  ;;  %v4254_v24 = vmul.f32 %v9284_v25, %v9778_v58  ;;  %v4255_v57 = vmul.f32 %v9284_v25, %v4068_v35 }
 0x5e1   : > { %4264 = vst.msk [vmem:[%s9301_s24 + $0x40] sm:$0xff] %vm1880_vm4, %v4232_v38  ;;  %v4252_v7 = vmul.f32 %v9284_v25, %v9776_v47 }
 0x5e2   : > { %4265 = vst.msk [vmem:[%s9301_s24 + $0x48] sm:$0xff] %vm1880_vm4, %v4233_v31 }
 0x5e3   : > { %4266 = vst.msk [vmem:[%s9301_s24 + $0x50] sm:$0xff] %vm1880_vm4, %v4234_v11 }
 0x5e4   : > { %4267 = vst.msk [vmem:[%s9301_s24 + $0x58] sm:$0xff] %vm1880_vm4, %v4235_v0 }
 0x5e5   : > { %4268 = vst.msk [vmem:[%s9301_s24 + $0x60] sm:$0xff] %vm1880_vm4, %v4236_v63 }
 0x5e6   : > { %4269 = vst.msk [vmem:[%s9301_s24 + $0x68] sm:$0xff] %vm1880_vm4, %v4237_v46 }
 0x5e7   : > { %4270 = vst.msk [vmem:[%s9301_s24 + $0x70] sm:$0xff] %vm1880_vm4, %v4238_v27 }
 0x5e8   : > { %4271 = vst.msk [vmem:[%s9301_s24 + $0x78] sm:$0xff] %vm1880_vm4, %v4239_v42 }
 0x5e9   : > { %4272 = vst.msk [vmem:[%s9301_s24 + $0x80] sm:$0xff] %vm1880_vm4, %v4240_v34 }
 0x5ea   : > { %4273 = vst.msk [vmem:[%s9301_s24 + $0x88] sm:$0xff] %vm1880_vm4, %v4241_v8 }
 0x5eb   : > { %4274 = vst.msk [vmem:[%s9301_s24 + $0x90] sm:$0xff] %vm1880_vm4, %v4242_v54 }
 0x5ec   : > { %4275 = vst.msk [vmem:[%s9301_s24 + $0x98] sm:$0xff] %vm1880_vm4, %v4243_v23 }
 0x5ed   : > { %4276 = vst.msk [vmem:[%s9301_s24 + $0xa0] sm:$0xff] %vm1880_vm4, %v4244_v4 }
 0x5ee   : > { %4277 = vst.msk [vmem:[%s9301_s24 + $0xa8] sm:$0xff] %vm1880_vm4, %v4245_v61 }
 0x5ef   : > { %4278 = vst.msk [vmem:[%s9301_s24 + $0xb0] sm:$0xff] %vm1880_vm4, %v4246_v17 }
 0x5f0   : > { %4279 = vst.msk [vmem:[%s9301_s24 + $0xb8] sm:$0xff] %vm1880_vm4, %v4247_v19 }
 0x5f1   : > { %4280 = vst.msk [vmem:[%s9301_s24 + $0xc0] sm:$0xff] %vm1880_vm4, %v4248_v50 }
 0x5f2   : > { %4281 = vst.msk [vmem:[%s9301_s24 + $0xc8] sm:$0xff] %vm1880_vm4, %v4249_v40 }
 0x5f3   : > { %4282 = vst.msk [vmem:[%s9301_s24 + $0xd0] sm:$0xff] %vm1880_vm4, %v4250_v62 }
 0x5f4   : > { %4283 = vst.msk [vmem:[%s9301_s24 + $0xd8] sm:$0xff] %vm1880_vm4, %v4251_v51 }
 0x5f5   : > { %4284 = vst.msk [vmem:[%s9301_s24 + $0xe0] sm:$0xff] %vm1880_vm4, %v4252_v7 }
 0x5f6   : > { %4285 = vst.msk [vmem:[%s9301_s24 + $0xe8] sm:$0xff] %vm1880_vm4, %v4253_v9 }
 0x5f7   : > { %4286 = vst.msk [vmem:[%s9301_s24 + $0xf0] sm:$0xff] %vm1880_vm4, %v4254_v24 }
 0x5f8   : > { %4287 = vst.msk [vmem:[%s9301_s24 + $0xf8] sm:$0xff] %vm1880_vm4, %v4255_v57 }
 0x5f9   : > { %5764 = shalt.err (!%p5761_p3)
}
 0x5fa   : > { %s5813_s12 = smov 128   ;;  %s9779_s24 = smov 8  }
 0x5fb   : > { %4516 = dma.vmem_to_hbm [thread:$0]  (%p5912_p5), %s4302_s29, 4096, %s4304_s30, %s4289_s14, %s5813_s12, %s5813_s12, %s9779_s24  }
 0x5fc PF: > { %p4522_p4 = scmp.ge.s32.totalorder %s5799_s20, 2  ;;  %s4318_s21 = sand.u32 1, %s5787_s17  }
 0x5fd   : > { %s4319_s0 = scalar_lea.sflag [#allocation5], %s4318_s21 }
 0x5fe   : > { %p4519_p7 = pnand %p4522_p4, %p5916_p6 }
 0x600   : > { %p4520_p8 = pneg %p4519_p7 }
 0x602   : > { %5782 = dma.done.wait (%p4520_p8), %s4319_s0, 4096  }
 0x603   : > { %5784 = vsyncadd (%p4520_p8), %s4319_s0, 4294963200  ;;  %p21_p9 = scmp.ge.s32.totalorder %s5899_s23, 4   ;;  %s9780_s17 = smov %s5791_s18 }
 0x604   : > { %s9781_s18 = smov %s5795_s19  ;;  %s9782_s19 = smov %s5910_s26 }
 0x605   : > { %s9783_s20 = smov %s5899_s23  ;;  %23 = sbr.rel (!%p21_p9) target bundleno = 5 (0x5), region = 101 }
 0x60a   :  { %4325 = vsyncpa [#allocation5], 1 }
 0x60b   :  { %4327 = vsyncpa [#allocation5 + $0x1], 1 }

</bundles_post_ra>
